<compile_context>
chip_gen: v7x
topology: tpu7x:2x2x1
jax: 0.10.0
libtpu: 0.0.40
codegen_flags: <defaults>
</compile_context>

<pallas_src>
import functools
import math

import jax
import jax.numpy as jnp
from jax.experimental import pallas as pl
from jax.experimental.pallas import tpu as pltpu


def _transformer_layer_kernel(
    q_ref, k_ref, v_ref,
    wq_ref, bq_ref, wk_ref, bk_ref, wv_ref, bv_ref,
    wo_ref, bo_ref,
    ln1_g_ref, ln1_b_ref,
    w1_ref, b1_ref, w2_ref, b2_ref,
    ln2_g_ref, ln2_b_ref,
    out_ref,
    *, n_heads, d_k, ln_eps,
):
    bb, S, D = q_ref.shape
    N = bb * S

    # f32 copies of the streamed activations (residual / LayerNorm path is f32).
    q2 = q_ref[...].astype(jnp.float32).reshape(N, D)
    k2 = k_ref[...].astype(jnp.float32).reshape(N, D)
    v2 = v_ref[...].astype(jnp.float32).reshape(N, D)

    def linear(x_f32, w_ref, b_ref):
        # bf16 operands on the MXU, f32 accumulation, f32 bias / epilogue.
        return jnp.dot(x_f32.astype(jnp.bfloat16), w_ref[...],
                       preferred_element_type=jnp.float32) + b_ref[...]

    # Q/K/V projections as single lane-dense (N, D) x (D, D) matmuls.
    # NOTE: 1/sqrt(d_k) is already folded into Wq / bq by the wrapper.
    qp = linear(q2, wq_ref, bq_ref)
    kp = linear(k2, wk_ref, bk_ref)
    vp = linear(v2, wv_ref, bv_ref)

    # Head-major relayout: (N, D) -> (H*bb, S, d_k), bf16. One-time static lane
    # slices + a single axis-0 concat, so every attention matmul / the softmax
    # below runs head-BATCHED instead of as H tiny per-head ops.
    def to_heads(x):
        x = x.astype(jnp.bfloat16).reshape(bb, S, D)
        return jnp.concatenate(
            [x[:, :, h * d_k:(h + 1) * d_k] for h in range(n_heads)], axis=0)

    qh = to_heads(qp)          # (H*bb, S, d_k)
    kh = to_heads(kp)
    vh = to_heads(vp)

    # Strict-causal mask: a query may only attend to strictly-past keys.
    row = jax.lax.broadcasted_iota(jnp.int32, (S, S), 0)
    col = jax.lax.broadcasted_iota(jnp.int32, (S, S), 1)
    allowed = (col < row)[None]                         # (1, S, S), bcast over H*bb

    # Batched QK^T (bf16 operands, f32 scores), softmax in f32.
    s = jnp.einsum("bqd,bkd->bqk", qh, kh,
                   preferred_element_type=jnp.float32)  # (H*bb, S, S)
    s = jnp.where(allowed, s, -1e32)
    m = jnp.max(s, axis=-1, keepdims=True)
    e = jnp.exp(s - m)
    denom = jnp.sum(e, axis=-1, keepdims=True)
    p = (e * pl.reciprocal(denom, approx=True)).astype(jnp.bfloat16)

    # Batched P @ V.
    o = jnp.einsum("bqk,bkd->bqd", p, vh,
                   preferred_element_type=jnp.float32)  # (H*bb, S, d_k) f32

    # zero_pad=True: zero the first query row's attention output (equivalent to
    # zeroing its post-softmax scores); after the output projection that row is
    # exactly bo. One select total, instead of a per-head select on (S, S).
    q_not_first = jax.lax.broadcasted_iota(jnp.int32, (1, S, 1), 1) >= 1
    o = jnp.where(q_not_first, o, 0.0).astype(jnp.bfloat16)

    # Output projection WITHOUT re-concatenating heads along lanes:
    #   concat_h(o_h) @ Wo == sum_h  o_h @ Wo[h*d_k:(h+1)*d_k, :]
    mm = jnp.dot(o[0:bb].reshape(N, d_k), wo_ref[0:d_k, :],
                 preferred_element_type=jnp.float32)
    for h in range(1, n_heads):
        o_h = o[h * bb:(h + 1) * bb].reshape(N, d_k)        # major-dim slice
        mm = mm + jnp.dot(o_h, wo_ref[h * d_k:(h + 1) * d_k, :],
                          preferred_element_type=jnp.float32)
    attn = mm + bo_ref[...]

    def layer_norm(x, g_ref, b_ref):
        mu = jnp.mean(x, axis=-1, keepdims=True)
        var = jnp.mean(jnp.square(x - mu), axis=-1, keepdims=True)
        return (x - mu) * jax.lax.rsqrt(var + ln_eps) * g_ref[...] + b_ref[...]

    x = layer_norm(q2 + attn, ln1_g_ref, ln1_b_ref)          # residual + LN1

    h1 = jnp.maximum(linear(x, w1_ref, b1_ref), 0.0)         # Linear -> ReLU
    ff = linear(h1, w2_ref, b2_ref)                          # -> Linear
    y = layer_norm(x + ff, ln2_g_ref, ln2_b_ref)             # residual + LN2

    out_ref[...] = y.reshape(bb, S, D).astype(out_ref.dtype)


def _vmem_budget_bytes(block_b, S, D, d_ff, n_heads):
    """Rough per-grid-step VMEM working set: double-buffered pipelined blocks +
    resident weights + the non-pipelined in-kernel intermediates."""
    f32, bf16 = 4, 2
    n = block_b * S
    io = 4 * 2 * n * D * f32                               # q/k/v/out, 2 buffers each
    weights = (4 * D * D + 2 * D * d_ff) * bf16 \
              + (8 * D + 2 * d_ff) * f32                   # biases + LN affine
    inter = (3 * n * D * (f32 + bf16)                      # qp/kp/vp (+ head-major bf16)
             + 2 * block_b * n_heads * S * S * f32         # scores + probs (not tiled)
             + n * d_ff * (f32 + bf16)                     # FFN hidden
             + 6 * n * D * f32)                            # attn / residual / LN temps
    return io + weights + inter


def transformer_layer_forward(query, key, values, params, *, n_heads,
                              block_b=None, ln_eps=1e-5):
    """Fused TransformerLayer forward. query/key/values: (B, S, d_model), f32."""
    B, S, D = query.shape
    assert key.shape == (B, S, D) and values.shape == (B, S, D)
    assert D % n_heads == 0
    d_k = D // n_heads
    d_ff = params["W1"].shape[1]

    if block_b is None:
        # grid >= 2 so v7x can shard the batch across its 2 TensorCores and the
        # BlockSpec pipeline overlaps q/k/v DMA / output writeback with compute.
        block_b = B // 2 if (B % 2 == 0 and B >= 2) else B
        # Cap block_b so the working set (O(S^2) scores included) stays well
        # under v7x's 64 MiB VMEM.
        while (block_b > 1 and block_b % 2 == 0
               and _vmem_budget_bytes(block_b, S, D, d_ff, n_heads) > (48 << 20)):
            block_b //= 2
    assert B % block_b == 0, "batch must be divisible by block_b"
    grid = (B // block_b,)

    scale = 1.0 / math.sqrt(d_k)
    as_bf16 = lambda w: jnp.asarray(w, jnp.bfloat16)
    as_f32 = lambda w: jnp.asarray(w, jnp.float32)

    # MXU matmul weights in bf16 (f32 accumulation happens in the kernel);
    # biases / LayerNorm affine stay f32. 1/sqrt(d_k) folded into Wq/bq (free).
    weights = [
        as_bf16(params["Wq"] * scale), as_f32(params["bq"] * scale),
        as_bf16(params["Wk"]), as_f32(params["bk"]),
        as_bf16(params["Wv"]), as_f32(params["bv"]),
        as_bf16(params["Wo"]), as_f32(params["bo"]),
        as_f32(params["g1"]), as_f32(params["be1"]),
        as_bf16(params["W1"]), as_f32(params["b1"]),
        as_bf16(params["W2"]), as_f32(params["b2"]),
        as_f32(params["g2"]), as_f32(params["be2"]),
    ]

    def data_spec():
        return pl.BlockSpec((block_b, S, D), lambda i: (i, 0, 0))

    def full_spec(a):
        nd = a.ndim
        # Constant index_map -> block stays VMEM-resident across grid steps.
        return pl.BlockSpec(a.shape, lambda i, _nd=nd: (0,) * _nd)

    kernel = functools.partial(_transformer_layer_kernel,
                               n_heads=n_heads, d_k=d_k, ln_eps=float(ln_eps))

    budget = _vmem_budget_bytes(block_b, S, D, d_ff, n_heads)
    vmem_limit = int(min(max(2 * budget, 32 << 20), 100 << 20))

    return pl.pallas_call(
        kernel,
        out_shape=jax.ShapeDtypeStruct((B, S, D), jnp.float32),
        grid_spec=pltpu.PrefetchScalarGridSpec(
            num_scalar_prefetch=0,
            grid=grid,
            in_specs=[data_spec(), data_spec(), data_spec()]
                     + [full_spec(w) for w in weights],
            out_specs=data_spec(),
        ),
        compiler_params=pltpu.CompilerParams(
            dimension_semantics=("parallel",),
            vmem_limit_bytes=vmem_limit,
        ),
    )(query, key, values, *weights)


def init_transformer_layer_params(key, d_model, d_ff, kq_same=True):
    """Deterministic params mirroring the torch module's shapes / _reset_parameters."""
    ks = jax.random.split(key, 12)

    def xavier(k, shape):
        lim = math.sqrt(6.0 / (shape[0] + shape[1]))
        return jax.random.uniform(k, shape, jnp.float32, -lim, lim)

    def small_uniform(k, shape, lim):
        return jax.random.uniform(k, shape, jnp.float32, -lim, lim)

    zeros_d = jnp.zeros((1, d_model), jnp.float32)

    Wk = xavier(ks[0], (d_model, d_model))
    Wv = xavier(ks[1], (d_model, d_model))
    Wq = Wk if kq_same else xavier(ks[2], (d_model, d_model))   # kq_same -> shared proj
    Wo = small_uniform(ks[3], (d_model, d_model), 1.0 / math.sqrt(d_model))

    W1 = small_uniform(ks[4], (d_model, d_ff), 1.0 / math.sqrt(d_model))
    b1 = small_uniform(ks[5], (1, d_ff), 1.0 / math.sqrt(d_model))
    W2 = small_uniform(ks[6], (d_ff, d_model), 1.0 / math.sqrt(d_ff))
    b2 = small_uniform(ks[7], (1, d_model), 1.0 / math.sqrt(d_ff))

    # LayerNorm affine: torch init is ones/zeros; perturb so the affine path is
    # actually exercised by the numerical check.
    g1 = 1.0 + 0.1 * jax.random.normal(ks[8], (1, d_model), jnp.float32)
    g2 = 1.0 + 0.1 * jax.random.normal(ks[9], (1, d_model), jnp.float32)
    be1 = 0.05 * jax.random.normal(ks[10], (1, d_model), jnp.float32)
    be2 = 0.05 * jax.random.normal(ks[11], (1, d_model), jnp.float32)

    return dict(Wq=Wq, bq=zeros_d, Wk=Wk, bk=zeros_d, Wv=Wv, bv=zeros_d,
                Wo=Wo, bo=zeros_d, g1=g1, be1=be1,
                W1=W1, b1=b1, W2=W2, b2=b2, g2=g2, be2=be2)


def _reference_transformer_layer(q, k, v, p, *, n_heads, ln_eps=1e-5):
    """Pure-JAX reference matching the torch forward (eval mode), f32/HIGHEST."""
    hp = jax.lax.Precision.HIGHEST
    B, S, D = q.shape
    d_k = D // n_heads

    def lin(x, W, b):
        return jnp.einsum("bsd,de->bse", x, W, precision=hp) + b

    def split_heads(x):
        return x.reshape(B, S, n_heads, d_k).transpose(0, 2, 1, 3)

    qp = split_heads(lin(q, p["Wq"], p["bq"]))
    kp = split_heads(lin(k, p["Wk"], p["bk"]))
    vp = split_heads(lin(v, p["Wv"], p["bv"]))

    scores = jnp.einsum("bhqd,bhkd->bhqk", qp, kp, precision=hp) / math.sqrt(d_k)
    i = jnp.arange(S)[:, None]
    j = jnp.arange(S)[None, :]
    scores = jnp.where((j < i)[None, None], scores, -1e32)
    probs = jax.nn.softmax(scores, axis=-1)
    probs = jnp.where((i >= 1)[None, None], probs, 0.0)      # zero_pad=True

    attn = jnp.einsum("bhqk,bhkd->bhqd", probs, vp, precision=hp)
    attn = attn.transpose(0, 2, 1, 3).reshape(B, S, D)
    attn = lin(attn, p["Wo"], p["bo"])

    def layer_norm(x, g, b):
        mu = jnp.mean(x, axis=-1, keepdims=True)
        var = jnp.mean(jnp.square(x - mu), axis=-1, keepdims=True)
        return (x - mu) / jnp.sqrt(var + ln_eps) * g + b

    x = layer_norm(q + attn, p["g1"], p["be1"])
    ff = jnp.maximum(lin(x, p["W1"], p["b1"]), 0.0)
    ff = lin(ff, p["W2"], p["b2"])
    return layer_norm(x + ff, p["g2"], p["be2"])


if __name__ == "__main__":
    # Small but lane-dense shapes consistent with the module (d_model % 128 == 0).
    B, S, D, H, D_FF = 4, 32, 128, 4, 256

    root = jax.random.PRNGKey(0)
    k_params, k_q, k_k, k_v = jax.random.split(root, 4)

    params = init_transformer_layer_params(k_params, D, D_FF, kq_same=True)
    q = jax.random.normal(k_q, (B, S, D), jnp.float32)
    k = jax.random.normal(k_k, (B, S, D), jnp.float32)
    v = jax.random.normal(k_v, (B, S, D), jnp.float32)

    out = transformer_layer_forward(q, k, v, params, n_heads=H)   # block_b auto -> 2
    jax.block_until_ready(out)

    ref = _reference_transformer_layer(q, k, v, params, n_heads=H)
    assert out.shape == (B, S, D)
    # Tolerances account for bf16 matmul operands (f32 accumulation) and the
    # approximate softmax reciprocal vs. the HIGHEST-precision f32 XLA reference
    # (~1e-2-scale absolute deviations after two LayerNorms). Structural bugs
    # (mask / zero_pad / residual / LayerNorm / head mixing) give O(1) errors,
    # so these bounds still separate correct from broken kernels.
    abs_err = jnp.abs(out - ref)
    max_err = float(jnp.max(abs_err))
    mean_err = float(jnp.mean(abs_err))
    assert max_err < 1.5e-1, f"max abs error {max_err}"
    assert mean_err < 2.5e-2, f"mean abs error {mean_err}"
    print("KERNEL_OK")
</pallas_src>

<mosaic_0001>
module attributes {stable_mosaic.version = 11 : i64} {
  func.func @_transformer_layer_kernel(%arg0: i32, %arg1: memref<2x32x128xf32, #tpu.memory_space<vmem>>, %arg2: memref<2x32x128xf32, #tpu.memory_space<vmem>>, %arg3: memref<2x32x128xf32, #tpu.memory_space<vmem>>, %arg4: memref<128x128xbf16, #tpu.memory_space<vmem>>, %arg5: memref<1x128xf32, #tpu.memory_space<vmem>>, %arg6: memref<128x128xbf16, #tpu.memory_space<vmem>>, %arg7: memref<1x128xf32, #tpu.memory_space<vmem>>, %arg8: memref<128x128xbf16, #tpu.memory_space<vmem>>, %arg9: memref<1x128xf32, #tpu.memory_space<vmem>>, %arg10: memref<128x128xbf16, #tpu.memory_space<vmem>>, %arg11: memref<1x128xf32, #tpu.memory_space<vmem>>, %arg12: memref<1x128xf32, #tpu.memory_space<vmem>>, %arg13: memref<1x128xf32, #tpu.memory_space<vmem>>, %arg14: memref<128x256xbf16, #tpu.memory_space<vmem>>, %arg15: memref<1x256xf32, #tpu.memory_space<vmem>>, %arg16: memref<256x128xbf16, #tpu.memory_space<vmem>>, %arg17: memref<1x128xf32, #tpu.memory_space<vmem>>, %arg18: memref<1x128xf32, #tpu.memory_space<vmem>>, %arg19: memref<1x128xf32, #tpu.memory_space<vmem>>, %arg20: memref<2x32x128xf32, #tpu.memory_space<vmem>>) attributes {dimension_semantics = [#tpu.dimension_semantics<parallel>], iteration_bounds = array<i64: 2>, scalar_prefetch = 0 : i64, scratch_operands = 0 : i64, tpu.core_type = #tpu.core_type<tc>, window_params = [{transform_indices = @transform_0, window_bounds = array<i64: 2, 32, 128>}, {transform_indices = @transform_1, window_bounds = array<i64: 2, 32, 128>}, {transform_indices = @transform_2, window_bounds = array<i64: 2, 32, 128>}, {pipeline_mode = #tpu.pipeline_mode<synchronous>, transform_indices = @transform_3, window_bounds = array<i64: 128, 128>}, {pipeline_mode = #tpu.pipeline_mode<synchronous>, transform_indices = @transform_4, window_bounds = array<i64: 1, 128>}, {pipeline_mode = #tpu.pipeline_mode<synchronous>, transform_indices = @transform_5, window_bounds = array<i64: 128, 128>}, {pipeline_mode = #tpu.pipeline_mode<synchronous>, transform_indices = @transform_6, window_bounds = array<i64: 1, 128>}, {pipeline_mode = #tpu.pipeline_mode<synchronous>, transform_indices = @transform_7, window_bounds = array<i64: 128, 128>}, {pipeline_mode = #tpu.pipeline_mode<synchronous>, transform_indices = @transform_8, window_bounds = array<i64: 1, 128>}, {pipeline_mode = #tpu.pipeline_mode<synchronous>, transform_indices = @transform_9, window_bounds = array<i64: 128, 128>}, {pipeline_mode = #tpu.pipeline_mode<synchronous>, transform_indices = @transform_10, window_bounds = array<i64: 1, 128>}, {pipeline_mode = #tpu.pipeline_mode<synchronous>, transform_indices = @transform_11, window_bounds = array<i64: 1, 128>}, {pipeline_mode = #tpu.pipeline_mode<synchronous>, transform_indices = @transform_12, window_bounds = array<i64: 1, 128>}, {pipeline_mode = #tpu.pipeline_mode<synchronous>, transform_indices = @transform_13, window_bounds = array<i64: 128, 256>}, {pipeline_mode = #tpu.pipeline_mode<synchronous>, transform_indices = @transform_14, window_bounds = array<i64: 1, 256>}, {pipeline_mode = #tpu.pipeline_mode<synchronous>, transform_indices = @transform_15, window_bounds = array<i64: 256, 128>}, {pipeline_mode = #tpu.pipeline_mode<synchronous>, transform_indices = @transform_16, window_bounds = array<i64: 1, 128>}, {pipeline_mode = #tpu.pipeline_mode<synchronous>, transform_indices = @transform_17, window_bounds = array<i64: 1, 128>}, {pipeline_mode = #tpu.pipeline_mode<synchronous>, transform_indices = @transform_18, window_bounds = array<i64: 1, 128>}, {transform_indices = @transform_19, window_bounds = array<i64: 2, 32, 128>}]} {
    %c0 = arith.constant 0 : index
    %c0_0 = arith.constant 0 : index
    %c0_1 = arith.constant 0 : index
    %0 = vector.load %arg1[%c0, %c0_0, %c0_1] : memref<2x32x128xf32, #tpu.memory_space<vmem>>, vector<2x32x128xf32>
    %1 = vector.shape_cast %0 : vector<2x32x128xf32> to vector<64x128xf32>
    %c0_2 = arith.constant 0 : index
    %c0_3 = arith.constant 0 : index
    %c0_4 = arith.constant 0 : index
    %2 = vector.load %arg2[%c0_2, %c0_3, %c0_4] : memref<2x32x128xf32, #tpu.memory_space<vmem>>, vector<2x32x128xf32>
    %3 = vector.shape_cast %2 : vector<2x32x128xf32> to vector<64x128xf32>
    %c0_5 = arith.constant 0 : index
    %c0_6 = arith.constant 0 : index
    %c0_7 = arith.constant 0 : index
    %4 = vector.load %arg3[%c0_5, %c0_6, %c0_7] : memref<2x32x128xf32, #tpu.memory_space<vmem>>, vector<2x32x128xf32>
    %5 = vector.shape_cast %4 : vector<2x32x128xf32> to vector<64x128xf32>
    %6 = arith.truncf %1 : vector<64x128xf32> to vector<64x128xbf16>
    %c0_8 = arith.constant 0 : index
    %c0_9 = arith.constant 0 : index
    %7 = vector.load %arg4[%c0_8, %c0_9] : memref<128x128xbf16, #tpu.memory_space<vmem>>, vector<128x128xbf16>
    %cst = arith.constant dense<0.000000e+00> : vector<64x128xf32>
    %8 = tpu.matmul %6, %7, %cst {dimension_numbers = #tpu.dot_dimension_numbers<[1], [0], [0], [1], [0, 0, 1, 1], [], []>} : vector<64x128xbf16>, vector<128x128xbf16>, vector<64x128xf32> -> vector<64x128xf32>
    %c0_10 = arith.constant 0 : index
    %c0_11 = arith.constant 0 : index
    %9 = vector.load %arg5[%c0_10, %c0_11] : memref<1x128xf32, #tpu.memory_space<vmem>>, vector<1x128xf32>
    %10 = vector.broadcast %9 : vector<1x128xf32> to vector<64x128xf32>
    %11 = arith.addf %8, %10 : vector<64x128xf32>
    %12 = arith.truncf %3 : vector<64x128xf32> to vector<64x128xbf16>
    %c0_12 = arith.constant 0 : index
    %c0_13 = arith.constant 0 : index
    %13 = vector.load %arg6[%c0_12, %c0_13] : memref<128x128xbf16, #tpu.memory_space<vmem>>, vector<128x128xbf16>
    %cst_14 = arith.constant dense<0.000000e+00> : vector<64x128xf32>
    %14 = tpu.matmul %12, %13, %cst_14 {dimension_numbers = #tpu.dot_dimension_numbers<[1], [0], [0], [1], [0, 0, 1, 1], [], []>} : vector<64x128xbf16>, vector<128x128xbf16>, vector<64x128xf32> -> vector<64x128xf32>
    %c0_15 = arith.constant 0 : index
    %c0_16 = arith.constant 0 : index
    %15 = vector.load %arg7[%c0_15, %c0_16] : memref<1x128xf32, #tpu.memory_space<vmem>>, vector<1x128xf32>
    %16 = vector.broadcast %15 : vector<1x128xf32> to vector<64x128xf32>
    %17 = arith.addf %14, %16 : vector<64x128xf32>
    %18 = arith.truncf %5 : vector<64x128xf32> to vector<64x128xbf16>
    %c0_17 = arith.constant 0 : index
    %c0_18 = arith.constant 0 : index
    %19 = vector.load %arg8[%c0_17, %c0_18] : memref<128x128xbf16, #tpu.memory_space<vmem>>, vector<128x128xbf16>
    %cst_19 = arith.constant dense<0.000000e+00> : vector<64x128xf32>
    %20 = tpu.matmul %18, %19, %cst_19 {dimension_numbers = #tpu.dot_dimension_numbers<[1], [0], [0], [1], [0, 0, 1, 1], [], []>} : vector<64x128xbf16>, vector<128x128xbf16>, vector<64x128xf32> -> vector<64x128xf32>
    %c0_20 = arith.constant 0 : index
    %c0_21 = arith.constant 0 : index
    %21 = vector.load %arg9[%c0_20, %c0_21] : memref<1x128xf32, #tpu.memory_space<vmem>>, vector<1x128xf32>
    %22 = vector.broadcast %21 : vector<1x128xf32> to vector<64x128xf32>
    %23 = arith.addf %20, %22 : vector<64x128xf32>
    %24 = arith.truncf %11 : vector<64x128xf32> to vector<64x128xbf16>
    %25 = vector.shape_cast %24 : vector<64x128xbf16> to vector<2x32x128xbf16>
    %26 = vector.extract_strided_slice %25 {offsets = [0, 0, 0], sizes = [2, 32, 32], strides = [1, 1, 1]} : vector<2x32x128xbf16> to vector<2x32x32xbf16>
    %27 = vector.extract_strided_slice %25 {offsets = [0, 0, 32], sizes = [2, 32, 32], strides = [1, 1, 1]} : vector<2x32x128xbf16> to vector<2x32x32xbf16>
    %28 = vector.extract_strided_slice %25 {offsets = [0, 0, 64], sizes = [2, 32, 32], strides = [1, 1, 1]} : vector<2x32x128xbf16> to vector<2x32x32xbf16>
    %29 = vector.extract_strided_slice %25 {offsets = [0, 0, 96], sizes = [2, 32, 32], strides = [1, 1, 1]} : vector<2x32x128xbf16> to vector<2x32x32xbf16>
    %30 = tpu.concatenate %26, %27, %28, %29 in 0 : vector<2x32x32xbf16>, vector<2x32x32xbf16>, vector<2x32x32xbf16>, vector<2x32x32xbf16> -> vector<8x32x32xbf16>
    %31 = arith.truncf %17 : vector<64x128xf32> to vector<64x128xbf16>
    %32 = vector.shape_cast %31 : vector<64x128xbf16> to vector<2x32x128xbf16>
    %33 = vector.extract_strided_slice %32 {offsets = [0, 0, 0], sizes = [2, 32, 32], strides = [1, 1, 1]} : vector<2x32x128xbf16> to vector<2x32x32xbf16>
    %34 = vector.extract_strided_slice %32 {offsets = [0, 0, 32], sizes = [2, 32, 32], strides = [1, 1, 1]} : vector<2x32x128xbf16> to vector<2x32x32xbf16>
    %35 = vector.extract_strided_slice %32 {offsets = [0, 0, 64], sizes = [2, 32, 32], strides = [1, 1, 1]} : vector<2x32x128xbf16> to vector<2x32x32xbf16>
    %36 = vector.extract_strided_slice %32 {offsets = [0, 0, 96], sizes = [2, 32, 32], strides = [1, 1, 1]} : vector<2x32x128xbf16> to vector<2x32x32xbf16>
    %37 = tpu.concatenate %33, %34, %35, %36 in 0 : vector<2x32x32xbf16>, vector<2x32x32xbf16>, vector<2x32x32xbf16>, vector<2x32x32xbf16> -> vector<8x32x32xbf16>
    %38 = arith.truncf %23 : vector<64x128xf32> to vector<64x128xbf16>
    %39 = vector.shape_cast %38 : vector<64x128xbf16> to vector<2x32x128xbf16>
    %40 = vector.extract_strided_slice %39 {offsets = [0, 0, 0], sizes = [2, 32, 32], strides = [1, 1, 1]} : vector<2x32x128xbf16> to vector<2x32x32xbf16>
    %41 = vector.extract_strided_slice %39 {offsets = [0, 0, 32], sizes = [2, 32, 32], strides = [1, 1, 1]} : vector<2x32x128xbf16> to vector<2x32x32xbf16>
    %42 = vector.extract_strided_slice %39 {offsets = [0, 0, 64], sizes = [2, 32, 32], strides = [1, 1, 1]} : vector<2x32x128xbf16> to vector<2x32x32xbf16>
    %43 = vector.extract_strided_slice %39 {offsets = [0, 0, 96], sizes = [2, 32, 32], strides = [1, 1, 1]} : vector<2x32x128xbf16> to vector<2x32x32xbf16>
    %44 = tpu.concatenate %40, %41, %42, %43 in 0 : vector<2x32x32xbf16>, vector<2x32x32xbf16>, vector<2x32x32xbf16>, vector<2x32x32xbf16> -> vector<8x32x32xbf16>
    %45 = tpu.iota {dimensions = array<i32: 0>} : vector<32x32xi32>
    %46 = tpu.iota {dimensions = array<i32: 1>} : vector<32x32xi32>
    %47 = arith.cmpi slt, %46, %45 : vector<32x32xi32>
    %48 = vector.shape_cast %47 : vector<32x32xi1> to vector<1x32x32xi1>
    "tpu.trace_start"() <{level = 10 : i32, message = "bqd,bkd->bqk"}> : () -> ()
    %cst_22 = arith.constant dense<0.000000e+00> : vector<8x32x32xf32>
    %49 = tpu.matmul %30, %37, %cst_22 {dimension_numbers = #tpu.dot_dimension_numbers<[2], [2], [1], [1], [0, 0, 0, 1, 1, 1], [0], [0]>} : vector<8x32x32xbf16>, vector<8x32x32xbf16>, vector<8x32x32xf32> -> vector<8x32x32xf32>
    %cst_23 = arith.constant -1.000000e+32 : f32
    "tpu.trace_stop"() : () -> ()
    %50 = vector.shape_cast %48 : vector<1x32x32xi1> to vector<1x32x32xi1>
    %51 = vector.broadcast %50 : vector<1x32x32xi1> to vector<8x32x32xi1>
    %52 = vector.broadcast %cst_23 : f32 to vector<8x32x32xf32>
    %53 = arith.select %51, %49, %52 : vector<8x32x32xi1>, vector<8x32x32xf32>
    %cst_24 = arith.constant dense<0xFF800000> : vector<8x32xf32>
    %54 = vector.multi_reduction <maximumf>, %53, %cst_24 [2] : vector<8x32x32xf32> to vector<8x32xf32>
    %55 = vector.shape_cast %54 : vector<8x32xf32> to vector<8x32x1xf32>
    %56 = vector.broadcast %55 : vector<8x32x1xf32> to vector<8x32x32xf32>
    %57 = arith.subf %53, %56 : vector<8x32x32xf32>
    %58 = math.exp %57 : vector<8x32x32xf32>
    %cst_25 = arith.constant dense<0.000000e+00> : vector<8x32xf32>
    %59 = vector.multi_reduction <add>, %58, %cst_25 [2] : vector<8x32x32xf32> to vector<8x32xf32>
    %60 = vector.shape_cast %59 : vector<8x32xf32> to vector<8x32x1xf32>
    %61 = tpu.reciprocal %60 {approx = true} : vector<8x32x1xf32> -> vector<8x32x1xf32>
    %62 = vector.broadcast %61 : vector<8x32x1xf32> to vector<8x32x32xf32>
    %63 = arith.mulf %58, %62 : vector<8x32x32xf32>
    %64 = arith.truncf %63 : vector<8x32x32xf32> to vector<8x32x32xbf16>
    "tpu.trace_start"() <{level = 10 : i32, message = "bqk,bkd->bqd"}> : () -> ()
    %cst_26 = arith.constant dense<0.000000e+00> : vector<8x32x32xf32>
    %65 = tpu.matmul %64, %44, %cst_26 {dimension_numbers = #tpu.dot_dimension_numbers<[2], [1], [1], [2], [0, 0, 0, 1, 1, 2], [0], [0]>} : vector<8x32x32xbf16>, vector<8x32x32xbf16>, vector<8x32x32xf32> -> vector<8x32x32xf32>
    "tpu.trace_stop"() : () -> ()
    %66 = tpu.iota {dimensions = array<i32: 1>} : vector<1x32x1xi32>
    %c1_i32 = arith.constant 1 : i32
    %67 = vector.broadcast %c1_i32 : i32 to vector<1x32x1xi32>
    %68 = arith.cmpi sge, %66, %67 : vector<1x32x1xi32>
    %cst_27 = arith.constant 0.000000e+00 : f32
    %69 = vector.shape_cast %68 : vector<1x32x1xi1> to vector<1x32x1xi1>
    %70 = vector.broadcast %69 : vector<1x32x1xi1> to vector<8x32x32xi1>
    %71 = vector.broadcast %cst_27 : f32 to vector<8x32x32xf32>
    %72 = arith.select %70, %65, %71 : vector<8x32x32xi1>, vector<8x32x32xf32>
    %73 = arith.truncf %72 : vector<8x32x32xf32> to vector<8x32x32xbf16>
    %74 = vector.extract_strided_slice %73 {offsets = [0, 0, 0], sizes = [2, 32, 32], strides = [1, 1, 1]} : vector<8x32x32xbf16> to vector<2x32x32xbf16>
    %75 = vector.shape_cast %74 : vector<2x32x32xbf16> to vector<64x32xbf16>
    %c0_28 = arith.constant 0 : index
    %c0_29 = arith.constant 0 : index
    %76 = vector.load %arg10[%c0_28, %c0_29] : memref<128x128xbf16, #tpu.memory_space<vmem>>, vector<32x128xbf16>
    %cst_30 = arith.constant dense<0.000000e+00> : vector<64x128xf32>
    %77 = tpu.matmul %75, %76, %cst_30 {dimension_numbers = #tpu.dot_dimension_numbers<[1], [0], [0], [1], [0, 0, 1, 1], [], []>} : vector<64x32xbf16>, vector<32x128xbf16>, vector<64x128xf32> -> vector<64x128xf32>
    %78 = vector.extract_strided_slice %73 {offsets = [2, 0, 0], sizes = [2, 32, 32], strides = [1, 1, 1]} : vector<8x32x32xbf16> to vector<2x32x32xbf16>
    %79 = vector.shape_cast %78 : vector<2x32x32xbf16> to vector<64x32xbf16>
    %c32 = arith.constant 32 : index
    %c0_31 = arith.constant 0 : index
    %80 = vector.load %arg10[%c32, %c0_31] : memref<128x128xbf16, #tpu.memory_space<vmem>>, vector<32x128xbf16>
    %cst_32 = arith.constant dense<0.000000e+00> : vector<64x128xf32>
    %81 = tpu.matmul %79, %80, %cst_32 {dimension_numbers = #tpu.dot_dimension_numbers<[1], [0], [0], [1], [0, 0, 1, 1], [], []>} : vector<64x32xbf16>, vector<32x128xbf16>, vector<64x128xf32> -> vector<64x128xf32>
    %82 = arith.addf %77, %81 : vector<64x128xf32>
    %83 = vector.extract_strided_slice %73 {offsets = [4, 0, 0], sizes = [2, 32, 32], strides = [1, 1, 1]} : vector<8x32x32xbf16> to vector<2x32x32xbf16>
    %84 = vector.shape_cast %83 : vector<2x32x32xbf16> to vector<64x32xbf16>
    %c64 = arith.constant 64 : index
    %c0_33 = arith.constant 0 : index
    %85 = vector.load %arg10[%c64, %c0_33] : memref<128x128xbf16, #tpu.memory_space<vmem>>, vector<32x128xbf16>
    %cst_34 = arith.constant dense<0.000000e+00> : vector<64x128xf32>
    %86 = tpu.matmul %84, %85, %cst_34 {dimension_numbers = #tpu.dot_dimension_numbers<[1], [0], [0], [1], [0, 0, 1, 1], [], []>} : vector<64x32xbf16>, vector<32x128xbf16>, vector<64x128xf32> -> vector<64x128xf32>
    %87 = arith.addf %82, %86 : vector<64x128xf32>
    %88 = vector.extract_strided_slice %73 {offsets = [6, 0, 0], sizes = [2, 32, 32], strides = [1, 1, 1]} : vector<8x32x32xbf16> to vector<2x32x32xbf16>
    %89 = vector.shape_cast %88 : vector<2x32x32xbf16> to vector<64x32xbf16>
    %c96 = arith.constant 96 : index
    %c0_35 = arith.constant 0 : index
    %90 = vector.load %arg10[%c96, %c0_35] : memref<128x128xbf16, #tpu.memory_space<vmem>>, vector<32x128xbf16>
    %cst_36 = arith.constant dense<0.000000e+00> : vector<64x128xf32>
    %91 = tpu.matmul %89, %90, %cst_36 {dimension_numbers = #tpu.dot_dimension_numbers<[1], [0], [0], [1], [0, 0, 1, 1], [], []>} : vector<64x32xbf16>, vector<32x128xbf16>, vector<64x128xf32> -> vector<64x128xf32>
    %92 = arith.addf %87, %91 : vector<64x128xf32>
    %c0_37 = arith.constant 0 : index
    %c0_38 = arith.constant 0 : index
    %93 = vector.load %arg11[%c0_37, %c0_38] : memref<1x128xf32, #tpu.memory_space<vmem>>, vector<1x128xf32>
    %94 = vector.broadcast %93 : vector<1x128xf32> to vector<64x128xf32>
    %95 = arith.addf %92, %94 : vector<64x128xf32>
    %96 = arith.addf %1, %95 : vector<64x128xf32>
    %cst_39 = arith.constant dense<0.000000e+00> : vector<64xf32>
    %97 = vector.multi_reduction <add>, %96, %cst_39 [1] : vector<64x128xf32> to vector<64xf32>
    %98 = vector.shape_cast %97 : vector<64xf32> to vector<64x1xf32>
    %cst_40 = arith.constant 1.280000e+02 : f32
    %99 = vector.broadcast %cst_40 : f32 to vector<64x1xf32>
    %100 = arith.divf %98, %99 : vector<64x1xf32>
    %101 = vector.broadcast %100 : vector<64x1xf32> to vector<64x128xf32>
    %102 = arith.subf %96, %101 : vector<64x128xf32>
    %103 = arith.mulf %102, %102 : vector<64x128xf32>
    %cst_41 = arith.constant dense<0.000000e+00> : vector<64xf32>
    %104 = vector.multi_reduction <add>, %103, %cst_41 [1] : vector<64x128xf32> to vector<64xf32>
    %105 = vector.shape_cast %104 : vector<64xf32> to vector<64x1xf32>
    %cst_42 = arith.constant 1.280000e+02 : f32
    %106 = vector.broadcast %cst_42 : f32 to vector<64x1xf32>
    %107 = arith.divf %105, %106 : vector<64x1xf32>
    %108 = vector.broadcast %100 : vector<64x1xf32> to vector<64x128xf32>
    %109 = arith.subf %96, %108 : vector<64x128xf32>
    %cst_43 = arith.constant 9.99999974E-6 : f32
    %110 = vector.broadcast %cst_43 : f32 to vector<64x1xf32>
    %111 = arith.addf %107, %110 : vector<64x1xf32>
    %112 = math.rsqrt %111 : vector<64x1xf32>
    %113 = vector.broadcast %112 : vector<64x1xf32> to vector<64x128xf32>
    %114 = arith.mulf %109, %113 : vector<64x128xf32>
    %c0_44 = arith.constant 0 : index
    %c0_45 = arith.constant 0 : index
    %115 = vector.load %arg12[%c0_44, %c0_45] : memref<1x128xf32, #tpu.memory_space<vmem>>, vector<1x128xf32>
    %116 = vector.broadcast %115 : vector<1x128xf32> to vector<64x128xf32>
    %117 = arith.mulf %114, %116 : vector<64x128xf32>
    %c0_46 = arith.constant 0 : index
    %c0_47 = arith.constant 0 : index
    %118 = vector.load %arg13[%c0_46, %c0_47] : memref<1x128xf32, #tpu.memory_space<vmem>>, vector<1x128xf32>
    %119 = vector.broadcast %118 : vector<1x128xf32> to vector<64x128xf32>
    %120 = arith.addf %117, %119 : vector<64x128xf32>
    %121 = arith.truncf %120 : vector<64x128xf32> to vector<64x128xbf16>
    %c0_48 = arith.constant 0 : index
    %c0_49 = arith.constant 0 : index
    %122 = vector.load %arg14[%c0_48, %c0_49] : memref<128x256xbf16, #tpu.memory_space<vmem>>, vector<128x256xbf16>
    %cst_50 = arith.constant dense<0.000000e+00> : vector<64x256xf32>
    %123 = tpu.matmul %121, %122, %cst_50 {dimension_numbers = #tpu.dot_dimension_numbers<[1], [0], [0], [1], [0, 0, 1, 1], [], []>} : vector<64x128xbf16>, vector<128x256xbf16>, vector<64x256xf32> -> vector<64x256xf32>
    %c0_51 = arith.constant 0 : index
    %c0_52 = arith.constant 0 : index
    %124 = vector.load %arg15[%c0_51, %c0_52] : memref<1x256xf32, #tpu.memory_space<vmem>>, vector<1x256xf32>
    %125 = vector.broadcast %124 : vector<1x256xf32> to vector<64x256xf32>
    %126 = arith.addf %123, %125 : vector<64x256xf32>
    %cst_53 = arith.constant 0.000000e+00 : f32
    %127 = vector.broadcast %cst_53 : f32 to vector<64x256xf32>
    %128 = arith.maximumf %126, %127 : vector<64x256xf32>
    %129 = arith.truncf %128 : vector<64x256xf32> to vector<64x256xbf16>
    %c0_54 = arith.constant 0 : index
    %c0_55 = arith.constant 0 : index
    %130 = vector.load %arg16[%c0_54, %c0_55] : memref<256x128xbf16, #tpu.memory_space<vmem>>, vector<256x128xbf16>
    %cst_56 = arith.constant dense<0.000000e+00> : vector<64x128xf32>
    %131 = tpu.matmul %129, %130, %cst_56 {dimension_numbers = #tpu.dot_dimension_numbers<[1], [0], [0], [1], [0, 0, 1, 1], [], []>} : vector<64x256xbf16>, vector<256x128xbf16>, vector<64x128xf32> -> vector<64x128xf32>
    %c0_57 = arith.constant 0 : index
    %c0_58 = arith.constant 0 : index
    %132 = vector.load %arg17[%c0_57, %c0_58] : memref<1x128xf32, #tpu.memory_space<vmem>>, vector<1x128xf32>
    %133 = vector.broadcast %132 : vector<1x128xf32> to vector<64x128xf32>
    %134 = arith.addf %131, %133 : vector<64x128xf32>
    %135 = arith.addf %120, %134 : vector<64x128xf32>
    %cst_59 = arith.constant dense<0.000000e+00> : vector<64xf32>
    %136 = vector.multi_reduction <add>, %135, %cst_59 [1] : vector<64x128xf32> to vector<64xf32>
    %137 = vector.shape_cast %136 : vector<64xf32> to vector<64x1xf32>
    %cst_60 = arith.constant 1.280000e+02 : f32
    %138 = vector.broadcast %cst_60 : f32 to vector<64x1xf32>
    %139 = arith.divf %137, %138 : vector<64x1xf32>
    %140 = vector.broadcast %139 : vector<64x1xf32> to vector<64x128xf32>
    %141 = arith.subf %135, %140 : vector<64x128xf32>
    %142 = arith.mulf %141, %141 : vector<64x128xf32>
    %cst_61 = arith.constant dense<0.000000e+00> : vector<64xf32>
    %143 = vector.multi_reduction <add>, %142, %cst_61 [1] : vector<64x128xf32> to vector<64xf32>
    %144 = vector.shape_cast %143 : vector<64xf32> to vector<64x1xf32>
    %cst_62 = arith.constant 1.280000e+02 : f32
    %145 = vector.broadcast %cst_62 : f32 to vector<64x1xf32>
    %146 = arith.divf %144, %145 : vector<64x1xf32>
    %147 = vector.broadcast %139 : vector<64x1xf32> to vector<64x128xf32>
    %148 = arith.subf %135, %147 : vector<64x128xf32>
    %cst_63 = arith.constant 9.99999974E-6 : f32
    %149 = vector.broadcast %cst_63 : f32 to vector<64x1xf32>
    %150 = arith.addf %146, %149 : vector<64x1xf32>
    %151 = math.rsqrt %150 : vector<64x1xf32>
    %152 = vector.broadcast %151 : vector<64x1xf32> to vector<64x128xf32>
    %153 = arith.mulf %148, %152 : vector<64x128xf32>
    %c0_64 = arith.constant 0 : index
    %c0_65 = arith.constant 0 : index
    %154 = vector.load %arg18[%c0_64, %c0_65] : memref<1x128xf32, #tpu.memory_space<vmem>>, vector<1x128xf32>
    %155 = vector.broadcast %154 : vector<1x128xf32> to vector<64x128xf32>
    %156 = arith.mulf %153, %155 : vector<64x128xf32>
    %c0_66 = arith.constant 0 : index
    %c0_67 = arith.constant 0 : index
    %157 = vector.load %arg19[%c0_66, %c0_67] : memref<1x128xf32, #tpu.memory_space<vmem>>, vector<1x128xf32>
    %158 = vector.broadcast %157 : vector<1x128xf32> to vector<64x128xf32>
    %159 = arith.addf %156, %158 : vector<64x128xf32>
    %160 = vector.shape_cast %159 : vector<64x128xf32> to vector<2x32x128xf32>
    %c0_68 = arith.constant 0 : index
    %c0_69 = arith.constant 0 : index
    %c0_70 = arith.constant 0 : index
    %161 = vector.load %arg20[%c0_68, %c0_69, %c0_70] : memref<2x32x128xf32, #tpu.memory_space<vmem>>, vector<2x32x128xf32>
    tpu.vector_store %arg20[%c0_68, %c0_69, %c0_70], %160 {strides = array<i32>} : memref<2x32x128xf32, #tpu.memory_space<vmem>>, vector<2x32x128xf32>,
    return
  }
  func.func @transform_0(%arg0: i32) -> (i32, i32, i32) {
    %c0_i32 = arith.constant 0 : i32
    %c0_i32_0 = arith.constant 0 : i32
    %c0_i32_1 = arith.constant 0 : i32
    return %arg0, %c0_i32, %c0_i32_0 : i32, i32, i32
  }
  func.func @transform_1(%arg0: i32) -> (i32, i32, i32) {
    %c0_i32 = arith.constant 0 : i32
    %c0_i32_0 = arith.constant 0 : i32
    %c0_i32_1 = arith.constant 0 : i32
    return %arg0, %c0_i32, %c0_i32_0 : i32, i32, i32
  }
  func.func @transform_2(%arg0: i32) -> (i32, i32, i32) {
    %c0_i32 = arith.constant 0 : i32
    %c0_i32_0 = arith.constant 0 : i32
    %c0_i32_1 = arith.constant 0 : i32
    return %arg0, %c0_i32, %c0_i32_0 : i32, i32, i32
  }
  func.func @transform_3(%arg0: i32) -> (i32, i32) {
    %c0_i32 = arith.constant 0 : i32
    %c0_i32_0 = arith.constant 0 : i32
    %c0_i32_1 = arith.constant 0 : i32
    return %c0_i32, %c0_i32_0 : i32, i32
  }
  func.func @transform_4(%arg0: i32) -> (i32, i32) {
    %c0_i32 = arith.constant 0 : i32
    %c0_i32_0 = arith.constant 0 : i32
    %c0_i32_1 = arith.constant 0 : i32
    return %c0_i32, %c0_i32_0 : i32, i32
  }
  func.func @transform_5(%arg0: i32) -> (i32, i32) {
    %c0_i32 = arith.constant 0 : i32
    %c0_i32_0 = arith.constant 0 : i32
    %c0_i32_1 = arith.constant 0 : i32
    return %c0_i32, %c0_i32_0 : i32, i32
  }
  func.func @transform_6(%arg0: i32) -> (i32, i32) {
    %c0_i32 = arith.constant 0 : i32
    %c0_i32_0 = arith.constant 0 : i32
    %c0_i32_1 = arith.constant 0 : i32
    return %c0_i32, %c0_i32_0 : i32, i32
  }
  func.func @transform_7(%arg0: i32) -> (i32, i32) {
    %c0_i32 = arith.constant 0 : i32
    %c0_i32_0 = arith.constant 0 : i32
    %c0_i32_1 = arith.constant 0 : i32
    return %c0_i32, %c0_i32_0 : i32, i32
  }
  func.func @transform_8(%arg0: i32) -> (i32, i32) {
    %c0_i32 = arith.constant 0 : i32
    %c0_i32_0 = arith.constant 0 : i32
    %c0_i32_1 = arith.constant 0 : i32
    return %c0_i32, %c0_i32_0 : i32, i32
  }
  func.func @transform_9(%arg0: i32) -> (i32, i32) {
    %c0_i32 = arith.constant 0 : i32
    %c0_i32_0 = arith.constant 0 : i32
    %c0_i32_1 = arith.constant 0 : i32
    return %c0_i32, %c0_i32_0 : i32, i32
  }
  func.func @transform_10(%arg0: i32) -> (i32, i32) {
    %c0_i32 = arith.constant 0 : i32
    %c0_i32_0 = arith.constant 0 : i32
    %c0_i32_1 = arith.constant 0 : i32
    return %c0_i32, %c0_i32_0 : i32, i32
  }
  func.func @transform_11(%arg0: i32) -> (i32, i32) {
    %c0_i32 = arith.constant 0 : i32
    %c0_i32_0 = arith.constant 0 : i32
    %c0_i32_1 = arith.constant 0 : i32
    return %c0_i32, %c0_i32_0 : i32, i32
  }
  func.func @transform_12(%arg0: i32) -> (i32, i32) {
    %c0_i32 = arith.constant 0 : i32
    %c0_i32_0 = arith.constant 0 : i32
    %c0_i32_1 = arith.constant 0 : i32
    return %c0_i32, %c0_i32_0 : i32, i32
  }
  func.func @transform_13(%arg0: i32) -> (i32, i32) {
    %c0_i32 = arith.constant 0 : i32
    %c0_i32_0 = arith.constant 0 : i32
    %c0_i32_1 = arith.constant 0 : i32
    return %c0_i32, %c0_i32_0 : i32, i32
  }
  func.func @transform_14(%arg0: i32) -> (i32, i32) {
    %c0_i32 = arith.constant 0 : i32
    %c0_i32_0 = arith.constant 0 : i32
    %c0_i32_1 = arith.constant 0 : i32
    return %c0_i32, %c0_i32_0 : i32, i32
  }
  func.func @transform_15(%arg0: i32) -> (i32, i32) {
    %c0_i32 = arith.constant 0 : i32
    %c0_i32_0 = arith.constant 0 : i32
    %c0_i32_1 = arith.constant 0 : i32
    return %c0_i32, %c0_i32_0 : i32, i32
  }
  func.func @transform_16(%arg0: i32) -> (i32, i32) {
    %c0_i32 = arith.constant 0 : i32
    %c0_i32_0 = arith.constant 0 : i32
    %c0_i32_1 = arith.constant 0 : i32
    return %c0_i32, %c0_i32_0 : i32, i32
  }
  func.func @transform_17(%arg0: i32) -> (i32, i32) {
    %c0_i32 = arith.constant 0 : i32
    %c0_i32_0 = arith.constant 0 : i32
    %c0_i32_1 = arith.constant 0 : i32
    return %c0_i32, %c0_i32_0 : i32, i32
  }
  func.func @transform_18(%arg0: i32) -> (i32, i32) {
    %c0_i32 = arith.constant 0 : i32
    %c0_i32_0 = arith.constant 0 : i32
    %c0_i32_1 = arith.constant 0 : i32
    return %c0_i32, %c0_i32_0 : i32, i32
  }
  func.func @transform_19(%arg0: i32) -> (i32, i32, i32) {
    %c0_i32 = arith.constant 0 : i32
    %c0_i32_0 = arith.constant 0 : i32
    %c0_i32_1 = arith.constant 0 : i32
    return %arg0, %c0_i32, %c0_i32_0 : i32, i32, i32
  }
}

</mosaic_0001>

<bundles_post_ra>
// kernel: tpu_custom_call.1
= control target key start
LH: loop header
LB: loop body
LE: loop exit
PB: predicated region body
PF: predicated region fallthrough
CT: control target
= control target key end

     0   :  { %s6726_s0 = inlined_call_operand.hbm [shape: f32[4,32,128], index: 0, kind: input, shape index: {}]   ;;  %s6727_s1 = inlined_call_operand.hbm [shape: f32[4,32,128], index: 1, kind: input, shape index: {}]   ;;  %s6728_s2 = inlined_call_operand.hbm [shape: f32[4,32,128], index: 2, kind: input, shape index: {}]   ;;  %s6729_s3 = inlined_call_operand.hbm [shape: bf16[128,128], index: 3, kind: input, shape index: {}]   ;;  %s6730_s4 = inlined_call_operand.vmem [shape: f32[1,128], index: 4, kind: input, shape index: {}]   ;;  %s6731_s5 = inlined_call_operand.hbm [shape: bf16[128,128], index: 5, kind: input, shape index: {}]   ;;  %s6732_s6 = inlined_call_operand.vmem [shape: f32[1,128], index: 6, kind: input, shape index: {}]   ;;  %s6733_s7 = inlined_call_operand.hbm [shape: bf16[128,128], index: 7, kind: input, shape index: {}]   ;;  %s6734_s8 = inlined_call_operand.vmem [shape: f32[1,128], index: 8, kind: input, shape index: {}]   ;;  %s6735_s9 = inlined_call_operand.hbm [shape: bf16[128,128], index: 9, kind: input, shape index: {}]   ;;  %s6736_s10 = inlined_call_operand.vmem [shape: f32[1,128], index: 10, kind: input, shape index: {}]   ;;  %s6737_s11 = inlined_call_operand.vmem [shape: f32[1,128], index: 11, kind: input, shape index: {}]   ;;  %s6738_s12 = inlined_call_operand.vmem [shape: f32[1,128], index: 12, kind: input, shape index: {}]   ;;  %s6739_s13 = inlined_call_operand.hbm [shape: bf16[128,256], index: 13, kind: input, shape index: {}]   ;;  %s6740_s14 = inlined_call_operand.vmem [shape: f32[1,256], index: 14, kind: input, shape index: {}]   ;;  %s6741_s15 = inlined_call_operand.hbm [shape: bf16[256,128], index: 15, kind: input, shape index: {}]   ;;  %s6742_s16 = inlined_call_operand.vmem [shape: f32[1,128], index: 16, kind: input, shape index: {}]   ;;  %s6743_s17 = inlined_call_operand.vmem [shape: f32[1,128], index: 17, kind: input, shape index: {}]   ;;  %s6744_s18 = inlined_call_operand.vmem [shape: f32[1,128], index: 18, kind: input, shape index: {}]   ;;  %s6745_s19 = inlined_call_operand.hbm [shape: f32[4,32,128], index: 19, kind: output, shape index: {}]  }
   0x1   :  { %6781 = sst [smem:[#allocation30_spill]] %s6726_s0 }
   0x2   :  { %6782 = sst [smem:[#allocation31_spill]] %s6727_s1 }
   0x3   :  { %6783 = sst [smem:[#allocation32_spill]] %s6728_s2 }
   0x4   :  { %6784 = sst [smem:[#allocation33_spill]] %s6729_s3 }
   0x5   :  { %6785 = sst [smem:[#allocation34_spill]] %s6731_s5 }
   0x6   :  { %6786 = sst [smem:[#allocation35_spill]] %s6732_s6 }
   0x7   :  { %6787 = sst [smem:[#allocation36_spill]] %s6733_s7 }
   0x8   :  { %6788 = sst [smem:[#allocation37_spill]] %s6734_s8 }
   0x9   :  { %6789 = sst [smem:[#allocation38_spill]] %s6736_s10 }
   0xa   :  { %6790 = sst [smem:[#allocation39_spill]] %s6737_s11 }
   0xb   :  { %6791 = sst [smem:[#allocation40_spill]] %s6738_s12 }
   0xc   :  { %6792 = sst [smem:[#allocation41_spill]] %s6739_s13 }
   0xd   :  { %6793 = sst [smem:[#allocation42_spill]] %s6740_s14 }
   0xe   :  { %6794 = sst [smem:[#allocation43_spill]] %s6742_s16 }
   0xf   :  { %6795 = sst [smem:[#allocation44_spill]] %s6743_s17 }
  0x10   :  { %6796 = sst [smem:[#allocation45_spill]] %s6744_s18 }
  0x11   :  { %6797 = sst [smem:[#allocation46_spill]] %s6745_s19 }
  0x12   :  { %24 = vsyncpa [#allocation3], 0 }
  0x13   :  { %26 = vsyncpa [#allocation3 + $0x1], 0 }
  0x14   :  { %27 = vsyncpa [#allocation6], 0 }
  0x15   :  { %29 = vsyncpa [#allocation6 + $0x1], 0 }
  0x16   :  { %30 = vsyncpa [#allocation9], 0 }
  0x17   :  { %31 = vsyncpa [#allocation12], 0 }
  0x18   :  { %32 = vsyncpa [#allocation15], 0 }
  0x19   :  { %33 = vsyncpa [#allocation4], 0 }
  0x1a   :  { %35 = vsyncpa [#allocation4 + $0x1], 0  ;;  %s5462_s0 = smov 0   ;;  %s5464_s30 = smov 0  }
  0x1b   :  { %s5466_s20 = smov 0   ;;  %s5468_s21 = smov 0  }
  0x1c LB: > { %6798 = sst [smem:[#allocation24_spill]] %s5328_s0  ;;  %s5342_s1 = smov [#allocation8]   ;;  %s5340_s21 = sphi %s5468_s21, %s6861_s21   ;;  %s5336_s20 = sphi %s5466_s20, %s6865_s20   ;;  %s5332_s30 = sphi %s5464_s30, %s6864_s30   ;;  %s5328_s0 = sphi %s5462_s0, %s6863_s0  }
  0x1d   : > { %6799 = sst [smem:[#allocation25_spill]] %s5340_s21  ;;  %s498_s22 = sshll.u32 %s5342_s1, 4  ;;  %s5488_s22 = int_to_ptr.vmem [resolvable:$true] %s498_s22 }
  0x1e   : > { %s5483_s2 = sadd.s32 4294967295, %s5340_s21   ;;  %p4015_p0 = scmp.ge.s32.totalorder %s5340_s21, 1 }
  0x1f   : > { %p6765_p1 = scmp.eq.s32.totalorder %s5483_s2, 0  ;;  %p486_p2 = scmp.lt.s32.totalorder %s5340_s21, 3 }
  0x20   : > { %s5343_s24 = smov [#allocation11]   ;;  %s5344_s26 = smov [#allocation14]  }
  0x21   : > { %p5490_p3 = pnand %p4015_p0, %p486_p2  ;;  %s530_s25 = sshll.u32 %s5343_s24, 4  ;;  %s5503_s25 = int_to_ptr.vmem [resolvable:$true] %s530_s25 }
  0x22   : > { %s568_s27 = sshll.u32 %s5344_s26, 4  ;;  %s6802_s1 = sld [smem:[#allocation33_spill]]  ;;  %s5505_s27 = int_to_ptr.vmem [resolvable:$true] %s568_s27 }
  0x23   : > { %s6800_s23 = scalar_select %p5490_p3, 1, 0 }
  0x24   : > { %p4665_p5 = pneg %p5490_p3 }
  0x26   : > { %p5499_p6 = pnand %p4665_p5, %p6765_p1 }
  0x28   : > { %s6801_s3 = scalar_select %p5499_p6, 1, 0 }
  0x29   : > { %s5000_s19 = scalar_lea.hbm %s6802_s1, 1024  ;;  %p5515_p8 = pneg %p5499_p6 }
  0x2a   : > { %p5001_p7 = scmp.ne.s32.totalorder %s6802_s1, %s5000_s19  ;;  %p5007_p11 = scmp.lt.u32.totalorder %s5000_s19, %s6802_s1 }
  0x2b   : > { %s6803_s24 = scalar_select %p5515_p8, 1, 0 }
  0x2c   : > { %p5003_p9 = pnand %p5515_p8, %p5001_p7 }
  0x2e   : > { %p5004_p10 = pneg %p5003_p9 }
  0x30   : > { %p5009_p12 = pnand %p5007_p11, %p5004_p10 }
  0x32   : > { %5012 = shalt.err (!%p5009_p12)
}
  0x33   : > { %s5013_s17 = scalar_lea.vmem %s5488_s22, 1024  ;;  %p5021_p5 = scmp.lt.s32.totalorder %s5488_s22, %s5488_s22 }
  0x34   : > { %p5014_p13 = scmp.ne.s32.totalorder %s5488_s22, %s5013_s17  ;;  %p5022_p4 = scmp.lt.s32.totalorder %s5013_s17, %s5013_s17 }
  0x36   : > { %p5016_p0 = pnand %p5014_p13, %p5515_p8  ;;  %p5023_p7 = por %p5022_p4, %p5021_p5 }
  0x38   : > { %p5017_p2 = pneg %p5016_p0 }
  0x3a   : > { %p5024_p9 = pnand %p5023_p7, %p5017_p2 }
  0x3c   : > { %5027 = shalt.err (!%p5024_p9)
}
  0x3d   : > { %s6752_s18 = smov 64   ;;  %s6754_s16 = smov 4  }
  0x3e   : > { %4668 = dma.hbm_to_vmem [thread:$0]  (!%p5499_p6), %s6802_s1, 1024, %s5488_s22, [#allocation9], %s6752_s18, %s6752_s18, %s6754_s16  }
  0x3f   : > { %s6804_s7 = sld [smem:[#allocation36_spill]] }
  0x45   : > { %s5028_s17 = scalar_lea.hbm %s6804_s7, 1024 }
  0x46   : > { %p5029_p4 = scmp.ne.s32.totalorder %s6804_s7, %s5028_s17  ;;  %p5035_p12 = scmp.lt.u32.totalorder %s5028_s17, %s6804_s7 }
  0x48   : > { %p5031_p10 = pnand %p5029_p4, %p5515_p8 }
  0x4a   : > { %p5032_p11 = pneg %p5031_p10 }
  0x4c   : > { %p5037_p13 = pnand %p5035_p12, %p5032_p11 }
  0x4e   : > { %5040 = shalt.err (!%p5037_p13)
}
  0x4f   : > { %s5041_s22 = scalar_lea.vmem %s5503_s25, 1024  ;;  %p5049_p7 = scmp.lt.s32.totalorder %s5503_s25, %s5503_s25 }
  0x50   : > { %p5042_p0 = scmp.ne.s32.totalorder %s5503_s25, %s5041_s22  ;;  %p5050_p9 = scmp.lt.s32.totalorder %s5041_s22, %s5041_s22 }
  0x52   : > { %p5044_p2 = pnand %p5042_p0, %p5515_p8  ;;  %p5051_p4 = por %p5050_p9, %p5049_p7 }
  0x54   : > { %p5045_p5 = pneg %p5044_p2 }
  0x56   : > { %p5052_p10 = pnand %p5051_p4, %p5045_p5 }
  0x58   : > { %5055 = shalt.err (!%p5052_p10)
}
  0x59   : > { %4674 = dma.hbm_to_vmem [thread:$0]  (!%p5499_p6), %s6804_s7, 1024, %s5503_s25, [#allocation12], %s6752_s18, %s6752_s18, %s6754_s16  }
  0x5a   : > { %s6805_s13 = sld [smem:[#allocation41_spill]] }
  0x60   : > { %s5056_s19 = scalar_lea.hbm %s6805_s13, 2048 }
  0x61   : > { %p5057_p11 = scmp.ne.s32.totalorder %s6805_s13, %s5056_s19  ;;  %p5063_p0 = scmp.lt.u32.totalorder %s5056_s19, %s6805_s13 }
  0x63   : > { %p5059_p12 = pnand %p5057_p11, %p5515_p8 }
  0x65   : > { %p5060_p13 = pneg %p5059_p12 }
  0x67   : > { %p5065_p2 = pnand %p5063_p0, %p5060_p13 }
  0x69   : > { %5068 = shalt.err (!%p5065_p2)
}
  0x6a   : > { %s5069_s25 = scalar_lea.vmem %s5505_s27, 2048  ;;  %p5077_p4 = scmp.lt.s32.totalorder %s5505_s27, %s5505_s27 }
  0x6b   : > { %p5070_p5 = scmp.ne.s32.totalorder %s5505_s27, %s5069_s25  ;;  %p5078_p10 = scmp.lt.s32.totalorder %s5069_s25, %s5069_s25 }
  0x6d   : > { %p5072_p7 = pnand %p5070_p5, %p5515_p8  ;;  %p5079_p11 = por %p5078_p10, %p5077_p4 }
  0x6f   : > { %p5073_p9 = pneg %p5072_p7 }
  0x71   : > { %p5080_p12 = pnand %p5079_p11, %p5073_p9 }
  0x73   : > { %5083 = shalt.err (!%p5080_p12)
}
  0x74   : > { %s6756_s22 = smov 128   ;;  %s6758_s10 = smov 8  }
  0x75   : > { %4680 = dma.hbm_to_vmem [thread:$0]  (!%p5499_p6), %s6805_s13, 2048, %s5505_s27, [#allocation15], %s6756_s22, %s6756_s22, %s6758_s10  }
  0x76   : > { %s4014_s14 = sadd.s32 4294967294, %s5340_s21   ;;  %s5593_s19 = sadd.s32 1, %s5340_s21  }
  0x77   : > { %6806 = sst [smem:[#allocation26_spill]] %s5593_s19  ;;  %s48_s28 = sadd.s32 1, %s5336_s20 }
  0x78   : > { %s45_s29 = ssub.s32 %s5340_s21, %s5593_s19  ;;  %p55_p13 = scmp.ne.s32.totalorder %s5336_s20, %s5332_s30 }
  0x79   : > { %p46_p0 = scmp.eq.s32.totalorder %s45_s29, 0  ;;  %p56_p2 = scmp.eq.s32.totalorder %s5340_s21, 0 }
  0x7a   : > { %p61_p5 = scmp.ne.s32.totalorder %s5332_s30, %s5328_s0  ;;  %p473_p7 = scmp.eq.s32.totalorder %s5483_s2, 1 }
  0x7b   : > { %s5605_s26 = scalar_select %p46_p0, %s5336_s20, %s48_s28  }
  0x7c   : > { %p57_p9 = por %p56_p2, %p55_p13  ;;  %p5609_p4 = por %p6765_p1, %p61_p5 }
  0x7d   : > { %6807 = sst [smem:[#allocation27_spill]] %s5605_s26  ;;  %p5613_p10 = por %p473_p7, %p55_p13 }
  0x7e   : > { %s6808_s27 = scalar_select %p5609_p4, 1, 0 }
  0x7f   : > { %s6809_s17 = scalar_select %p5613_p10, 1, 0 }
  0x80   : > { %p479_p11 = scmp.eq.s32.totalorder %s4014_s14, 1  ;;  %p4704_p12 = scmp.lt.s32.totalorder %s5340_s21, 2 }
  0x81   : > { %6810 = sst [smem:[#allocation28_spill]] %s6809_s17  ;;  %s6760_s25 = sand.u32 1, %s5336_s20  }
  0x82   : > { %p5619_p3 = por %p479_p11, %p61_p5  ;;  %s5625_s12 = sshll.u32 %s6760_s25, 6 }
  0x83   : > { %s5628_s28 = sshll.u32 %s5340_s21, 10  ;;  %p5630_p0 = pnand %p4704_p12, %p57_p9 }
  0x84   : > { %s6811_s11 = scalar_select %p5619_p3, 1, 0 }
  0x85   : > { %s6813_s29 = scalar_select %p5630_p0, 1, 0 }
  0x86   : > { %6812 = sst [smem:[#allocation29_spill]] %s6811_s11  ;;  %s629_s18 = sand.u32 1, %s5340_s21  }
  0x87   : > { %s6814_s22 = sld [smem:[#allocation31_spill]]  ;;  %s633_s25 = scalar_lea.vmem [#allocation5], %s5625_s12 }
  0x88   : > { %s641_s1 = sshll.u32 %s633_s25, 4  ;;  %s5644_s7 = scalar_lea.sflag [#allocation6], %s629_s18  ;;  %s5642_s1 = int_to_ptr.vmem [resolvable:$true] %s641_s1 }
  0x89   : > { %p5650_p2 = pneg %p5630_p0 }
  0x8b   : > { %s6815_s26 = scalar_select %p5650_p2, 1, 0 }
  0x8d   : > { %s5639_s10 = scalar_lea.hbm %s6814_s22, %s5628_s28  ;;  %s5089_s19 = scalar_lea.hbm %s6814_s22, 2048 }
  0x8e   : > { %s5084_s13 = scalar_lea.hbm %s5639_s10, 1024  ;;  %p5090_p9 = scmp.lt.u32.totalorder %s5639_s10, %s6814_s22 }
  0x8f   : > { %p5085_p13 = scmp.ne.s32.totalorder %s5639_s10, %s5084_s13  ;;  %p5091_p11 = scmp.lt.u32.totalorder %s5089_s19, %s5084_s13 }
  0x90   : > { %p5093_p1 = scmp.lt.u32.totalorder %s5084_s13, %s5639_s10 }
  0x91   : > { %p5087_p5 = pnand %p5650_p2, %p5085_p13  ;;  %p5092_p12 = por %p5091_p11, %p5090_p9 }
  0x93   : > { %p5088_p7 = pneg %p5087_p5  ;;  %p5094_p3 = por %p5093_p1, %p5092_p12 }
  0x95   : > { %p5095_p10 = pnand %p5094_p3, %p5088_p7 }
  0x97   : > { %5098 = shalt.err (!%p5095_p10)
}
  0x98   : > { %s5099_s18 = scalar_lea.vmem %s5642_s1, 1024  ;;  %s5349_s16 = smov [#allocation5]  }
  0x99   : > { %p5100_p13 = scmp.ne.s32.totalorder %s5642_s1, %s5099_s18  ;;  %s5104_s14 = sshll.u32 %s5349_s16, 4  ;;  %s5105_s14 = int_to_ptr.vmem [resolvable:$false] %s5104_s14 }
  0x9a   : > { %s5106_s21 = scalar_lea.vmem %s5105_s14, 2048  ;;  %p5107_p6 = scmp.lt.s32.totalorder %s5642_s1, %s5105_s14 }
  0x9b   : > { %p5102_p5 = pnand %p5100_p13, %p5650_p2  ;;  %p5108_p8 = scmp.lt.s32.totalorder %s5106_s21, %s5099_s18 }
  0x9d   : > { %p5103_p4 = pneg %p5102_p5  ;;  %p5109_p9 = por %p5108_p8, %p5107_p6 }
  0x9f   : > { %p5110_p11 = pnand %p5109_p9, %p5103_p4 }
  0xa1   : > { %5113 = shalt.err (!%p5110_p11)
}
  0xa2   : > { %s6816_s13 = smov 8   ;;  %s6817_s19 = smov 128  }
  0xa3   : > { %4690 = dma.hbm_to_vmem [thread:$0]  (!%p5630_p0), %s5639_s10, 1024, %s5642_s1, %s5644_s7, %s6817_s19, %s6817_s19, %s6816_s13  }
  0xa4   : > { %s5350_s25 = smov [#allocation10]   ;;  %s5351_s16 = smov [#allocation13]  }
  0xa5   : > { %s514_s22 = sshll.u32 %s5350_s25, 4  ;;  %s546_s11 = sshll.u32 %s5351_s16, 4  ;;  %s515_s22 = int_to_ptr.vmem [resolvable:$true] %s514_s22  ;;  %s547_s11 = int_to_ptr.vmem [resolvable:$true] %s546_s11 }
  0xa6   : > { %s6818_s5 = sld [smem:[#allocation34_spill]]  ;;  %p6819_p3 = scmp.ne.s32.totalorder %s6803_s24, 0 }
  0xac   : > { %s5114_s21 = scalar_lea.hbm %s6818_s5, 1024 }
  0xad   : > { %p5115_p1 = scmp.ne.s32.totalorder %s6818_s5, %s5114_s21  ;;  %p5121_p4 = scmp.lt.u32.totalorder %s5114_s21, %s6818_s5 }
  0xaf   : > { %p5117_p6 = pnand %p5115_p1, %p6819_p3 }
  0xb1   : > { %p5118_p8 = pneg %p5117_p6 }
  0xb3   : > { %p5123_p10 = pnand %p5121_p4, %p5118_p8 }
  0xb5   : > { %5126 = shalt.err (!%p5123_p10)
}
  0xb6   : > { %s5127_s1 = scalar_lea.vmem %s515_s22, 1024  ;;  %p5135_p5 = scmp.lt.s32.totalorder %s515_s22, %s515_s22 }
  0xb7   : > { %p5128_p7 = scmp.ne.s32.totalorder %s515_s22, %s5127_s1  ;;  %p5136_p9 = scmp.lt.s32.totalorder %s5127_s1, %s5127_s1 }
  0xb9   : > { %p5130_p12 = pnand %p5128_p7, %p6819_p3  ;;  %p5137_p11 = por %p5136_p9, %p5135_p5 }
  0xbb   : > { %p5131_p13 = pneg %p5130_p12 }
  0xbd   : > { %p5138_p0 = pnand %p5137_p11, %p5131_p13 }
  0xbf   : > { %5141 = shalt.err (!%p5138_p0)
}
  0xc0   : > { %p6820_p1 = scmp.ne.s32.totalorder %s6801_s3, 0  ;;  %s6821_s0 = smov 4  }
  0xc1   : > { %s6822_s10 = smov 64   ;;  %s5142_s16 = scalar_lea.hbm %s6735_s9, 1024 }
  0xc2   : > { %4671 = dma.hbm_to_vmem [thread:$0]  (!%p6820_p1), %s6818_s5, 1024, %s515_s22, [#allocation9], %s6822_s10, %s6822_s10, %s6821_s0  }
  0xc3   : > { %p5143_p6 = scmp.ne.s32.totalorder %s6735_s9, %s5142_s16  ;;  %p5149_p4 = scmp.lt.u32.totalorder %s5142_s16, %s6735_s9 }
  0xc5   : > { %p5145_p0 = pnand %p5143_p6, %p6819_p3 }
  0xc7   : > { %p5146_p8 = pneg %p5145_p0 }
  0xc9   : > { %p5151_p10 = pnand %p5149_p4, %p5146_p8 }
  0xcb   : > { %5154 = shalt.err (!%p5151_p10)
}
  0xcc   : > { %s5155_s6 = scalar_lea.vmem %s547_s11, 1024  ;;  %p5163_p5 = scmp.lt.s32.totalorder %s547_s11, %s547_s11 }
  0xcd   : > { %p5156_p7 = scmp.ne.s32.totalorder %s547_s11, %s5155_s6  ;;  %p5164_p9 = scmp.lt.s32.totalorder %s5155_s6, %s5155_s6 }
  0xcf   : > { %p5158_p12 = pnand %p5156_p7, %p6819_p3  ;;  %p5165_p11 = por %p5164_p9, %p5163_p5 }
  0xd1   : > { %p5159_p13 = pneg %p5158_p12 }
  0xd3   : > { %p5166_p2 = pnand %p5165_p11, %p5159_p13 }
  0xd5   : > { %5169 = shalt.err (!%p5166_p2)
}
  0xd6   : > { %4677 = dma.hbm_to_vmem [thread:$0]  (!%p6820_p1), %s6735_s9, 1024, %s547_s11, [#allocation12], %s6822_s10, %s6822_s10, %s6821_s0  }
  0xd7   : > { %s5352_s17 = smov [#allocation16]   ;;  %s5170_s18 = scalar_lea.hbm %s6741_s15, 2048 }
  0xd8   : > { %s584_s25 = sshll.u32 %s5352_s17, 4  ;;  %p5171_p2 = scmp.ne.s32.totalorder %s6741_s15, %s5170_s18  ;;  %s585_s25 = int_to_ptr.vmem [resolvable:$true] %s584_s25 }
  0xd9   : > { %p5177_p8 = scmp.lt.u32.totalorder %s5170_s18, %s6741_s15 }
  0xda   : > { %p5173_p6 = pnand %p5171_p2, %p6819_p3 }
  0xdc   : > { %p5174_p0 = pneg %p5173_p6 }
  0xde   : > { %p5179_p4 = pnand %p5177_p8, %p5174_p0 }
  0xe0   : > { %5182 = shalt.err (!%p5179_p4)
}
  0xe1   : > { %s5183_s11 = scalar_lea.vmem %s585_s25, 2048  ;;  %p5191_p13 = scmp.lt.s32.totalorder %s585_s25, %s585_s25 }
  0xe2   : > { %p5184_p10 = scmp.ne.s32.totalorder %s585_s25, %s5183_s11  ;;  %p5192_p5 = scmp.lt.s32.totalorder %s5183_s11, %s5183_s11 }
  0xe4   : > { %p5186_p7 = pnand %p5184_p10, %p6819_p3  ;;  %p5193_p9 = por %p5192_p5, %p5191_p13 }
  0xe6   : > { %p5187_p12 = pneg %p5186_p7 }
  0xe8   : > { %p5194_p11 = pnand %p5193_p9, %p5187_p12 }
  0xea   : > { %5197 = shalt.err (!%p5194_p11)
}
  0xeb   : > { %4683 = dma.hbm_to_vmem [thread:$0]  (!%p6820_p1), %s6741_s15, 2048, %s585_s25, [#allocation15], %s6822_s10, %s6822_s10, %s6821_s0  }
  0xec   : > { %s6823_s17 = sld [smem:[#allocation30_spill]]  ;;  %s611_s3 = scalar_lea.vmem [#allocation2], %s5625_s12 }
  0xed   : > { %s619_s14 = sshll.u32 %s611_s3, 4  ;;  %s6824_s18 = sand.u32 1, %s5336_s20   ;;  %s5747_s14 = int_to_ptr.vmem [resolvable:$true] %s619_s14 }
  0xee   : > { %s5751_s21 = scalar_lea.sflag [#allocation3], %s6824_s18  ;;  %p6825_p2 = scmp.ne.s32.totalorder %s6815_s26, 0 }
  0xf2   : > { %s5744_s16 = scalar_lea.hbm %s6823_s17, %s5628_s28  ;;  %s5203_s25 = scalar_lea.hbm %s6823_s17, 2048 }
  0xf3   : > { %s5198_s1 = scalar_lea.hbm %s5744_s16, 1024  ;;  %p5204_p0 = scmp.lt.u32.totalorder %s5744_s16, %s6823_s17 }
  0xf4   : > { %p5199_p3 = scmp.ne.s32.totalorder %s5744_s16, %s5198_s1  ;;  %p5205_p8 = scmp.lt.u32.totalorder %s5203_s25, %s5198_s1 }
  0xf5   : > { %p5207_p10 = scmp.lt.u32.totalorder %s5198_s1, %s5744_s16 }
  0xf6   : > { %p5201_p1 = pnand %p5199_p3, %p6825_p2  ;;  %p5206_p4 = por %p5205_p8, %p5204_p0 }
  0xf8   : > { %p5202_p6 = pneg %p5201_p1  ;;  %p5208_p7 = por %p5207_p10, %p5206_p4 }
  0xfa   : > { %p5209_p12 = pnand %p5208_p7, %p5202_p6 }
  0xfc   : > { %5212 = shalt.err (!%p5209_p12)
}
  0xfd   : > { %s5213_s5 = scalar_lea.vmem %s5747_s14, 1024  ;;  %s5353_s22 = smov [#allocation2]  }
  0xfe   : > { %p5214_p13 = scmp.ne.s32.totalorder %s5747_s14, %s5213_s5  ;;  %s5218_s24 = sshll.u32 %s5353_s22, 4  ;;  %s5219_s24 = int_to_ptr.vmem [resolvable:$false] %s5218_s24 }
  0xff   : > { %s5220_s8 = scalar_lea.vmem %s5219_s24, 2048  ;;  %p5221_p11 = scmp.lt.s32.totalorder %s5747_s14, %s5219_s24 }
 0x100   : > { %p5216_p5 = pnand %p5214_p13, %p6825_p2  ;;  %p5222_p3 = scmp.lt.s32.totalorder %s5220_s8, %s5213_s5 }
 0x102   : > { %p5217_p9 = pneg %p5216_p5  ;;  %p5223_p1 = por %p5222_p3, %p5221_p11 }
 0x104   : > { %p5224_p0 = pnand %p5223_p1, %p5217_p9 }
 0x106   : > { %5227 = shalt.err (!%p5224_p0)
}
 0x107   : > { %p6826_p6 = scmp.ne.s32.totalorder %s6813_s29, 0  ;;  %s6827_s1 = sld [smem:[#allocation32_spill]] }
 0x108   : > { %s655_s10 = scalar_lea.vmem [#allocation7], %s5625_s12 }
 0x109   : > { %4687 = dma.hbm_to_vmem [thread:$0]  (!%p6826_p6), %s5744_s16, 1024, %s5747_s14, %s5751_s21, %s6817_s19, %s6817_s19, %s6816_s13  }
 0x10a   : > { %s663_s25 = sshll.u32 %s655_s10, 4  ;;  %s5785_s25 = int_to_ptr.vmem [resolvable:$true] %s663_s25 }
 0x10d   : > { %s5782_s0 = scalar_lea.hbm %s6827_s1, %s5628_s28  ;;  %s5233_s14 = scalar_lea.hbm %s6827_s1, 2048 }
 0x10e   : > { %s5228_s6 = scalar_lea.hbm %s5782_s0, 1024  ;;  %p5234_p7 = scmp.lt.u32.totalorder %s5782_s0, %s6827_s1 }
 0x10f   : > { %p5229_p8 = scmp.ne.s32.totalorder %s5782_s0, %s5228_s6  ;;  %p5235_p12 = scmp.lt.u32.totalorder %s5233_s14, %s5228_s6 }
 0x110   : > { %p5237_p5 = scmp.lt.u32.totalorder %s5228_s6, %s5782_s0 }
 0x111   : > { %p5231_p4 = pnand %p5229_p8, %p6825_p2  ;;  %p5236_p13 = por %p5235_p12, %p5234_p7 }
 0x113   : > { %p5232_p10 = pneg %p5231_p4  ;;  %p5238_p9 = por %p5237_p5, %p5236_p13 }
 0x115   : > { %p5239_p11 = pnand %p5238_p9, %p5232_p10 }
 0x117   : > { %5242 = shalt.err (!%p5239_p11)
}
 0x118   : > { %s5243_s12 = scalar_lea.vmem %s5785_s25, 1024  ;;  %s5354_s5 = smov [#allocation7]  }
 0x119   : > { %p5244_p3 = scmp.ne.s32.totalorder %s5785_s25, %s5243_s12  ;;  %s5248_s22 = sshll.u32 %s5354_s5, 4  ;;  %s5249_s22 = int_to_ptr.vmem [resolvable:$false] %s5248_s22 }
 0x11a   : > { %s5250_s24 = scalar_lea.vmem %s5249_s22, 2048  ;;  %p5251_p8 = scmp.lt.s32.totalorder %s5785_s25, %s5249_s22 }
 0x11b   : > { %p5246_p1 = pnand %p5244_p3, %p6825_p2  ;;  %p5252_p4 = scmp.lt.s32.totalorder %s5250_s24, %s5243_s12 }
 0x11d   : > { %p5247_p0 = pneg %p5246_p1  ;;  %p5253_p7 = por %p5252_p4, %p5251_p8 }
 0x11f   : > { %p5254_p12 = pnand %p5253_p7, %p5247_p0 }
 0x121   : > { %5257 = shalt.err (!%p5254_p12)
}
 0x122   : > { %4693 = dma.hbm_to_vmem [thread:$0]  (!%p6826_p6), %s5782_s0, 1024, %s5785_s25, %s5644_s7, %s6817_s19, %s6817_s19, %s6816_s13  }
 0x123   : > { %p6828_p2 = scmp.ne.s32.totalorder %s6800_s23, 0 }
 0x124   : > { %s5815_s26 = sand.u32 (!%p6828_p2), 1, %s5332_s30   ;;  %p6829_p10 = scmp.ne.s32.totalorder (!%p6828_p2), %s6808_s27, 0 }
 0x125   : > { %675 = sbr.rel (%p6828_p2) target bundleno = 2892 (0xb4c), region = 96  ;;  %s5818_s8 = sshll.u32 (!%p6828_p2), %s5815_s26, 6 }
 0x126   : > { %s678_s29 = scalar_lea.sflag (!%p6828_p2), [#allocation3], %s5815_s26  ;;  %s5822_s3 = scalar_lea.vmem (!%p6828_p2), [#allocation2], %s5818_s8 }
 0x12c   : > { %5303 = dma.done.wait (%p6829_p10), %s678_s29, 1024  }
 0x12d   : > { %5305 = vsyncadd (%p6829_p10), %s678_s29, 4294966272  ;;  %s686_s7 = sand.u32 1, %s5483_s2   ;;  %s5830_s13 = scalar_lea.vmem [#allocation5], %s5818_s8 }
 0x12e   : > { %s687_s23 = scalar_lea.sflag [#allocation6], %s686_s7 }
 0x12f   : > { %5307 = dma.done.wait (%p6829_p10), %s687_s23, 2048  }
 0x130   : > { %5309 = vsyncadd (%p6829_p10), %s687_s23, 4294965248  ;;  %s5837_s19 = scalar_lea.vmem [#allocation7], %s5818_s8  ;;  %p6830_p6 = scmp.eq.s32.totalorder %s5483_s2, 0 }
 0x132   : > { %5311 = dma.done.wait (%p6830_p6), [#allocation9], 2048   ;;  %p6831_p13 = pmov %p6830_p6 }
 0x133   : > { %p6832_p5 = pmov %p6830_p6 }
 0x134   : > { %5313 = vsyncadd (%p6831_p13), [#allocation9], 4294965248 }
 0x135   : > { %5315 = dma.done.wait (%p6832_p5), [#allocation12], 2048   ;;  %p6833_p9 = pmov %p6832_p5 }
 0x136   : > { %p6834_p11 = pmov %p6832_p5 }
 0x137   : > { %5317 = vsyncadd (%p6833_p9), [#allocation12], 4294965248 }
 0x138   : > { %5319 = dma.done.wait (%p6834_p11), [#allocation15], 4096   ;;  %p6835_p3 = pmov %p6832_p5 }
 0x139   : > { %v4760_v0 = vld [vmem:[#allocation10] sm:$0xff]   ;;  %v4762_v2 = vld [vmem:[#allocation10 + $0x8] sm:$0xff]   ;;  %v4764_v4 = vld [vmem:[#allocation10 + $0x10] sm:$0xff]   ;;  %s6836_s25 = sld [smem:[#allocation35_spill]]  ;;  %vm1356_vm0 = vcmask 261120   ;;  %s5355_s6 = smov 96  }
 0x13a   : > { %5321 = vsyncadd (%p6835_p3), [#allocation15], 4294963200  ;;  %v4761_v1 = vld [vmem:[#allocation8] sm:$0xff]   ;;  %4369 = vmatprep.subr.bf16.mxu1 %v4760_v0  ;;  %v4763_v3 = vld [vmem:[#allocation8 + $0x8] sm:$0xff]   ;;  %s5356_s11 = smov 64   ;;  %s5357_s16 = smov 32  }
 0x13b   : > { %4370 = vmatpush3.bf16.msra.mxu1 %v4760_v0  ;;  %4345 = vmatprep.subr.bf16.mxu0 %v4761_v1  ;;  %v4765_v5 = vld [vmem:[#allocation8 + $0x10] sm:$0xff]   ;;  %v4766_v6 = vld [vmem:[#allocation10 + $0x18] sm:$0xff]   ;;  %v4768_v8 = vld [vmem:[#allocation10 + $0x20] sm:$0xff]   ;;  %s6837_s28 = sld [smem:[#allocation37_spill]]  ;;  %s6846_s22 = sld [smem:[#allocation38_spill]] }
 0x13c   : > { %4371 = vmatprep.subr.bf16.mxu1 %v4762_v2  ;;  %4346 = vmatpush3.bf16.msra.mxu0 %v4761_v1  ;;  %v4767_v7 = vld [vmem:[#allocation8 + $0x18] sm:$0xff]   ;;  %v4769_v9 = vld [vmem:[#allocation8 + $0x20] sm:$0xff]   ;;  %v802_v11 = vld [vmem:[%s5830_s13 + $0x8] sm:$0xff]  ;;  %s6849_s18 = sld [smem:[#allocation42_spill]]  ;;  %s6659_s12 = scalar_lea.vmem [#allocation17], %s5818_s8 }
 0x13d   : > { %4347 = vmatprep.subr.bf16.mxu0 %v4763_v3  ;;  %v801_v10 = vld [vmem:[%s5830_s13] sm:$0xff]  ;;  %v4770_v12 = vld [vmem:[#allocation10 + $0x28] sm:$0xff]   ;;  %v4772_v18 = vld [vmem:[#allocation10 + $0x30] sm:$0xff]   ;;  %s6853_s8 = sld [smem:[#allocation28_spill]]  ;;  %s4180_s5 = sshll.u32 %s5483_s2, 10 }
 0x13e   : > { %v957_v13 = vpack.c.bf16 %v802_v11, %v801_v10  ;;  %v4771_v14 = vld [vmem:[#allocation8 + $0x28] sm:$0xff]   ;;  %v793_v15 = vld [vmem:[%s5822_s3] sm:$0xff]  ;;  %v4773_v19 = vld [vmem:[#allocation8 + $0x30] sm:$0xff]   ;;  %s3827_s23 = scalar_lea.sflag [#allocation4], %s5815_s26  ;;  %s5359_s2 = smov [#allocation17]  }
 0x13f   : > { %4372 = vmatpush3.bf16.msra.mxu1 %v4762_v2  ;;  %v794_v16 = vld [vmem:[%s5822_s3 + $0x8] sm:$0xff]  ;;  %v4774_v20 = vld [vmem:[#allocation10 + $0x38] sm:$0xff]   ;;  %v803_v22 = vld [vmem:[%s5830_s13 + $0x10] sm:$0xff] }
 0x140   : > { %4373 = vmatprep.subr.bf16.mxu1 %v4764_v4  ;;  %4348 = vmatpush3.bf16.msra.mxu0 %v4763_v3  ;;  %v817_v17 = vpack.c.bf16 %v794_v16, %v793_v15  ;;  %v4775_v21 = vld [vmem:[#allocation8 + $0x38] sm:$0xff]   ;;  %v795_v24 = vld [vmem:[%s5822_s3 + $0x10] sm:$0xff]  ;;  %v805_v26 = vld [vmem:[%s5830_s13 + $0x20] sm:$0xff] }
 0x141   : > { %4349 = vmatprep.subr.bf16.mxu0 %v4765_v5  ;;  %4385 = vmatprep.mubr.bf16.mxu1 %v957_v13  ;;  %v804_v23 = vld [vmem:[%s5830_s13 + $0x18] sm:$0xff]  ;;  %v806_v27 = vld [vmem:[%s5830_s13 + $0x28] sm:$0xff]  ;;  %v797_v28 = vld [vmem:[%s5822_s3 + $0x20] sm:$0xff] }
 0x142   : > { %4361 = vmatprep.mubr.bf16.mxu0 %v817_v17  ;;  %v796_v25 = vld [vmem:[%s5822_s3 + $0x18] sm:$0xff]  ;;  %v798_v29 = vld [vmem:[%s5822_s3 + $0x28] sm:$0xff]  ;;  %v4776_v30 = vld [vmem:[#allocation11] sm:$0xff]   ;;  %v958_v31 = vpack.c.bf16 %v804_v23, %v803_v22  ;;  %v959_v33 = vpack.c.bf16 %v806_v27, %v805_v26 }
 0x143   : > { %4374 = vmatpush3.bf16.msra.mxu1 %v4764_v4  ;;  %v818_v32 = vpack.c.bf16 %v796_v25, %v795_v24  ;;  %v4777_v34 = vld [vmem:[#allocation11 + $0x8] sm:$0xff]   ;;  %v819_v35 = vpack.c.bf16 %v798_v29, %v797_v28  ;;  %v807_v36 = vld [vmem:[%s5830_s13 + $0x30] sm:$0xff]  ;;  %v808_v37 = vld [vmem:[%s5830_s13 + $0x38] sm:$0xff]  ;;  %s6848_s13 = sld [smem:[#allocation40_spill]]  ;;  %p6855_p0 = scmp.ne.s32.totalorder %s6853_s8, 0 }
 0x144   : > { %4375 = vmatprep.subr.bf16.mxu1 %v4766_v6  ;;  %4350 = vmatpush3.bf16.msra.mxu0 %v4765_v5  ;;  %v799_v38 = vld [vmem:[%s5822_s3 + $0x30] sm:$0xff]  ;;  %v800_v39 = vld [vmem:[%s5822_s3 + $0x38] sm:$0xff]  ;;  %v809_v41 = vld [vmem:[%s5837_s19] sm:$0xff]  ;;  %v960_v43 = vpack.c.bf16 %v808_v37, %v807_v36 }
 0x145   : > { %4351 = vmatprep.subr.bf16.mxu0 %v4767_v7  ;;  %v4778_v40 = vld [vmem:[#allocation11 + $0x10] sm:$0xff]   ;;  %v810_v42 = vld [vmem:[%s5837_s19 + $0x8] sm:$0xff]  ;;  %v820_v44 = vpack.c.bf16 %v800_v39, %v799_v38  ;;  %v4779_v45 = vld [vmem:[#allocation11 + $0x18] sm:$0xff]  }
 0x146   : > { %v1097_v46 = vpack.c.bf16 %v810_v42, %v809_v41  ;;  %v4780_v47 = vld [vmem:[#allocation11 + $0x20] sm:$0xff]   ;;  %v4781_v48 = vld [vmem:[#allocation11 + $0x28] sm:$0xff]   ;;  %v4782_v49 = vld [vmem:[#allocation11 + $0x30] sm:$0xff]  }
 0x147   : > { %4376 = vmatpush3.bf16.msra.mxu1 %v4766_v6  ;;  %v4783_v50 = vld [vmem:[#allocation11 + $0x38] sm:$0xff]   ;;  %v811_v51 = vld [vmem:[%s5837_s19 + $0x10] sm:$0xff]  ;;  %v813_v53 = vld [vmem:[%s5837_s19 + $0x20] sm:$0xff] }
 0x148   : > { %4377 = vmatprep.subr.bf16.mxu1 %v4768_v8  ;;  %4352 = vmatpush3.bf16.msra.mxu0 %v4767_v7  ;;  %v812_v52 = vld [vmem:[%s5837_s19 + $0x18] sm:$0xff]  ;;  %v814_v54 = vld [vmem:[%s5837_s19 + $0x28] sm:$0xff]  ;;  %v815_v57 = vld [vmem:[%s5837_s19 + $0x30] sm:$0xff] }
 0x149   : > { %4353 = vmatprep.subr.bf16.mxu0 %v4769_v9  ;;  %v1098_v55 = vpack.c.bf16 %v812_v52, %v811_v51  ;;  %v1099_v56 = vpack.c.bf16 %v814_v54, %v813_v53  ;;  %v816_v58 = vld [vmem:[%s5837_s19 + $0x38] sm:$0xff]  ;;  %v4046_v60 = vld [vmem:[%s6730_s4] ss:$0 sm:$0xff]  ;;  %s5262_s19 = sshll.u32 %s5359_s2, 4  ;;  %s5263_s19 = int_to_ptr.vmem [resolvable:$false] %s5262_s19 }
 0x14a   : > { %v1100_v59 = vpack.c.bf16 %v816_v58, %v815_v57  ;;  %v4055_v62 = vld [vmem:[%s6836_s25] ss:$0 sm:$0xff]  ;;  %s6850_s25 = sld [smem:[#allocation43_spill]]  ;;  %s5264_s27 = scalar_lea.vmem %s5263_s19, 2048 }
 0x14b   : > { %4378 = vmatpush3.bf16.msra.mxu1 %v4768_v8 }
 0x14c   : > { %4379 = vmatprep.subr.bf16.mxu1 %v4770_v12  ;;  %4354 = vmatpush3.bf16.msra.mxu0 %v4769_v9 }
 0x14d   : > { %4355 = vmatprep.subr.bf16.mxu0 %v4771_v14 }
 0x14f   : > { %4380 = vmatpush3.bf16.msra.mxu1 %v4770_v12 }
 0x150   : > { %4381 = vmatprep.subr.bf16.mxu1 %v4772_v18  ;;  %4356 = vmatpush3.bf16.msra.mxu0 %v4771_v14 }
 0x151   : > { %4357 = vmatprep.subr.bf16.mxu0 %v4773_v19 }
 0x153   : > { %4382 = vmatpush3.bf16.msra.mxu1 %v4772_v18 }
 0x154   : > { %4383 = vmatprep.subr.bf16.mxu1 %v4774_v20  ;;  %4358 = vmatpush3.bf16.msra.mxu0 %v4773_v19 }
 0x155   : > { %4359 = vmatprep.subr.bf16.mxu0 %v4775_v21 }
 0x157   : > { %4384 = vmatpush3.bf16.msra.mxu1 %v4774_v20 }
 0x158   : > { %4360 = vmatpush3.bf16.msra.mxu0 %v4775_v21 }
 0x159   : > { %4393 = vmatprep.subr.bf16.mxu0 %v4776_v30 }
 0x15a   : > { %4386 = vmatmul.mubr.bf16.vlgmr.msra.gmra.mrb[0].mxu1 %v958_v31 }
 0x15b   : > { %4362 = vmatmul.mubr.bf16.vlgmr.msra.gmra.mrb[0].mxu0 %v818_v32  ;;  %4389 = vmatprep.mubr.bf16.mxu1 %v959_v33 }
 0x15c   : > { %4365 = vmatprep.mubr.bf16.mxu0 %v819_v35  ;;  %4394 = vmatpush3.bf16.msra.mxu0 %v4776_v30 }
 0x15d   : > { %4395 = vmatprep.subr.bf16.mxu0 %v4777_v34 }
 0x160   : > { %4396 = vmatpush3.bf16.msra.mxu0 %v4777_v34 }
 0x161   : > { %4397 = vmatprep.subr.bf16.mxu0 %v4778_v40 }
 0x162   : > { %4390 = vmatmul.mubr.bf16.gmra.mrb[4].mxu1 %v960_v43  ;;  %v4064_v43 = vld [vmem:[%s6837_s28] ss:$0 sm:$0xff]  ;;  %s6852_s28 = sld [smem:[#allocation45_spill]] }
 0x163   : > { %4366 = vmatmul.mubr.bf16.gmra.mrb[4].mxu0 %v820_v44 }
 0x164   : > { %4398 = vmatpush3.bf16.msra.mxu0 %v4778_v40  ;;  %4409 = vmatprep.mubr.bf16.mxu0 %v1097_v46 }
 0x165   : > { %4399 = vmatprep.subr.bf16.mxu0 %v4779_v45 }
 0x168   : > { %4400 = vmatpush3.bf16.msra.mxu0 %v4779_v45 }
 0x169   : > { %4401 = vmatprep.subr.bf16.mxu0 %v4780_v47 }
 0x16c   : > { %4402 = vmatpush3.bf16.msra.mxu0 %v4780_v47 }
 0x16d   : > { %4403 = vmatprep.subr.bf16.mxu0 %v4781_v48 }
 0x170   : > { %4404 = vmatpush3.bf16.msra.mxu0 %v4781_v48 }
 0x171   : > { %4405 = vmatprep.subr.bf16.mxu0 %v4782_v49 }
 0x174   : > { %4406 = vmatpush3.bf16.msra.mxu0 %v4782_v49 }
 0x175   : > { %4407 = vmatprep.subr.bf16.mxu0 %v4783_v50 }
 0x178   : > { %4408 = vmatpush3.bf16.msra.mxu0 %v4783_v50 }
 0x17b   : > { %4410 = vmatmul.mubr.bf16.vlgmr.msra.gmra.mrb[8].mxu0 %v1098_v55 }
 0x17c   : > { %4413 = vmatprep.mubr.bf16.mxu0 %v1099_v56 }
 0x183   : > { %4414 = vmatmul.mubr.bf16.gmra.mrb[12].mxu0 %v1100_v59 }
 0x22d   : > { %v4387_v61 = vpop.f32.mrb[0].mxu1 }
 0x22e   : > { %v1066_v63 = vpop.f32.mrb[1].mxu1  ;;  %v4363_v0 = vpop.f32.mrb[0].mxu0  ;;  %v1075_v4 = vadd.f32 %v4387_v61, %v4055_v62 }
 0x22f   : > { %v4388_v1 = vpop.f32.mrb[2].mxu1  ;;  %v935_v2 = vadd.f32 %v4363_v0, %v4046_v60  ;;  %v926_v3 = vpop.f32.mrb[1].mxu0  ;;  %v1067_v9 = vadd.f32 %v4055_v62, %v1066_v63 }
 0x230   : > { %v1078_v5 = vadd.f32 %v4388_v1, %v4055_v62  ;;  %v1069_v6 = vpop.f32.mrb[3].mxu1  ;;  %v927_v7 = vadd.f32 %v4046_v60, %v926_v3  ;;  %v4364_v8 = vpop.f32.mrb[2].mxu0 }
 0x231   : > { %v1070_v10 = vadd.f32 %v4055_v62, %v1069_v6  ;;  %v938_v11 = vadd.f32 %v4364_v8, %v4046_v60  ;;  %v929_v12 = vpop.f32.mrb[3].mxu0 }
 0x232   : > { %v1270_v13 = vpack.c.bf16 %v1078_v5, %v1075_v4  ;;  %v930_v14 = vadd.f32 %v4046_v60, %v929_v12 }
 0x233   : > { %v1269_v15 = vpack.c.bf16 %v1070_v10, %v1067_v9  ;;  %v1238_v16 = vpack.c.bf16 %v938_v11, %v935_v2 }
 0x234   : > { %v1237_v17 = vpack.c.bf16 %v930_v14, %v927_v7  ;;  %v1367_v39 = vsel %vm1356_vm0, %v1270_v13, 0 }
 0x235   : > { %v4391_v18 = vpop.f32.mrb[4].mxu1  ;;  %1277 = vrot.lane.b32.xlu0 %v1269_v15, %s5355_s6  ;;  %4617 = vmatprep.subr.msk.bf16.mxu0 %vm1356_vm0, %v1269_v15  ;;  %v1364_v19 = vsel %vm1356_vm0, %v1269_v15, 0 }
 0x236   : > { %v1091_v20 = vadd.f32 %v4391_v18, %v4055_v62  ;;  %v1082_v21 = vpop.f32.mrb[5].mxu1  ;;  %4418 = vmatpush3.bf16.xpose.msra.mxu0 %v1364_v19  ;;  %v4367_v22 = vpop.f32.mrb[4].mxu0  ;;  %4421 = vmatprep.mubr.msk.bf16.mxu0 %vm1356_vm0, %v1237_v17 }
 0x237   : > { %v1083_v23 = vadd.f32 %v4055_v62, %v1082_v21  ;;  %v4392_v24 = vpop.f32.mrb[6].mxu1  ;;  %4618 = vmatprep.subr.msk.bf16.mxu0 %vm1356_vm0, %v1270_v13  ;;  %v951_v25 = vadd.f32 %v4367_v22, %v4046_v60  ;;  %v942_v26 = vpop.f32.mrb[5].mxu0 }
 0x238   : > { %v1094_v27 = vadd.f32 %v4392_v24, %v4055_v62  ;;  %v1085_v28 = vpop.f32.mrb[7].mxu1  ;;  %v943_v29 = vadd.f32 %v4046_v60, %v942_v26  ;;  %v4368_v30 = vpop.f32.mrb[6].mxu0 }
 0x239   : > { %v1086_v31 = vadd.f32 %v4055_v62, %v1085_v28  ;;  %1279 = vrot.lane.b32.xlu0 %v1270_v13, %s5355_s6  ;;  %v954_v32 = vadd.f32 %v4368_v30, %v4046_v60  ;;  %v945_v33 = vpop.f32.mrb[7].mxu0 }
 0x23a   : > { %v1272_v34 = vpack.c.bf16 %v1094_v27, %v1091_v20  ;;  %v946_v35 = vadd.f32 %v4046_v60, %v945_v33 }
 0x23b   : > { %v1271_v36 = vpack.c.bf16 %v1086_v31, %v1083_v23  ;;  %v1240_v37 = vpack.c.bf16 %v954_v32, %v951_v25 }
 0x23c   : > { %v1239_v38 = vpack.c.bf16 %v946_v35, %v943_v29  ;;  %v1428_v41 = vsel %vm1356_vm0, %v1272_v34, 0  ;;  %v1345_v35 = vlaneseq }
 0x23d   : > { %1281 = vrot.lane.b32.xlu1 %v1271_v36, %s5355_s6  ;;  %4619 = vmatprep.subr.msk.bf16.mxu1 %vm1356_vm0, %v1271_v36  ;;  %v1425_v40 = vsel %vm1356_vm0, %v1271_v36, 0 }
 0x23e   : > { %1247 = vrot.lane.b32.xlu0 %v1238_v16, %s5355_s6  ;;  %4420 = vmatpush3.bf16.xpose.msra.mxu0 %v1367_v39 }
 0x23f   : > { %4426 = vmatpush3.bf16.xpose.msra.mxu1 %v1425_v40  ;;  %4429 = vmatprep.mubr.msk.bf16.mxu1 %vm1356_vm0, %v1239_v38 }
 0x240   : > { %4620 = vmatprep.subr.msk.bf16.mxu1 %vm1356_vm0, %v1272_v34 }
 0x241   : > { %1245 = vrot.lane.b32.xlu1 %v1237_v17, %s5355_s6 }
 0x242   : > { %1249 = vrot.lane.b32.xlu0 %v1239_v38, %s5355_s6 }
 0x245   : > { %1283 = vrot.lane.b32.xlu1 %v1272_v34, %s5355_s6  ;;  %4422 = vmatmul.mubr.msk.bf16.vlgmr.msra.gmra.mrb[16].mxu0 %vm1356_vm0, %v1238_v16 }
 0x246   : > { %1285 = vrot.lane.b32.xlu0 %v1269_v15, %s5356_s11 }
 0x247   : > { %4428 = vmatpush3.bf16.xpose.msra.mxu1 %v1428_v41 }
 0x249   : > { %1251 = vrot.lane.b32.xlu1 %v1240_v37, %s5355_s6 }
 0x24a   : > { %1289 = vrot.lane.b32.xlu0 %v1271_v36, %s5356_s11 }
 0x24d   : > { %1287 = vrot.lane.b32.xlu1 %v1270_v13, %s5356_s11 }
 0x24e   : > { %1255 = vrot.lane.b32.xlu0 %v1238_v16, %s5356_s11  ;;  %4430 = vmatmul.mubr.msk.bf16.vlgmr.msra.gmra.mrb[8].mxu1 %vm1356_vm0, %v1240_v37  ;;  %v4411_v42 = vpop.f32.mrb[8].mxu0 }
 0x24f   : > { %v1215_v44 = vadd.f32 %v4411_v42, %v4064_v43  ;;  %v1206_v45 = vpop.f32.mrb[9].mxu0 }
 0x250   : > { %v1207_v46 = vadd.f32 %v4064_v43, %v1206_v45  ;;  %v4412_v47 = vpop.f32.mrb[10].mxu0 }
 0x251   : > { %1253 = vrot.lane.b32.xlu1 %v1237_v17, %s5356_s11  ;;  %v1218_v48 = vadd.f32 %v4412_v47, %v4064_v43  ;;  %v1209_v49 = vpop.f32.mrb[11].mxu0 }
 0x252   : > { %1293 = vrot.lane.b32.xlu0 %v1269_v15, %s5357_s16  ;;  %v1210_v50 = vadd.f32 %v4064_v43, %v1209_v49 }
 0x253   : > { %v5919_v52 = vpack.c.bf16 %v1218_v48, %v1215_v44 }
 0x254   : > { %v5921_v55 = vpack.c.bf16 %v1210_v50, %v1207_v46 }
 0x255   : > { %1291 = vrot.lane.b32.xlu1 %v1272_v34, %s5356_s11 }
 0x256   : > { %1259 = vrot.lane.b32.xlu0 %v1240_v37, %s5356_s11  ;;  %v4415_v51 = vpop.f32.mrb[12].mxu0 }
 0x257   : > { %v1231_v53 = vadd.f32 %v4415_v51, %v4064_v43  ;;  %v1222_v54 = vpop.f32.mrb[13].mxu0 }
 0x258   : > { %v1223_v56 = vadd.f32 %v4064_v43, %v1222_v54  ;;  %v4416_v57 = vpop.f32.mrb[14].mxu0 }
 0x259   : > { %1257 = vrot.lane.b32.xlu1 %v1239_v38, %s5356_s11  ;;  %v1234_v58 = vadd.f32 %v4416_v57, %v4064_v43  ;;  %v1225_v59 = vpop.f32.mrb[15].mxu0 }
 0x25a   : > { %1261 = vrot.lane.b32.xlu0 %v1237_v17, %s5357_s16  ;;  %v1226_v60 = vadd.f32 %v4064_v43, %v1225_v59 }
 0x25b   : > { %v5926_v61 = vpack.c.bf16 %v1234_v58, %v1231_v53 }
 0x25c   : > { %v5928_v62 = vpack.c.bf16 %v1226_v60, %v1223_v56 }
 0x25d   : > { %1295 = vrot.lane.b32.xlu1 %v1270_v13, %s5357_s16 }
 0x25e   : > { %1297 = vrot.lane.b32.xlu0 %v1271_v36, %s5357_s16  ;;  %v5984_v36 = vshrl.u32 %v1345_v35, 7 }
 0x260   : > { %v1347_v39 = vadd.s32 8, %v5984_v36  ;;  %v1349_v43 = vadd.s32 24, %v5984_v36  ;;  %vm2693_vm5 = vcmp.ge.s32.totalorder %v5984_v36, 1 }
 0x261   : > { %1263 = vrot.lane.b32.xlu1 %v1238_v16, %s5357_s16 }
 0x262   : > { %1265 = vrot.lane.b32.xlu0 %v1239_v38, %s5357_s16  ;;  %v1351_v38 = vand.u32 127, %v1345_v35 }
 0x264   : > { %vm5993_vm2 = vcmp.lt.s32.totalorder %v1351_v38, %v5984_v36  ;;  %vm6002_vm3 = vcmp.lt.s32.totalorder %v1351_v38, %v1347_v39  ;;  %vm6014_vm4 = vcmp.lt.s32.totalorder %v1351_v38, %v1349_v43 }
 0x265   : > { %1299 = vrot.lane.b32.xlu1 %v1272_v34, %s5357_s16 }
 0x266   : > { %1311 = vrot.lane.b32.xlu0 %v5919_v52, %s5355_s6 }
 0x269   : > { %1267 = vrot.lane.b32.xlu1 %v1240_v37, %s5357_s16  ;;  %v1348_v37 = vadd.s32 16, %v5984_v36 }
 0x26a   : > { %1315 = vrot.lane.b32.xlu0 %v5926_v61, %s5355_s6 }
 0x26b   : > { %vm5988_vm1 = vcmp.lt.s32.totalorder %v1351_v38, %v1348_v37 }
 0x26d   : > { %1323 = vrot.lane.b32.xlu1 %v5919_v52, %s5356_s11 }
 0x271   : > { %1309 = vrot.lane.b32.xlu1 %v5921_v55, %s5355_s6 }
 0x275   : > { %1321 = vrot.lane.b32.xlu1 %v5921_v55, %s5356_s11 }
 0x279   : > { %1313 = vrot.lane.b32.xlu1 %v5928_v62, %s5355_s6 }
 0x2a7   : > { %v1278_v63 = vpop.permute.xlu0 %1277 }
 0x2a8   : > { %4621 = vmatprep.subr.msk.bf16.mxu0 %vm1356_vm0, %v1278_v63  ;;  %v1486_v0 = vsel %vm1356_vm0, %v1278_v63, 0 }
 0x2a9   : > { %4434 = vmatpush3.bf16.xpose.msra.mxu0 %v1486_v0 }
 0x2ab   : > { %v1280_v1 = vpop.permute.xlu0 %1279 }
 0x2ac   : > { %4622 = vmatprep.subr.msk.bf16.mxu0 %vm1356_vm0, %v1280_v1  ;;  %v1489_v4 = vsel %vm1356_vm0, %v1280_v1, 0 }
 0x2af   : > { %v1282_v2 = vpop.permute.xlu1 %1281 }
 0x2b0   : > { %v1248_v3 = vpop.permute.xlu0 %1247  ;;  %4623 = vmatprep.subr.msk.bf16.mxu1 %vm1356_vm0, %v1282_v2  ;;  %v1547_v5 = vsel %vm1356_vm0, %v1282_v2, 0 }
 0x2b1   : > { %4436 = vmatpush3.bf16.xpose.msra.mxu0 %v1489_v4  ;;  %4442 = vmatpush3.bf16.xpose.msra.mxu1 %v1547_v5 }
 0x2b3   : > { %v1246_v6 = vpop.permute.xlu1 %1245 }
 0x2b4   : > { %v1250_v7 = vpop.permute.xlu0 %1249  ;;  %4437 = vmatprep.mubr.msk.bf16.mxu0 %vm1356_vm0, %v1246_v6 }
 0x2b5   : > { %4445 = vmatprep.mubr.msk.bf16.mxu1 %vm1356_vm0, %v1250_v7 }
 0x2b7   : > { %v1284_v8 = vpop.permute.xlu1 %1283 }
 0x2b8   : > { %v1286_v9 = vpop.permute.xlu0 %1285  ;;  %4438 = vmatmul.mubr.msk.bf16.vlgmr.msra.gmra.mrb[20].mxu0 %vm1356_vm0, %v1248_v3  ;;  %4624 = vmatprep.subr.msk.bf16.mxu1 %vm1356_vm0, %v1284_v8  ;;  %v1550_v10 = vsel %vm1356_vm0, %v1284_v8, 0 }
 0x2b9   : > { %4625 = vmatprep.subr.msk.bf16.mxu0 %vm1356_vm0, %v1286_v9  ;;  %4444 = vmatpush3.bf16.xpose.msra.mxu1 %v1550_v10  ;;  %v1608_v11 = vsel %vm1356_vm0, %v1286_v9, 0 }
 0x2ba   : > { %4450 = vmatpush3.bf16.xpose.msra.mxu0 %v1608_v11 }
 0x2bb   : > { %v1252_v12 = vpop.permute.xlu1 %1251 }
 0x2bc   : > { %v1290_v13 = vpop.permute.xlu0 %1289 }
 0x2bd   : > { %4627 = vmatprep.subr.msk.bf16.mxu1 %vm1356_vm0, %v1290_v13  ;;  %v1669_v17 = vsel %vm1356_vm0, %v1290_v13, 0 }
 0x2bf   : > { %v1288_v14 = vpop.permute.xlu1 %1287 }
 0x2c0   : > { %v1256_v15 = vpop.permute.xlu0 %1255  ;;  %4446 = vmatmul.mubr.msk.bf16.vlgmr.msra.gmra.mrb[12].mxu1 %vm1356_vm0, %v1252_v12  ;;  %4626 = vmatprep.subr.msk.bf16.mxu0 %vm1356_vm0, %v1288_v14  ;;  %v1611_v16 = vsel %vm1356_vm0, %v1288_v14, 0 }
 0x2c1   : > { %4458 = vmatpush3.bf16.xpose.msra.mxu1 %v1669_v17 }
 0x2c2   : > { %4452 = vmatpush3.bf16.xpose.msra.mxu0 %v1611_v16 }
 0x2c3   : > { %v1254_v18 = vpop.permute.xlu1 %1253 }
 0x2c4   : > { %v1294_v19 = vpop.permute.xlu0 %1293  ;;  %4453 = vmatprep.mubr.msk.bf16.mxu0 %vm1356_vm0, %v1254_v18 }
 0x2c5   : > { %4629 = vmatprep.subr.msk.bf16.mxu0 %vm1356_vm0, %v1294_v19  ;;  %v1730_v23 = vsel %vm1356_vm0, %v1294_v19, 0 }
 0x2c7   : > { %v1292_v20 = vpop.permute.xlu1 %1291 }
 0x2c8   : > { %v1260_v21 = vpop.permute.xlu0 %1259  ;;  %4628 = vmatprep.subr.msk.bf16.mxu1 %vm1356_vm0, %v1292_v20  ;;  %v1672_v22 = vsel %vm1356_vm0, %v1292_v20, 0 }
 0x2c9   : > { %4454 = vmatmul.mubr.msk.bf16.vlgmr.msra.gmra.mrb[24].mxu0 %vm1356_vm0, %v1256_v15  ;;  %4460 = vmatpush3.bf16.xpose.msra.mxu1 %v1672_v22 }
 0x2ca   : > { %4466 = vmatpush3.bf16.xpose.msra.mxu0 %v1730_v23 }
 0x2cb   : > { %v1258_v24 = vpop.permute.xlu1 %1257 }
 0x2cc   : > { %v1262_v25 = vpop.permute.xlu0 %1261  ;;  %4461 = vmatprep.mubr.msk.bf16.mxu1 %vm1356_vm0, %v1258_v24 }
 0x2cd   : > { %4469 = vmatprep.mubr.msk.bf16.mxu0 %vm1356_vm0, %v1262_v25 }
 0x2cf   : > { %v1296_v26 = vpop.permute.xlu1 %1295 }
 0x2d0   : > { %v1298_v27 = vpop.permute.xlu0 %1297  ;;  %4462 = vmatmul.mubr.msk.bf16.vlgmr.msra.gmra.mrb[16].mxu1 %vm1356_vm0, %v1260_v21  ;;  %4630 = vmatprep.subr.msk.bf16.mxu0 %vm1356_vm0, %v1296_v26  ;;  %v1733_v28 = vsel %vm1356_vm0, %v1296_v26, 0 }
 0x2d1   : > { %4631 = vmatprep.subr.msk.bf16.mxu1 %vm1356_vm0, %v1298_v27  ;;  %v1791_v29 = vsel %vm1356_vm0, %v1298_v27, 0 }
 0x2d2   : > { %4468 = vmatpush3.bf16.xpose.msra.mxu0 %v1733_v28  ;;  %4474 = vmatpush3.bf16.xpose.msra.mxu1 %v1791_v29 }
 0x2d3   : > { %v1264_v30 = vpop.permute.xlu1 %1263  ;;  %4481 = vmatprep.subr.bf16.mxu0 %v5921_v55 }
 0x2d4   : > { %v1266_v31 = vpop.permute.xlu0 %1265 }
 0x2d5   : > { %4477 = vmatprep.mubr.msk.bf16.mxu1 %vm1356_vm0, %v1266_v31 }
 0x2d7   : > { %v1300_v32 = vpop.permute.xlu1 %1299 }
 0x2d8   : > { %4632 = vmatprep.subr.msk.bf16.mxu1 %vm1356_vm0, %v1300_v32  ;;  %v1794_v33 = vsel %vm1356_vm0, %v1300_v32, 0 }
 0x2d9   : > { %4470 = vmatmul.mubr.msk.bf16.vlgmr.msra.gmra.mrb[28].mxu0 %vm1356_vm0, %v1264_v30 }
 0x2da   : > { %4476 = vmatpush3.bf16.xpose.msra.mxu1 %v1794_v33  ;;  %4482 = vmatpush3.bf16.msra.mxu0 %v5921_v55 }
 0x2db   : > { %4483 = vmatprep.subr.bf16.mxu0 %v5919_v52  ;;  %4489 = vmatprep.subr.bf16.mxu1 %v5928_v62  ;;  %v1268_v34 = vpop.permute.xlu1 %1267 }
 0x2de   : > { %4484 = vmatpush3.bf16.msra.mxu0 %v5919_v52 }
 0x2df   : > { %v6008_v49 = vpop.permute.xlu1 %1323 }
 0x2e1   : > { %4478 = vmatmul.mubr.msk.bf16.vlgmr.msra.gmra.mrb[20].mxu1 %vm1356_vm0, %v1268_v34 }
 0x2e2   : > { %4490 = vmatpush3.bf16.msra.mxu1 %v5928_v62 }
 0x2e3   : > { %4491 = vmatprep.subr.bf16.mxu1 %v5926_v61  ;;  %v6030_v59 = vpop.permute.xlu1 %1309 }
 0x2e4   : > { %4497 = vmatprep.subr.bf16.mxu0 %v6030_v59 }
 0x2e6   : > { %4492 = vmatpush3.bf16.msra.mxu1 %v5926_v61 }
 0x2e7   : > { %v6049_v7 = vpop.permute.xlu1 %1321 }
 0x2eb   : > { %v6059_v11 = vpop.permute.xlu1 %1313 }
 0x2ec   : > { %4505 = vmatprep.subr.bf16.mxu1 %v6059_v11 }
 0x318   : > { %v4423_v41 = vpop.f32.mrb[16].mxu0 }
 0x319   : > { %v6000_v44 = vsel %vm5988_vm1, %v4423_v41, -1e+32  ;;  %v1403_v45 = vpop.f32.mrb[17].mxu0 }
 0x31a   : > { %v4424_v47 = vpop.f32.mrb[18].mxu0  ;;  %v1891_v48 = vsel %vm1356_vm0, %v6000_v44, -inf  ;;  %v6012_v50 = vsel %vm5993_vm2, %v1403_v45, -1e+32 }
 0x31b   : > { %1892 = vmax.xlane.f32.xlu0 %v1891_v48  ;;  %v1406_v51 = vpop.f32.mrb[19].mxu0  ;;  %v1885_v57 = vsel %vm1356_vm0, %v6012_v50, -inf  ;;  %v6028_v58 = vsel %vm6014_vm4, %v4424_v47, -1e+32 }
 0x31c   : > { %v6020_v54 = vsel %vm6002_vm3, %v1406_v51, -1e+32  ;;  %v1894_v1 = vsel %vm1356_vm0, %v6028_v58, -inf }
 0x31d   : > { %v1888_v56 = vsel %vm1356_vm0, %v6020_v54, -inf }
 0x31e   : > { %1889 = vmax.xlane.f32.xlu1 %v1888_v56 }
 0x31f   : > { %1886 = vmax.xlane.f32.xlu0 %v1885_v57 }
 0x321   : > { %v4431_v60 = vpop.f32.mrb[8].mxu1 }
 0x322   : > { %v6035_v63 = vsel %vm5988_vm1, %v4431_v60, -1e+32  ;;  %v1464_v0 = vpop.f32.mrb[9].mxu1 }
 0x323   : > { %v4432_v2 = vpop.f32.mrb[10].mxu1  ;;  %1895 = vmax.xlane.f32.xlu0 %v1894_v1  ;;  %v1903_v3 = vsel %vm1356_vm0, %v6035_v63, -inf  ;;  %v6043_v4 = vsel %vm5993_vm2, %v1464_v0, -1e+32  ;;  %v6112_v1 = vpop.permute.xlu0 %1311 }
 0x324   : > { %v6047_v5 = vsel %vm6014_vm4, %v4432_v2, -1e+32  ;;  %v1467_v6 = vpop.f32.mrb[11].mxu1  ;;  %1904 = vmax.xlane.f32.xlu1 %v1903_v3  ;;  %v1897_v10 = vsel %vm1356_vm0, %v6043_v4, -inf }
 0x325   : > { %v1906_v8 = vsel %vm1356_vm0, %v6047_v5, -inf  ;;  %v6055_v9 = vsel %vm6002_vm3, %v1467_v6, -1e+32 }
 0x326   : > { %v1900_v12 = vsel %vm1356_vm0, %v6055_v9, -inf }
 0x327   : > { %1907 = vmax.xlane.f32.xlu0 %v1906_v8  ;;  %v6118_v3 = vpop.permute.xlu0 %1315 }
 0x328   : > { %1898 = vmax.xlane.f32.xlu1 %v1897_v10 }
 0x32b   : > { %1901 = vmax.xlane.f32.xlu0 %v1900_v12 }
 0x38b   : > { %v4439_v13 = vpop.f32.mrb[20].mxu0 }
 0x38c   : > { %v6066_v14 = vsel %vm5988_vm1, %v4439_v13, -1e+32  ;;  %v1525_v15 = vpop.f32.mrb[21].mxu0 }
 0x38d   : > { %v4440_v16 = vpop.f32.mrb[22].mxu0  ;;  %v1915_v17 = vsel %vm1356_vm0, %v6066_v14, -inf  ;;  %v6072_v18 = vsel %vm5993_vm2, %v1525_v15, -1e+32 }
 0x38e   : > { %v6076_v19 = vsel %vm6014_vm4, %v4440_v16, -1e+32  ;;  %1916 = vmax.xlane.f32.xlu1 %v1915_v17  ;;  %v1528_v20 = vpop.f32.mrb[23].mxu0  ;;  %v1909_v23 = vsel %vm1356_vm0, %v6072_v18, -inf }
 0x38f   : > { %v1918_v21 = vsel %vm1356_vm0, %v6076_v19, -inf  ;;  %v6082_v22 = vsel %vm6002_vm3, %v1528_v20, -1e+32 }
 0x390   : > { %1919 = vmax.xlane.f32.xlu0 %v1918_v21  ;;  %v1912_v25 = vsel %vm1356_vm0, %v6082_v22, -inf }
 0x392   : > { %1910 = vmax.xlane.f32.xlu1 %v1909_v23 }
 0x393   : > { %v4447_v24 = vpop.f32.mrb[12].mxu1 }
 0x394   : > { %v6090_v26 = vsel %vm5988_vm1, %v4447_v24, -1e+32  ;;  %v1586_v27 = vpop.f32.mrb[13].mxu1  ;;  %1913 = vmax.xlane.f32.xlu0 %v1912_v25 }
 0x395   : > { %v4448_v28 = vpop.f32.mrb[14].mxu1  ;;  %v1927_v29 = vsel %vm1356_vm0, %v6090_v26, -inf  ;;  %v6096_v30 = vsel %vm5993_vm2, %v1586_v27, -1e+32 }
 0x396   : > { %v1589_v31 = vpop.f32.mrb[15].mxu1  ;;  %1928 = vmax.xlane.f32.xlu1 %v1927_v29  ;;  %v1921_v32 = vsel %vm1356_vm0, %v6096_v30, -inf  ;;  %v6116_v2 = vsel %vm6014_vm4, %v4448_v28, -1e+32 }
 0x397   : > { %v1930_v6 = vsel %vm1356_vm0, %v6116_v2, -inf  ;;  %v6124_v8 = vsel %vm6002_vm3, %v1589_v31, -1e+32 }
 0x398   : > { %v1924_v13 = vsel %vm1356_vm0, %v6124_v8, -inf }
 0x39a   : > { %1922 = vmax.xlane.f32.xlu1 %v1921_v32 }
 0x39c   : > { %v4455_v33 = vpop.f32.mrb[24].mxu0 }
 0x39d   : > { %v1647_v34 = vpop.f32.mrb[25].mxu0  ;;  %v6128_v10 = vsel %vm5988_vm1, %v4455_v33, -1e+32 }
 0x39e   : > { %v4456_v35 = vpop.f32.mrb[26].mxu0  ;;  %v1939_v16 = vsel %vm1356_vm0, %v6128_v10, -inf  ;;  %v6140_v17 = vsel %vm5993_vm2, %v1647_v34, -1e+32 }
 0x39f   : > { %v1650_v37 = vpop.f32.mrb[27].mxu0  ;;  %v6134_v15 = vsel %vm6014_vm4, %v4456_v35, -1e+32  ;;  %v1933_v24 = vsel %vm1356_vm0, %v6140_v17, -inf }
 0x3a0   : > { %v1942_v20 = vsel %vm1356_vm0, %v6134_v15, -inf  ;;  %v6146_v21 = vsel %vm6002_vm3, %v1650_v37, -1e+32 }
 0x3a1   : > { %v1936_v27 = vsel %vm1356_vm0, %v6146_v21, -inf }
 0x3a3   : > { %v4463_v38 = vpop.f32.mrb[16].mxu1 }
 0x3a4   : > { %v1708_v39 = vpop.f32.mrb[17].mxu1  ;;  %v6152_v25 = vsel %vm5988_vm1, %v4463_v38, -1e+32 }
 0x3a5   : > { %v4464_v41 = vpop.f32.mrb[18].mxu1  ;;  %v1951_v31 = vsel %vm1356_vm0, %v6152_v25, -inf  ;;  %v6164_v32 = vsel %vm5993_vm2, %v1708_v39, -1e+32 }
 0x3a6   : > { %v1711_v43 = vpop.f32.mrb[19].mxu1  ;;  %v6158_v28 = vsel %vm6014_vm4, %v4464_v41, -1e+32  ;;  %v1945_v38 = vsel %vm1356_vm0, %v6164_v32, -inf }
 0x3a7   : > { %v1954_v34 = vsel %vm1356_vm0, %v6158_v28, -inf  ;;  %v6170_v35 = vsel %vm6002_vm3, %v1711_v43, -1e+32 }
 0x3a8   : > { %v1893_v12 = vpop.xlane.xlu0 %1892 }
 0x3a9   : > { %v1983_v37 = vsub.f32 %v6000_v44, %v1893_v12 }
 0x3aa   : > { %1327 = vrot.lane.b32.xlu0 %v5926_v61, %s5356_s11 }
 0x3ab   : > { %1325 = vrot.lane.b32.xlu1 %v5928_v62, %s5356_s11  ;;  %v1890_v29 = vpop.xlane.xlu1 %1889 }
 0x3ac   : > { %v4471_v45 = vpop.f32.mrb[28].mxu0  ;;  %v1887_v23 = vpop.xlane.xlu0 %1886 }
 0x3ad   : > { %v1769_v47 = vpop.f32.mrb[29].mxu0  ;;  %v6177_v41 = vsel %vm5988_vm1, %v4471_v45, -1e+32  ;;  %v1981_v43 = vsub.f32 %v6012_v50, %v1887_v23 }
 0x3ae   : > { %v4472_v48 = vpop.f32.mrb[30].mxu0  ;;  %v1963_v45 = vsel %vm1356_vm0, %v6177_v41, -inf }
 0x3af   : > { %v1772_v51 = vpop.f32.mrb[31].mxu0  ;;  %v6185_v44 = vsel %vm6014_vm4, %v4472_v48, -1e+32  ;;  %v2013_v23 = vmul.f32 1.442695, %v1981_v43 }
 0x3b0   : > { %v1896_v33 = vpop.xlane.xlu0 %1895  ;;  %v1966_v50 = vsel %vm1356_vm0, %v6185_v44, -inf  ;;  %v6198_v48 = vsel %vm6002_vm3, %v1772_v51, -1e+32 }
 0x3b1   : > { %v1984_v39 = vsub.f32 %v6028_v58, %v1896_v33  ;;  %v6192_v58 = vsel %vm5993_vm2, %v1769_v47, -1e+32  ;;  %v1960_v51 = vsel %vm1356_vm0, %v6198_v48, -inf }
 0x3b4   : > { %v6104_v56 = vpop.f32.mrb[20].mxu1  ;;  %v1908_v12 = vpop.xlane.xlu0 %1907 }
 0x3b5   : > { %v6106_v57 = vpop.f32.mrb[21].mxu1  ;;  %v1988_v33 = vsub.f32 %v6047_v5, %v1908_v12 }
 0x3b6   : > { %v6108_v60 = vpop.f32.mrb[22].mxu1  ;;  %v6222_v5 = vsel %vm5993_vm2, %v6106_v57, -1e+32 }
 0x3b7   : > { %v6110_v0 = vpop.f32.mrb[23].mxu1  ;;  %v1969_v42 = vsel %vm1356_vm0, %v6222_v5, -inf }
 0x3c9   : > { %1931 = vmax.xlane.f32.xlu0 %v1930_v6  ;;  %v1905_v6 = vpop.xlane.xlu1 %1904 }
 0x3cd   : > { %1925 = vmax.xlane.f32.xlu0 %v1924_v13  ;;  %v1948_v13 = vsel %vm1356_vm0, %v6170_v35, -inf }
 0x3cf   : > { %1940 = vmax.xlane.f32.xlu1 %v1939_v16  ;;  %v2017_v16 = vmul.f32 1.442695, %v1983_v37 }
 0x3d1   : > { %1943 = vmax.xlane.f32.xlu0 %v1942_v20  ;;  %v1982_v20 = vsub.f32 %v6020_v54, %v1890_v29  ;;  %4832 = vpow2.f32 %v2017_v16  ;;  %v1957_v54 = vsel %vm1356_vm0, %v6192_v58, -inf  ;;  %v6206_v29 = vsel %vm5988_vm1, %v6104_v56, -1e+32 }
 0x3d2   : > { %v1975_v40 = vsel %vm1356_vm0, %v6206_v29, -inf  ;;  %v2027_v56 = vmul.f32 1.442695, %v1988_v33 }
 0x3d3   : > { %1934 = vmax.xlane.f32.xlu1 %v1933_v24  ;;  %v2019_v24 = vmul.f32 1.442695, %v1984_v39  ;;  %v2015_v47 = vmul.f32 1.442695, %v1982_v20 }
 0x3d5   : > { %1937 = vmax.xlane.f32.xlu0 %v1936_v27  ;;  %v1987_v27 = vsub.f32 %v6035_v63, %v1905_v6  ;;  %4834 = vpow2.f32 %v2019_v24 }
 0x3d6   : > { %4836 = vpow2.f32 %v2013_v23 }
 0x3d7   : > { %1952 = vmax.xlane.f32.xlu1 %v1951_v31  ;;  %v1899_v31 = vpop.xlane.xlu1 %1898  ;;  %v2025_v63 = vmul.f32 1.442695, %v1987_v27  ;;  %4838 = vpow2.f32 %v2015_v47 }
 0x3d8   : > { %v1985_v37 = vsub.f32 %v6043_v4, %v1899_v31 }
 0x3d9   : > { %1955 = vmax.xlane.f32.xlu0 %v1954_v34  ;;  %v1902_v34 = vpop.xlane.xlu0 %1901  ;;  %4840 = vpow2.f32 %v2025_v63 }
 0x3da   : > { %v1986_v39 = vsub.f32 %v6055_v9, %v1902_v34  ;;  %v2021_v53 = vmul.f32 1.442695, %v1985_v37  ;;  %4842 = vpow2.f32 %v2027_v56 }
 0x3db   : > { %1946 = vmax.xlane.f32.xlu1 %v1945_v38  ;;  %v6215_v38 = vsel %vm6014_vm4, %v6108_v60, -1e+32  ;;  %v6230_v60 = vsel %vm6002_vm3, %v6110_v0, -1e+32  ;;  %v6234_v57 = vpop.eup %4832 }
 0x3dc   : > { %v1978_v4 = vsel %vm1356_vm0, %v6215_v38, -inf  ;;  %v2023_v6 = vmul.f32 1.442695, %v1986_v39  ;;  %v1972_v9 = vsel %vm1356_vm0, %v6230_v60, -inf  ;;  %4844 = vpow2.f32 %v2021_v53 }
 0x3dd   : > { %1949 = vmax.xlane.f32.xlu0 %v1948_v13  ;;  %v2083_v46 = vsel %vm1356_vm0, %v6234_v57, 0.0 }
 0x3de   : > { %4846 = vpow2.f32 %v2023_v6 }
 0x3df   : > { %1964 = vmax.xlane.f32.xlu1 %v1963_v45  ;;  %v6238_v13 = vpop.eup %4834 }
 0x3e0   : > { %v6242_v0 = vpop.eup %4836  ;;  %v2086_v16 = vsel %vm1356_vm0, %v6238_v13, 0.0 }
 0x3e1   : > { %1967 = vmax.xlane.f32.xlu0 %v1966_v50  ;;  %v6246_v43 = vpop.eup %4838  ;;  %v2077_v12 = vsel %vm1356_vm0, %v6242_v0, 0.0 }
 0x3e2   : > { %v2080_v20 = vsel %vm1356_vm0, %v6246_v43, 0.0 }
 0x3e3   : > { %1958 = vmax.xlane.f32.xlu1 %v1957_v54  ;;  %v6250_v45 = vpop.eup %4840 }
 0x3e4   : > { %v6254_v24 = vpop.eup %4842  ;;  %v2095_v50 = vsel %vm1356_vm0, %v6250_v45, 0.0 }
 0x3e5   : > { %1961 = vmax.xlane.f32.xlu0 %v1960_v51  ;;  %v2098_v27 = vsel %vm1356_vm0, %v6254_v24, 0.0 }
 0x3e6   : > { %v6258_v23 = vpop.eup %4844 }
 0x3e7   : > { %1976 = vmax.xlane.f32.xlu1 %v1975_v40  ;;  %v2089_v54 = vsel %vm1356_vm0, %v6258_v23, 0.0 }
 0x3e8   : > { %v6262_v31 = vpop.eup %4846 }
 0x3e9   : > { %1979 = vmax.xlane.f32.xlu0 %v1978_v4  ;;  %v2092_v47 = vsel %vm1356_vm0, %v6262_v31, 0.0 }
 0x3eb   : > { %1970 = vmax.xlane.f32.xlu1 %v1969_v42 }
 0x3ed   : > { %1973 = vmax.xlane.f32.xlu0 %v1972_v9 }
 0x3ef   : > { %2084 = vadd.xlane.f32.xlu1 %v2083_v46 }
 0x3f1   : > { %2087 = vadd.xlane.f32.xlu0 %v2086_v16 }
 0x3f3   : > { %2078 = vadd.xlane.f32.xlu1 %v2077_v12 }
 0x3f5   : > { %2081 = vadd.xlane.f32.xlu0 %v2080_v20 }
 0x3f7   : > { %2096 = vadd.xlane.f32.xlu1 %v2095_v50 }
 0x3f9   : > { %2099 = vadd.xlane.f32.xlu0 %v2098_v27 }
 0x3fb   : > { %2090 = vadd.xlane.f32.xlu1 %v2089_v54 }
 0x3fd   : > { %2093 = vadd.xlane.f32.xlu0 %v2092_v47 }
 0x41b   : > { %v1917_v33 = vpop.xlane.xlu1 %1916 }
 0x41c   : > { %v1991_v34 = vsub.f32 %v6066_v14, %v1917_v33 }
 0x41d   : > { %v1920_v51 = vpop.xlane.xlu0 %1919 }
 0x41e   : > { %v2033_v63 = vmul.f32 1.442695, %v1991_v34  ;;  %v1992_v37 = vsub.f32 %v6076_v19, %v1920_v51 }
 0x41f   : > { %v1911_v40 = vpop.xlane.xlu1 %1910 }
 0x420   : > { %4848 = vpow2.f32 %v2033_v63  ;;  %v2035_v56 = vmul.f32 1.442695, %v1992_v37  ;;  %v1989_v39 = vsub.f32 %v6072_v18, %v1911_v40 }
 0x421   : > { %v1914_v4 = vpop.xlane.xlu0 %1913 }
 0x422   : > { %4850 = vpow2.f32 %v2035_v56  ;;  %v2029_v53 = vmul.f32 1.442695, %v1989_v39  ;;  %v1990_v42 = vsub.f32 %v6082_v22, %v1914_v4 }
 0x423   : > { %v1929_v6 = vpop.xlane.xlu1 %1928 }
 0x424   : > { %4852 = vpow2.f32 %v2029_v53  ;;  %v2031_v9 = vmul.f32 1.442695, %v1990_v42  ;;  %v1995_v46 = vsub.f32 %v6090_v26, %v1929_v6 }
 0x425   : > { %v6298_v63 = vpop.permute.xlu0 %1327 }
 0x426   : > { %4854 = vpow2.f32 %v2031_v9  ;;  %v2041_v14 = vmul.f32 1.442695, %v1995_v46 }
 0x427   : > { %v1923_v16 = vpop.xlane.xlu1 %1922 }
 0x428   : > { %4856 = vpow2.f32 %v2041_v14  ;;  %v1993_v19 = vsub.f32 %v6096_v30, %v1923_v16 }
 0x42a   : > { %v6274_v12 = vpop.eup %4848  ;;  %v2037_v20 = vmul.f32 1.442695, %v1993_v19 }
 0x42b   : > { %v2107_v18 = vsel %vm1356_vm0, %v6274_v12, 0.0  ;;  %v6301_v56 = vpop.permute.xlu1 %1325 }
 0x42c   : > { %v6278_v50 = vpop.eup %4850  ;;  %4858 = vpow2.f32 %v2037_v20  ;;  %2108 = vadd.xlane.f32.xlu1 %v2107_v18 }
 0x42d   : > { %v2110_v22 = vsel %vm1356_vm0, %v6278_v50, 0.0 }
 0x42e   : > { %v6282_v26 = vpop.eup %4852  ;;  %2111 = vadd.xlane.f32.xlu0 %v2110_v22 }
 0x42f   : > { %v2101_v27 = vsel %vm1356_vm0, %v6282_v26, 0.0 }
 0x430   : > { %v6286_v30 = vpop.eup %4854  ;;  %2102 = vadd.xlane.f32.xlu1 %v2101_v27 }
 0x431   : > { %v2104_v54 = vsel %vm1356_vm0, %v6286_v30, 0.0 }
 0x432   : > { %v6290_v47 = vpop.eup %4856  ;;  %2105 = vadd.xlane.f32.xlu0 %v2104_v54 }
 0x433   : > { %v2119_v33 = vsel %vm1356_vm0, %v6290_v47, 0.0 }
 0x434   : > { %2120 = vadd.xlane.f32.xlu1 %v2119_v33 }
 0x436   : > { %v6294_v34 = vpop.eup %4858 }
 0x437   : > { %v2113_v51 = vsel %vm1356_vm0, %v6294_v34, 0.0 }
 0x438   : > { %2114 = vadd.xlane.f32.xlu1 %v2113_v51 }
 0x456   : > { %v1932_v37 = vpop.xlane.xlu0 %1931 }
 0x457   : > { %v1996_v40 = vsub.f32 %v6116_v2, %v1932_v37 }
 0x459   : > { %v2043_v39 = vmul.f32 1.442695, %v1996_v40 }
 0x45a   : > { %v1926_v4 = vpop.xlane.xlu0 %1925 }
 0x45b   : > { %4860 = vpow2.f32 %v2043_v39  ;;  %v1994_v53 = vsub.f32 %v6124_v8, %v1926_v4 }
 0x45c   : > { %v1941_v42 = vpop.xlane.xlu1 %1940 }
 0x45d   : > { %v2039_v6 = vmul.f32 1.442695, %v1994_v53  ;;  %v1999_v9 = vsub.f32 %v6128_v10, %v1941_v42 }
 0x45e   : > { %v1944_v46 = vpop.xlane.xlu0 %1943 }
 0x45f   : > { %4862 = vpow2.f32 %v2039_v6  ;;  %v2049_v14 = vmul.f32 1.442695, %v1999_v9  ;;  %v2000_v16 = vsub.f32 %v6134_v15, %v1944_v46 }
 0x460   : > { %v1935_v19 = vpop.xlane.xlu1 %1934 }
 0x461   : > { %4864 = vpow2.f32 %v2049_v14  ;;  %v1997_v2 = vsub.f32 %v6140_v17, %v1935_v19  ;;  %v2051_v20 = vmul.f32 1.442695, %v2000_v16 }
 0x462   : > { %v1938_v18 = vpop.xlane.xlu0 %1937 }
 0x463   : > { %v2045_v22 = vmul.f32 1.442695, %v1997_v2  ;;  %v1998_v27 = vsub.f32 %v6146_v21, %v1938_v18 }
 0x464   : > { %v1953_v54 = vpop.xlane.xlu1 %1952 }
 0x465   : > { %v6308_v8 = vpop.eup %4860  ;;  %4866 = vpow2.f32 %v2045_v22  ;;  %v2047_v33 = vmul.f32 1.442695, %v1998_v27  ;;  %v2003_v10 = vsub.f32 %v6152_v25, %v1953_v54 }
 0x466   : > { %4868 = vpow2.f32 %v2051_v20  ;;  %v1956_v51 = vpop.xlane.xlu0 %1955  ;;  %v2122_v15 = vsel %vm1356_vm0, %v6308_v8, 0.0 }
 0x467   : > { %4870 = vpow2.f32 %v2047_v33  ;;  %v2057_v37 = vmul.f32 1.442695, %v2003_v10  ;;  %2123 = vadd.xlane.f32.xlu0 %v2122_v15  ;;  %v2004_v25 = vsub.f32 %v6158_v28, %v1956_v51 }
 0x468   : > { %v1947_v17 = vpop.xlane.xlu1 %1946 }
 0x469   : > { %v6313_v40 = vpop.eup %4862  ;;  %v2001_v21 = vsub.f32 %v6164_v32, %v1947_v17  ;;  %4872 = vpow2.f32 %v2057_v37  ;;  %v2059_v32 = vmul.f32 1.442695, %v2004_v25 }
 0x46a   : > { %v1950_v39 = vpop.xlane.xlu0 %1949  ;;  %v2116_v4 = vsel %vm1356_vm0, %v6313_v40, 0.0 }
 0x46b   : > { %v6318_v53 = vpop.eup %4864  ;;  %v2053_v42 = vmul.f32 1.442695, %v2001_v21  ;;  %2117 = vadd.xlane.f32.xlu0 %v2116_v4  ;;  %v2002_v16 = vsub.f32 %v6170_v35, %v1950_v39 }
 0x46c   : > { %v6321_v6 = vpop.xlane.xlu1 %1964  ;;  %v2131_v46 = vsel %vm1356_vm0, %v6318_v53, 0.0 }
 0x46d   : > { %4874 = vpow2.f32 %v2053_v42  ;;  %v2055_v27 = vmul.f32 1.442695, %v2002_v16 }
 0x46e   : > { %v1968_v9 = vpop.xlane.xlu0 %1967  ;;  %4876 = vpow2.f32 %v2059_v32 }
 0x46f   : > { %v6325_v14 = vpop.eup %4866  ;;  %2132 = vadd.xlane.f32.xlu0 %v2131_v46  ;;  %v2008_v51 = vsub.f32 %v6185_v44, %v1968_v9  ;;  %4878 = vpow2.f32 %v2055_v27 }
 0x470   : > { %v6328_v19 = vpop.eup %4868  ;;  %v1959_v2 = vpop.xlane.xlu1 %1958  ;;  %v2125_v28 = vsel %vm1356_vm0, %v6325_v14, 0.0 }
 0x471   : > { %v6332_v20 = vpop.eup %4870  ;;  %2126 = vadd.xlane.f32.xlu1 %v2125_v28  ;;  %v2005_v54 = vsub.f32 %v6192_v58, %v1959_v2  ;;  %v2134_v33 = vsel %vm1356_vm0, %v6328_v19, 0.0  ;;  %v2067_v4 = vmul.f32 1.442695, %v2008_v51 }
 0x472   : > { %v1962_v18 = vpop.xlane.xlu0 %1961  ;;  %v2128_v22 = vsel %vm1356_vm0, %v6332_v20, 0.0 }
 0x473   : > { %2129 = vadd.xlane.f32.xlu0 %v2128_v22  ;;  %v6341_v10 = vpop.eup %4872  ;;  %v2061_v37 = vmul.f32 1.442695, %v2005_v54  ;;  %v2006_v17 = vsub.f32 %v6198_v48, %v1962_v18 }
 0x474   : > { %v6337_v35 = vpop.xlane.xlu1 %1976  ;;  %v2143_v58 = vsel %vm1356_vm0, %v6341_v10, 0.0 }
 0x475   : > { %2135 = vadd.xlane.f32.xlu1 %v2134_v33  ;;  %4880 = vpow2.f32 %v2061_v37  ;;  %v2063_v42 = vmul.f32 1.442695, %v2006_v17 }
 0x476   : > { %v6344_v15 = vpop.xlane.xlu0 %1979  ;;  %4882 = vpow2.f32 %v2067_v4 }
 0x477   : > { %v6351_v39 = vpop.eup %4874  ;;  %4884 = vpow2.f32 %v2063_v42 }
 0x478   : > { %v6347_v21 = vpop.xlane.xlu1 %1970  ;;  %v2137_v44 = vsel %vm1356_vm0, %v6351_v39, 0.0  ;;  %v6355_v9 = vpop.eup %4876 }
 0x479   : > { %2144 = vadd.xlane.f32.xlu1 %v2143_v58  ;;  %v2146_v2 = vsel %vm1356_vm0, %v6355_v9, 0.0  ;;  %v6360_v28 = vpop.eup %4878 }
 0x47a   : > { %v1974_v25 = vpop.xlane.xlu0 %1973  ;;  %v2140_v54 = vsel %vm1356_vm0, %v6360_v28, 0.0 }
 0x47b   : > { %v2010_v32 = vsub.f32 %v6230_v60, %v1974_v25 }
 0x47c   : > { %v2085_v46 = vpop.xlane.xlu1 %2084 }
 0x47d   : > { %2138 = vadd.xlane.f32.xlu1 %v2137_v44  ;;  %v2071_v22 = vmul.f32 1.442695, %v2010_v32 }
 0x47e   : > { %v2088_v48 = vpop.xlane.xlu0 %2087 }
 0x47f   : > { %4886 = vrcp.f32 %v2088_v48  ;;  %v6364_v33 = vpop.eup %4880 }
 0x480   : > { %v2079_v16 = vpop.xlane.xlu1 %2078  ;;  %v6366_v51 = vpop.eup %4882  ;;  %v2149_v17 = vsel %vm1356_vm0, %v6364_v33, 0.0 }
 0x481   : > { %4888 = vrcp.f32 %v2079_v16  ;;  %2147 = vadd.xlane.f32.xlu1 %v2146_v2  ;;  %v6370_v58 = vpop.eup %4884  ;;  %v2158_v44 = vsel %vm1356_vm0, %v6366_v51, 0.0 }
 0x482   : > { %4890 = vrcp.f32 %v2085_v46  ;;  %v2082_v18 = vpop.xlane.xlu0 %2081 }
 0x483   : > { %4892 = vrcp.f32 %v2082_v18 }
 0x484   : > { %v2097_v27 = vpop.xlane.xlu1 %2096  ;;  %4894 = vpow2.f32 %v2071_v22 }
 0x485   : > { %2141 = vadd.xlane.f32.xlu1 %v2140_v54 }
 0x486   : > { %v2100_v60 = vpop.xlane.xlu0 %2099 }
 0x487   : > { %4896 = vrcp.f32 %v2100_v60 }
 0x488   : > { %v2091_v37 = vpop.xlane.xlu1 %2090 }
 0x489   : > { %4898 = vrcp.f32 %v2091_v37  ;;  %2150 = vadd.xlane.f32.xlu1 %v2149_v17  ;;  %1333 = vrot.lane.b32.xlu0 %v5921_v55, %s5357_s16  ;;  %v4887_v4 = vpop.eup %4886  ;;  %v2152_v55 = vsel %vm1356_vm0, %v6370_v58, 0.0  ;;  %v2007_v37 = vsub.f32 %v6177_v41, %v6321_v6  ;;  %v2011_v41 = vsub.f32 %v6206_v29, %v6337_v35 }
 0x48a   : > { %4900 = vrcp.f32 %v2097_v27  ;;  %v2094_v25 = vpop.xlane.xlu0 %2093  ;;  %v2208_v32 = vmul.f32 %v4887_v4, %v6238_v13 }
 0x48b   : > { %v4889_v42 = vpop.eup %4888  ;;  %4902 = vrcp.f32 %v2094_v25  ;;  %v2065_v4 = vmul.f32 1.442695, %v2007_v37 }
 0x48c   : > { %v4891_v46 = vpop.eup %4890  ;;  %v2205_v16 = vmul.f32 %v4889_v42, %v6242_v0 }
 0x48d   : > { %v4893_v48 = vpop.eup %4892  ;;  %2159 = vadd.xlane.f32.xlu1 %v2158_v44  ;;  %v2207_v18 = vmul.f32 %v4891_v46, %v6234_v57  ;;  %4904 = vpow2.f32 %v2065_v4  ;;  %v2009_v44 = vsub.f32 %v6222_v5, %v6347_v21 }
 0x48e   : > { %v2206_v2 = vmul.f32 %v4893_v48, %v6246_v43  ;;  %v6382_v27 = vpop.eup %4894 }
 0x48f   : > { %v2238_v54 = vpack.c.bf16 %v2208_v32, %v2207_v18  ;;  %v2164_v57 = vsel %vm1356_vm0, %v6382_v27, 0.0  ;;  %v2069_v29 = vmul.f32 1.442695, %v2009_v44 }
 0x490   : > { %v2237_v22 = vpack.c.bf16 %v2206_v2, %v2205_v16 }
 0x491   : > { %2153 = vadd.xlane.f32.xlu1 %v2152_v55  ;;  %v4897_v60 = vpop.eup %4896 }
 0x492   : > { %4485 = vmatprep.mubr.msk.bf16.mxu0 %vm1356_vm0, %v2237_v22  ;;  %v2212_v17 = vmul.f32 %v4897_v60, %v6254_v24  ;;  %v2073_v24 = vmul.f32 1.442695, %v2011_v41 }
 0x493   : > { %v4899_v13 = vpop.eup %4898  ;;  %4486 = vmatmul.mubr.msk.bf16.vlgmr.msra.gmra.mrb[32].mxu0 %vm1356_vm0, %v2238_v54 }
 0x494   : > { %v4901_v0 = vpop.eup %4900  ;;  %4498 = vmatpush3.bf16.msra.mxu0 %v6030_v59  ;;  %v2209_v6 = vmul.f32 %v4899_v13, %v6258_v23  ;;  %4906 = vpow2.f32 %v2073_v24 }
 0x495   : > { %v4903_v43 = vpop.eup %4902  ;;  %4499 = vmatprep.subr.bf16.mxu0 %v6112_v1  ;;  %2165 = vadd.xlane.f32.xlu1 %v2164_v57  ;;  %v2211_v42 = vmul.f32 %v4901_v0, %v6250_v45  ;;  %4908 = vpow2.f32 %v2069_v29 }
 0x496   : > { %v2210_v25 = vmul.f32 %v4903_v43, %v6262_v31 }
 0x497   : > { %v2240_v46 = vpack.c.bf16 %v2212_v17, %v2211_v42  ;;  %v6410_v5 = vpop.eup %4904 }
 0x498   : > { %4500 = vmatpush3.bf16.msra.mxu0 %v6112_v1  ;;  %v2239_v59 = vpack.c.bf16 %v2210_v25, %v2209_v6  ;;  %v2012_v1 = vsub.f32 %v6215_v38, %v6344_v15 }
 0x499   : > { %4513 = vmatprep.subr.bf16.mxu0 %v6049_v7 }
 0x49a   : > { %4493 = vmatprep.mubr.msk.bf16.mxu1 %vm1356_vm0, %v2239_v59  ;;  %v2075_v45 = vmul.f32 1.442695, %v2012_v1 }
 0x49b   : > { %4494 = vmatmul.mubr.msk.bf16.vlgmr.msra.gmra.mrb[24].mxu1 %vm1356_vm0, %v2240_v46 }
 0x49c   : > { %4506 = vmatpush3.bf16.msra.mxu1 %v6059_v11  ;;  %4910 = vpow2.f32 %v2075_v45  ;;  %v2155_v11 = vsel %vm1356_vm0, %v6410_v5, 0.0 }
 0x49d   : > { %4507 = vmatprep.subr.bf16.mxu1 %v6118_v3 }
 0x49e   : > { %v6416_v23 = vpop.eup %4906 }
 0x49f   : > { %v2167_v38 = vsel %vm1356_vm0, %v6416_v23, 0.0 }
 0x4a0   : > { %4508 = vmatpush3.bf16.msra.mxu1 %v6118_v3  ;;  %v6420_v3 = vpop.eup %4908 }
 0x4a1   : > { %4521 = vmatprep.subr.bf16.mxu1 %v6301_v56  ;;  %v2161_v31 = vsel %vm1356_vm0, %v6420_v3, 0.0 }
 0x4a6   : > { %1335 = vrot.lane.b32.xlu1 %v5919_v52, %s5357_s16  ;;  %v6424_v35 = vpop.eup %4910 }
 0x4a7   : > { %v2170_v52 = vsel %vm1356_vm0, %v6424_v35, 0.0 }
 0x4a8   : > { %2156 = vadd.xlane.f32.xlu0 %v2155_v11 }
 0x4ac   : > { %2168 = vadd.xlane.f32.xlu0 %v2167_v38 }
 0x4b0   : > { %2162 = vadd.xlane.f32.xlu0 %v2161_v31 }
 0x4b4   : > { %2171 = vadd.xlane.f32.xlu0 %v2170_v52 }
 0x4b9   : > { %v2109_v15 = vpop.xlane.xlu1 %2108 }
 0x4bb   : > { %v2112_v21 = vpop.xlane.xlu0 %2111 }
 0x4bc   : > { %4912 = vrcp.f32 %v2112_v21 }
 0x4bd   : > { %v2103_v48 = vpop.xlane.xlu1 %2102 }
 0x4be   : > { %4914 = vrcp.f32 %v2103_v48 }
 0x4bf   : > { %4916 = vrcp.f32 %v2109_v15  ;;  %v2106_v32 = vpop.xlane.xlu0 %2105 }
 0x4c0   : > { %4918 = vrcp.f32 %v2106_v32 }
 0x4c6   : > { %v4913_v16 = vpop.eup %4912 }
 0x4c7   : > { %v2216_v22 = vmul.f32 %v4913_v16, %v6278_v50 }
 0x4c8   : > { %v4915_v2 = vpop.eup %4914 }
 0x4c9   : > { %v4917_v18 = vpop.eup %4916  ;;  %v2213_v54 = vmul.f32 %v4915_v2, %v6282_v26 }
 0x4ca   : > { %v4919_v55 = vpop.eup %4918  ;;  %1337 = vrot.lane.b32.xlu0 %v5928_v62, %s5357_s16  ;;  %v2215_v37 = vmul.f32 %v4917_v18, %v6274_v12  ;;  %v2121_v62 = vpop.xlane.xlu1 %2120 }
 0x4cb   : > { %v2214_v60 = vmul.f32 %v4919_v55, %v6286_v30 }
 0x4cc   : > { %v2242_v0 = vpack.c.bf16 %v2216_v22, %v2215_v37 }
 0x4cd   : > { %v2241_v13 = vpack.c.bf16 %v2214_v60, %v2213_v54  ;;  %v4784_v60 = vld [vmem:[#allocation13 + $0x10] sm:$0xff]  }
 0x4ce   : > { %1339 = vrot.lane.b32.xlu0 %v5926_v61, %s5357_s16  ;;  %v2115_v50 = vpop.xlane.xlu1 %2114  ;;  %s6851_s16 = sld [smem:[#allocation44_spill]] }
 0x4cf   : > { %4501 = vmatprep.mubr.msk.bf16.mxu0 %vm1356_vm0, %v2241_v13 }
 0x4d0   : > { %4502 = vmatmul.mubr.msk.bf16.vlgmr.msra.gmra.mrb[36].mxu0 %vm1356_vm0, %v2242_v0 }
 0x4d1   : > { %4514 = vmatpush3.bf16.msra.mxu0 %v6049_v7 }
 0x4d2   : > { %4515 = vmatprep.subr.bf16.mxu0 %v6008_v49 }
 0x4d5   : > { %4516 = vmatpush3.bf16.msra.mxu0 %v6008_v49 }
 0x4f4   : > { %v2124_v26 = vpop.xlane.xlu0 %2123 }
 0x4f5   : > { %4920 = vrcp.f32 %v2124_v26 }
 0x4f6   : > { %4922 = vrcp.f32 %v2115_v50 }
 0x4f7   : > { %4924 = vrcp.f32 %v2121_v62 }
 0x4f8   : > { %v2118_v12 = vpop.xlane.xlu0 %2117 }
 0x4f9   : > { %4926 = vrcp.f32 %v2118_v12 }
 0x4fc   : > { %v2133_v61 = vpop.xlane.xlu0 %2132 }
 0x4fe   : > { %v2127_v30 = vpop.xlane.xlu1 %2126 }
 0x4ff   : > { %4928 = vrcp.f32 %v2127_v30  ;;  %v4921_v57 = vpop.eup %4920 }
 0x500   : > { %4930 = vrcp.f32 %v2133_v61  ;;  %v2130_v43 = vpop.xlane.xlu0 %2129  ;;  %v4923_v17 = vpop.eup %4922  ;;  %v2220_v49 = vmul.f32 %v4921_v57, %v6308_v8  ;;  %v4785_v57 = vld [vmem:[#allocation13 + $0x18] sm:$0xff]  }
 0x501   : > { %4932 = vrcp.f32 %v2130_v43  ;;  %v4925_v7 = vpop.eup %4924  ;;  %v2217_v25 = vmul.f32 %v4923_v17, %v6294_v34 }
 0x502   : > { %v2136_v4 = vpop.xlane.xlu1 %2135  ;;  %v2219_v59 = vmul.f32 %v4925_v7, %v6290_v47 }
 0x503   : > { %v4927_v41 = vpop.eup %4926  ;;  %4934 = vrcp.f32 %v2136_v4 }
 0x504   : > { %v1334_v6 = vpop.permute.xlu0 %1333  ;;  %v2218_v42 = vmul.f32 %v4927_v41, %v6313_v40  ;;  %v2244_v44 = vpack.c.bf16 %v2220_v49, %v2219_v59 }
 0x505   : > { %4529 = vmatprep.subr.bf16.mxu0 %v1334_v6 }
 0x506   : > { %v2145_v46 = vpop.xlane.xlu1 %2144  ;;  %v2243_v24 = vpack.c.bf16 %v2218_v42, %v2217_v25 }
 0x508   : > { %4509 = vmatprep.mubr.msk.bf16.mxu1 %vm1356_vm0, %v2243_v24 }
 0x509   : > { %v4929_v1 = vpop.eup %4928  ;;  %4510 = vmatmul.mubr.msk.bf16.vlgmr.msra.gmra.mrb[28].mxu1 %vm1356_vm0, %v2244_v44 }
 0x50a   : > { %v4931_v29 = vpop.eup %4930  ;;  %4522 = vmatpush3.bf16.msra.mxu1 %v6301_v56  ;;  %v2139_v8 = vpop.xlane.xlu1 %2138  ;;  %v2221_v34 = vmul.f32 %v4929_v1, %v6325_v14 }
 0x50b   : > { %v4933_v45 = vpop.eup %4932  ;;  %4523 = vmatprep.subr.bf16.mxu1 %v6298_v63  ;;  %v2223_v11 = vmul.f32 %v4931_v29, %v6318_v53 }
 0x50c   : > { %v2222_v47 = vmul.f32 %v4933_v45, %v6332_v20 }
 0x50d   : > { %v4935_v40 = vpop.eup %4934 }
 0x50e   : > { %v2224_v38 = vmul.f32 %v4935_v40, %v6328_v19  ;;  %4524 = vmatpush3.bf16.msra.mxu1 %v6298_v63  ;;  %v2148_v31 = vpop.xlane.xlu1 %2147  ;;  %v2245_v52 = vpack.c.bf16 %v2222_v47, %v2221_v34 }
 0x50f   : > { %4936 = vrcp.f32 %v2148_v31 }
 0x510   : > { %4517 = vmatprep.mubr.msk.bf16.mxu0 %vm1356_vm0, %v2245_v52  ;;  %v2246_v56 = vpack.c.bf16 %v2224_v38, %v2223_v11  ;;  %4938 = vrcp.f32 %v2139_v8 }
 0x511   : > { %4940 = vrcp.f32 %v2145_v46  ;;  %v4786_v46 = vld [vmem:[#allocation13] sm:$0xff]  }
 0x512   : > { %v2142_v15 = vpop.xlane.xlu1 %2141  ;;  %4518 = vmatmul.mubr.msk.bf16.vlgmr.msra.gmra.mrb[40].mxu0 %vm1356_vm0, %v2246_v56 }
 0x513   : > { %4942 = vrcp.f32 %v2142_v15  ;;  %4530 = vmatpush3.bf16.msra.mxu0 %v1334_v6 }
 0x516   : > { %v2151_v14 = vpop.xlane.xlu1 %2150 }
 0x517   : > { %4944 = vrcp.f32 %v2151_v14 }
 0x519   : > { %v4937_v20 = vpop.eup %4936 }
 0x51a   : > { %v2160_v53 = vpop.xlane.xlu1 %2159  ;;  %v4939_v21 = vpop.eup %4938  ;;  %v2228_v63 = vmul.f32 %v4937_v20, %v6355_v9 }
 0x51b   : > { %v4941_v19 = vpop.eup %4940  ;;  %v2225_v16 = vmul.f32 %v4939_v21, %v6351_v39  ;;  %v4788_v21 = vld [vmem:[#allocation13 + $0x20] sm:$0xff]  }
 0x51c   : > { %v2227_v18 = vmul.f32 %v4941_v19, %v6341_v10 }
 0x51d   : > { %v4943_v48 = vpop.eup %4942 }
 0x51e   : > { %v2154_v32 = vpop.xlane.xlu1 %2153  ;;  %v2226_v2 = vmul.f32 %v4943_v48, %v6360_v28  ;;  %v2248_v22 = vpack.c.bf16 %v2228_v63, %v2227_v18 }
 0x51f   : > { %4946 = vrcp.f32 %v2154_v32 }
 0x520   : > { %v2247_v55 = vpack.c.bf16 %v2226_v2, %v2225_v16  ;;  %4948 = vrcp.f32 %v2160_v53  ;;  %v4787_v53 = vld [vmem:[#allocation13 + $0x8] sm:$0xff]  }
 0x521   : > { %v4945_v13 = vpop.eup %4944 }
 0x522   : > { %v2166_v54 = vpop.xlane.xlu1 %2165  ;;  %4525 = vmatprep.mubr.msk.bf16.mxu1 %vm1356_vm0, %v2247_v55  ;;  %v2229_v39 = vmul.f32 %v4945_v13, %v6364_v33 }
 0x523   : > { %4526 = vmatmul.mubr.msk.bf16.vlgmr.msra.gmra.mrb[32].mxu1 %vm1356_vm0, %v2248_v22 }
 0x526   : > { %v1336_v37 = vpop.permute.xlu1 %1335 }
 0x527   : > { %4531 = vmatprep.subr.bf16.mxu0 %v1336_v37 }
 0x528   : > { %4532 = vmatpush3.bf16.msra.mxu0 %v1336_v37 }
 0x529   : > { %v4947_v9 = vpop.eup %4946  ;;  %4545 = vmatprep.subr.bf16.mxu0 %v4784_v60 }
 0x52a   : > { %v2230_v28 = vmul.f32 %v4947_v9, %v6370_v58  ;;  %v4949_v26 = vpop.eup %4948 }
 0x52b   : > { %v2232_v61 = vmul.f32 %v4949_v26, %v6366_v51 }
 0x52c   : > { %v2249_v10 = vpack.c.bf16 %v2230_v28, %v2229_v39  ;;  %v4789_v39 = vld [vmem:[#allocation13 + $0x28] sm:$0xff]   ;;  %v4790_v28 = vld [vmem:[#allocation13 + $0x30] sm:$0xff]  }
 0x52e   : > { %4533 = vmatprep.mubr.msk.bf16.mxu0 %vm1356_vm0, %v2249_v10 }
 0x535   : > { %v2157_v0 = vpop.xlane.xlu0 %2156 }
 0x536   : > { %4950 = vrcp.f32 %v2157_v0 }
 0x537   : > { %4952 = vrcp.f32 %v2166_v54 }
 0x539   : > { %v2169_v62 = vpop.xlane.xlu0 %2168 }
 0x53d   : > { %v2163_v50 = vpop.xlane.xlu0 %2162 }
 0x53e   : > { %4954 = vrcp.f32 %v2163_v50 }
 0x53f   : > { %4956 = vrcp.f32 %v2169_v62 }
 0x540   : > { %v4951_v12 = vpop.eup %4950 }
 0x541   : > { %v2231_v30 = vmul.f32 %v4951_v12, %v6410_v5  ;;  %v2172_v33 = vpop.xlane.xlu0 %2171  ;;  %v4953_v17 = vpop.eup %4952 }
 0x542   : > { %4958 = vrcp.f32 %v2172_v33  ;;  %v2234_v51 = vmul.f32 %v4953_v17, %v6382_v27 }
 0x543   : > { %v2250_v58 = vpack.c.bf16 %v2232_v61, %v2231_v30  ;;  %v4791_v61 = vld [vmem:[#allocation13 + $0x38] sm:$0xff]  }
 0x545   : > { %4534 = vmatmul.mubr.msk.bf16.vlgmr.msra.gmra.mrb[44].mxu0 %vm1356_vm0, %v2250_v58  ;;  %v1338_v43 = vpop.permute.xlu0 %1337 }
 0x546   : > { %4537 = vmatprep.subr.bf16.mxu1 %v1338_v43  ;;  %4546 = vmatpush3.bf16.msra.mxu0 %v4784_v60 }
 0x547   : > { %4538 = vmatpush3.bf16.msra.mxu1 %v1338_v43  ;;  %4547 = vmatprep.subr.bf16.mxu0 %v4785_v57 }
 0x548   : > { %v4955_v7 = vpop.eup %4954 }
 0x549   : > { %v1340_v4 = vpop.permute.xlu0 %1339  ;;  %v2233_v41 = vmul.f32 %v4955_v7, %v6420_v3  ;;  %v4957_v49 = vpop.eup %4956 }
 0x54a   : > { %4539 = vmatprep.subr.bf16.mxu1 %v1340_v4  ;;  %4548 = vmatpush3.bf16.msra.mxu0 %v4785_v57  ;;  %v2235_v25 = vmul.f32 %v4957_v49, %v6416_v23 }
 0x54b   : > { %4540 = vmatpush3.bf16.msra.mxu1 %v1340_v4  ;;  %v2251_v5 = vpack.c.bf16 %v2234_v51, %v2233_v41  ;;  %4557 = vmatprep.subr.bf16.mxu0 %v4786_v46 }
 0x54c   : > { %v4959_v6 = vpop.eup %4958 }
 0x54d   : > { %v2236_v42 = vmul.f32 %v4959_v6, %v6424_v35  ;;  %4541 = vmatprep.mubr.msk.bf16.mxu1 %vm1356_vm0, %v2251_v5 }
 0x54f   : > { %v2252_v59 = vpack.c.bf16 %v2236_v42, %v2235_v25 }
 0x551   : > { %4542 = vmatmul.mubr.msk.bf16.vlgmr.msra.gmra.mrb[36].mxu1 %vm1356_vm0, %v2252_v59  ;;  %v4129_v59 = vld [vmem:[%s6846_s22] ss:$0 sm:$0xff]  ;;  %s3841_s22 = sshll.u32 %s6659_s12, 4  ;;  %s6680_s22 = int_to_ptr.vmem [resolvable:$true] %s3841_s22 }
 0x552   : > { %p5265_p7 = scmp.lt.s32.totalorder %s6680_s22, %s5263_s19 }
 0x566   : > { %v4487_v27 = vpop.f32.mrb[32].mxu0 }
 0x567   : > { %v2293_v3 = vpop.f32.mrb[33].mxu0 }
 0x568   : > { %v2705_v24 = vsel %vm2693_vm5, %v2293_v3, 0.0  ;;  %v4488_v44 = vpop.f32.mrb[34].mxu0 }
 0x569   : > { %v2738_v1 = vpack.c.bf16 %v4488_v44, %v4487_v27  ;;  %v2296_v29 = vpop.f32.mrb[35].mxu0 }
 0x56a   : > { %v2737_v23 = vpack.c.bf16 %v2296_v29, %v2705_v24  ;;  %v4992_v29 = vld [vmem:[%s5822_s3] sm:$0xff] }
 0x56e   : > { %v4495_v8 = vpop.f32.mrb[24].mxu1 }
 0x56f   : > { %v2348_v35 = vpop.f32.mrb[25].mxu1 }
 0x570   : > { %v2709_v45 = vsel %vm2693_vm5, %v2348_v35, 0.0  ;;  %v4496_v34 = vpop.f32.mrb[26].mxu1  ;;  %v4993_v35 = vld [vmem:[%s5822_s3 + $0x8] sm:$0xff] }
 0x571   : > { %v2740_v47 = vpack.c.bf16 %v4496_v34, %v4495_v8  ;;  %v2351_v40 = vpop.f32.mrb[27].mxu1  ;;  %v4994_v34 = vld [vmem:[%s5822_s3 + $0x10] sm:$0xff] }
 0x572   : > { %v2739_v11 = vpack.c.bf16 %v2351_v40, %v2709_v45 }
 0x5a3   : > { %v4503_v38 = vpop.f32.mrb[36].mxu0 }
 0x5a4   : > { %v2403_v31 = vpop.f32.mrb[37].mxu0 }
 0x5a5   : > { %v2713_v52 = vsel %vm2693_vm5, %v2403_v31, 0.0  ;;  %v4504_v56 = vpop.f32.mrb[38].mxu0 }
 0x5a6   : > { %v2742_v15 = vpack.c.bf16 %v4504_v56, %v4503_v38  ;;  %v2406_v14 = vpop.f32.mrb[39].mxu0 }
 0x5a7   : > { %v2741_v20 = vpack.c.bf16 %v2406_v14, %v2713_v52 }
 0x5a9   : > { %4549 = vmatprep.mubr.msk.bf16.mxu0 %vm1356_vm0, %v2741_v20  ;;  %v4996_v20 = vld [vmem:[%s5822_s3 + $0x30] sm:$0xff] }
 0x5aa   : > { %4550 = vmatmul.mubr.msk.bf16.vlgmr.msra.gmra.mrb[48].mxu0 %vm1356_vm0, %v2742_v15 }
 0x5ab   : > { %4558 = vmatpush3.bf16.msra.mxu0 %v4786_v46 }
 0x5ac   : > { %4559 = vmatprep.subr.bf16.mxu0 %v4787_v53 }
 0x5af   : > { %4560 = vmatpush3.bf16.msra.mxu0 %v4787_v53 }
 0x5b0   : > { %4569 = vmatprep.subr.bf16.mxu0 %v4788_v21 }
 0x5dc   : > { %v4511_v19 = vpop.f32.mrb[28].mxu1 }
 0x5dd   : > { %v2458_v48 = vpop.f32.mrb[29].mxu1 }
 0x5de   : > { %v2717_v63 = vsel %vm2693_vm5, %v2458_v48, 0.0  ;;  %v4512_v32 = vpop.f32.mrb[30].mxu1 }
 0x5df   : > { %v2744_v16 = vpack.c.bf16 %v4512_v32, %v4511_v19  ;;  %v2461_v2 = vpop.f32.mrb[31].mxu1  ;;  %v4997_v19 = vld [vmem:[%s5822_s3 + $0x20] sm:$0xff] }
 0x5e0   : > { %v2743_v18 = vpack.c.bf16 %v2461_v2, %v2717_v63 }
 0x5e2   : > { %4553 = vmatprep.mubr.msk.bf16.mxu0 %vm1356_vm0, %v2743_v18  ;;  %v4999_v18 = vld [vmem:[%s5822_s3 + $0x38] sm:$0xff] }
 0x5e3   : > { %4554 = vmatmul.mubr.msk.bf16.gmra.mrb[52].mxu0 %vm1356_vm0, %v2744_v16  ;;  %v4998_v16 = vld [vmem:[%s5822_s3 + $0x28] sm:$0xff] }
 0x5e4   : > { %4561 = vmatprep.mubr.msk.bf16.mxu0 %vm1356_vm0, %v2737_v23 }
 0x5e5   : > { %v4519_v55 = vpop.f32.mrb[40].mxu0 }
 0x5e6   : > { %v2513_v22 = vpop.f32.mrb[41].mxu0 }
 0x5e7   : > { %v2721_v54 = vsel %vm2693_vm5, %v2513_v22, 0.0  ;;  %v4520_v60 = vpop.f32.mrb[42].mxu0  ;;  %v4792_v22 = vld [vmem:[#allocation14] ss:$8 sps:$4 sm:$0xff]  }
 0x5e8   : > { %v2746_v37 = vpack.c.bf16 %v4520_v60, %v4519_v55  ;;  %v2516_v13 = vpop.f32.mrb[43].mxu0  ;;  %v4797_v60 = vld [vmem:[#allocation14 + $0x14] ss:$8 sps:$4 sm:$0xff]  }
 0x5e9   : > { %v2745_v9 = vpack.c.bf16 %v2516_v13, %v2721_v54  ;;  %v4794_v54 = vld [vmem:[#allocation14 + $0x4] ss:$8 sps:$4 sm:$0xff]  }
 0x5ea   : > { %3395 = vmatprep.subr.bf16.mxu1 %v4794_v54 }
 0x5eb   : > { %4562 = vmatmul.mubr.msk.bf16.vlgmr.msra.gmra.mrb[48].mxu0 %vm1356_vm0, %v2738_v1  ;;  %3396 = vmatpush1.bf16.msra.mxu1 %v4792_v22 }
 0x5ec   : > { %4565 = vmatprep.mubr.msk.bf16.mxu0 %vm1356_vm0, %v2739_v11  ;;  %4570 = vmatpush3.bf16.msra.mxu0 %v4788_v21  ;;  %v4995_v11 = vld [vmem:[%s5822_s3 + $0x18] sm:$0xff]  ;;  %s6847_s3 = sld [smem:[#allocation39_spill]] }
 0x5ed   : > { %4571 = vmatprep.subr.bf16.mxu0 %v4789_v39  ;;  %3397 = vmatprep.subr.bf16.mxu1 %v4797_v60 }
 0x5f0   : > { %4572 = vmatpush3.bf16.msra.mxu0 %v4789_v39 }
 0x5f1   : > { %4581 = vmatprep.subr.bf16.mxu0 %v4790_v28 }
 0x5f3   : > { %4566 = vmatmul.mubr.msk.bf16.gmra.mrb[52].mxu0 %vm1356_vm0, %v2740_v47 }
 0x5f4   : > { %4573 = vmatprep.mubr.msk.bf16.mxu0 %vm1356_vm0, %v2745_v9 }
 0x5f6   : > { %v4527_v10 = vpop.f32.mrb[32].mxu1 }
 0x5f7   : > { %v2568_v0 = vpop.f32.mrb[33].mxu1 }
 0x5f8   : > { %v2725_v62 = vsel %vm2693_vm5, %v2568_v0, 0.0  ;;  %v4528_v50 = vpop.f32.mrb[34].mxu1 }
 0x5f9   : > { %v2748_v26 = vpack.c.bf16 %v4528_v50, %v4527_v10  ;;  %v2571_v12 = vpop.f32.mrb[35].mxu1 }
 0x5fa   : > { %v2747_v30 = vpack.c.bf16 %v2571_v12, %v2725_v62 }
 0x5fb   : > { %4574 = vmatmul.mubr.msk.bf16.vlgmr.msra.gmra.mrb[48].mxu0 %vm1356_vm0, %v2746_v37  ;;  %v4795_v37 = vld [vmem:[#allocation14 + $0x10] ss:$8 sps:$4 sm:$0xff]  }
 0x5fc   : > { %4577 = vmatprep.mubr.msk.bf16.mxu0 %vm1356_vm0, %v2747_v30  ;;  %4582 = vmatpush3.bf16.msra.mxu0 %v4790_v28 }
 0x5fd   : > { %4583 = vmatprep.subr.bf16.mxu0 %v4791_v61  ;;  %3398 = vmatpush1.bf16.msra.mxu1 %v4795_v37  ;;  %v6554_v37 = vld [vmem:[%s6847_s3] ss:$0 sm:$0xff]  ;;  %s6854_s3 = sld [smem:[#allocation46_spill]] }
 0x600   : > { %4584 = vmatpush3.bf16.msra.mxu0 %v4791_v61 }
 0x603   : > { %4578 = vmatmul.mubr.msk.bf16.gmra.mrb[52].mxu0 %vm1356_vm0, %v2748_v26  ;;  %s6678_s7 = scalar_lea.hbm %s6854_s3, %s4180_s5 }
 0x618   : > { %v4535_v33 = vpop.f32.mrb[44].mxu0 }
 0x619   : > { %v2623_v58 = vpop.f32.mrb[45].mxu0 }
 0x61a   : > { %v2729_v57 = vsel %vm2693_vm5, %v2623_v58, 0.0  ;;  %v4536_v43 = vpop.f32.mrb[46].mxu0 }
 0x61b   : > { %v2750_v17 = vpack.c.bf16 %v4536_v43, %v4535_v33  ;;  %v2626_v7 = vpop.f32.mrb[47].mxu0 }
 0x61c   : > { %v2749_v4 = vpack.c.bf16 %v2626_v7, %v2729_v57 }
 0x61e   : > { %4585 = vmatprep.mubr.msk.bf16.mxu0 %vm1356_vm0, %v2749_v4 }
 0x61f   : > { %4586 = vmatmul.mubr.msk.bf16.vlgmr.msra.gmra.mrb[48].mxu0 %vm1356_vm0, %v2750_v17 }
 0x624   : > { %v4543_v41 = vpop.f32.mrb[36].mxu1 }
 0x625   : > { %v2678_v51 = vpop.f32.mrb[37].mxu1 }
 0x626   : > { %v2733_v49 = vsel %vm2693_vm5, %v2678_v51, 0.0  ;;  %v4544_v5 = vpop.f32.mrb[38].mxu1 }
 0x627   : > { %v2752_v6 = vpack.c.bf16 %v4544_v5, %v4543_v41  ;;  %v2681_v25 = vpop.f32.mrb[39].mxu1 }
 0x628   : > { %v2751_v42 = vpack.c.bf16 %v2681_v25, %v2733_v49 }
 0x62a   : > { %4589 = vmatprep.mubr.msk.bf16.mxu0 %vm1356_vm0, %v2751_v42 }
 0x62b   : > { %4590 = vmatmul.mubr.msk.bf16.gmra.mrb[52].mxu0 %vm1356_vm0, %v2752_v6 }
 0x6f2   : > { %v4587_v46 = vpop.f32.mrb[48].mxu0 }
 0x6f3   : > { %v3102_v27 = vpop.f32.mrb[49].mxu0  ;;  %v3150_v1 = vadd.f32 %v4587_v46, %v4129_v59 }
 0x6f4   : > { %v3148_v3 = vadd.f32 %v4129_v59, %v3102_v27  ;;  %v4588_v24 = vpop.f32.mrb[50].mxu0 }
 0x6f5   : > { %v3105_v44 = vpop.f32.mrb[51].mxu0  ;;  %v3158_v47 = vadd.f32 %v4994_v34, %v3150_v1  ;;  %v3151_v40 = vadd.f32 %v4588_v24, %v4129_v59  ;;  %v4800_v24 = vld [vmem:[#allocation14 + $0x24] ss:$8 sps:$4 sm:$0xff]   ;;  %v4809_v34 = vld [vmem:[#allocation14 + $0x54] ss:$8 sps:$4 sm:$0xff]  }
 0x6f6   : > { %v3156_v23 = vadd.f32 %v4992_v29, %v3148_v3  ;;  %v3149_v8 = vadd.f32 %v4129_v59, %v3105_v44  ;;  %v4798_v44 = vld [vmem:[#allocation14 + $0x20] ss:$8 sps:$4 sm:$0xff]   ;;  %3399 = vmatprep.subr.bf16.mxu1 %v4800_v24 }
 0x6f7   : > { %v3159_v38 = vadd.f32 %v4995_v11, %v3151_v40  ;;  %3400 = vmatpush1.bf16.msra.mxu1 %v4798_v44  ;;  %v4812_v40 = vld [vmem:[#allocation14 + $0x64] ss:$8 sps:$4 sm:$0xff]   ;;  %v4810_v11 = vld [vmem:[#allocation14 + $0x60] ss:$8 sps:$4 sm:$0xff]  }
 0x6f8   : > { %v3157_v45 = vadd.f32 %v4993_v35, %v3149_v8  ;;  %3164 = vadd.xlane.f32.xlu0 %v3156_v23  ;;  %v4801_v8 = vld [vmem:[#allocation14 + $0x30] ss:$8 sps:$4 sm:$0xff]   ;;  %v4806_v35 = vld [vmem:[#allocation14 + $0x44] ss:$8 sps:$4 sm:$0xff]  }
 0x6fa   : > { %3166 = vadd.xlane.f32.xlu1 %v3157_v45 }
 0x6fc   : > { %3168 = vadd.xlane.f32.xlu0 %v3158_v47 }
 0x6fe   : > { %v4591_v31 = vpop.f32.mrb[52].mxu0 }
 0x6ff   : > { %v3154_v52 = vadd.f32 %v4591_v31, %v4129_v59  ;;  %v3118_v56 = vpop.f32.mrb[53].mxu0  ;;  %v4813_v31 = vld [vmem:[#allocation14 + $0x70] ss:$8 sps:$4 sm:$0xff]  }
 0x700   : > { %v3152_v15 = vadd.f32 %v4129_v59, %v3118_v56  ;;  %3170 = vadd.xlane.f32.xlu0 %v3159_v38  ;;  %v4592_v14 = vpop.f32.mrb[54].mxu0  ;;  %v4816_v56 = vld [vmem:[#allocation16 + $0x40] sm:$0xff]  }
 0x701   : > { %v3162_v53 = vadd.f32 %v4996_v20, %v3154_v52  ;;  %v3121_v21 = vpop.f32.mrb[55].mxu0  ;;  %v3155_v32 = vadd.f32 %v4592_v14, %v4129_v59  ;;  %v5358_v52 = vmov 0  }
 0x702   : > { %v3160_v48 = vadd.f32 %v4997_v19, %v3152_v15  ;;  %v3153_v63 = vadd.f32 %v4129_v59, %v3121_v21  ;;  %3427 = vmatprep.mubr.bf16.mxu1 %v5358_v52 }
 0x703   : > { %3176 = vadd.xlane.f32.xlu1 %v3162_v53  ;;  %v3163_v55 = vadd.f32 %v4999_v18, %v3155_v32 }
 0x704   : > { %3172 = vadd.xlane.f32.xlu0 %v3160_v48  ;;  %v3161_v2 = vadd.f32 %v4998_v16, %v3153_v63 }
 0x708   : > { %3174 = vadd.xlane.f32.xlu0 %v3161_v2 }
 0x70c   : > { %3178 = vadd.xlane.f32.xlu0 %v3163_v55 }
 0x785   : > { %v3165_v13 = vpop.xlane.xlu0 %3164 }
 0x786   : > { %v3181_v9 = vmul.f32 0.0078125, %v3165_v13 }
 0x787   : > { %v3167_v39 = vpop.xlane.xlu1 %3166 }
 0x788   : > { %v6518_v28 = vsub.f32 %v3156_v23, %v3181_v9  ;;  %v3182_v10 = vmul.f32 0.0078125, %v3167_v39  ;;  %v4803_v23 = vld [vmem:[#allocation14 + $0x34] ss:$8 sps:$4 sm:$0xff]  }
 0x789   : > { %v3169_v0 = vpop.xlane.xlu0 %3168  ;;  %3401 = vmatprep.subr.bf16.mxu1 %v4803_v23  ;;  %v4820_v23 = vld [vmem:[#allocation16 + $0x50] sm:$0xff]  }
 0x78a   : > { %v6520_v62 = vsub.f32 %v3157_v45, %v3182_v10  ;;  %v3183_v50 = vmul.f32 0.0078125, %v3169_v0  ;;  %v3197_v26 = vmul.f32 %v6518_v28, %v6518_v28  ;;  %3402 = vmatpush1.bf16.msra.mxu1 %v4801_v8  ;;  %v4804_v45 = vld [vmem:[#allocation14 + $0x40] ss:$8 sps:$4 sm:$0xff]  }
 0x78b   : > { %3403 = vmatprep.subr.bf16.mxu1 %v4806_v35  ;;  %v4821_v35 = vld [vmem:[#allocation16 + $0x10] sm:$0xff]  }
 0x78c   : > { %v6524_v12 = vsub.f32 %v3158_v47, %v3183_v50  ;;  %3205 = vadd.xlane.f32.xlu1 %v3197_v26  ;;  %v3198_v61 = vmul.f32 %v6520_v62, %v6520_v62  ;;  %v4807_v47 = vld [vmem:[#allocation14 + $0x50] ss:$8 sps:$4 sm:$0xff]  }
 0x78d   : > { %v3171_v30 = vpop.xlane.xlu0 %3170 }
 0x78e   : > { %v3184_v33 = vmul.f32 0.0078125, %v3171_v30  ;;  %3207 = vadd.xlane.f32.xlu0 %v3198_v61  ;;  %v3199_v58 = vmul.f32 %v6524_v12, %v6524_v12  ;;  %3404 = vmatpush1.bf16.msra.mxu1 %v4804_v45 }
 0x78f   : > { %3405 = vmatprep.subr.bf16.mxu1 %v4809_v34 }
 0x790   : > { %v6530_v57 = vsub.f32 %v3159_v38, %v3184_v33  ;;  %v3177_v43 = vpop.xlane.xlu1 %3176  ;;  %3209 = vadd.xlane.f32.xlu1 %v3199_v58  ;;  %v4815_v38 = vld [vmem:[#allocation14 + $0x74] ss:$8 sps:$4 sm:$0xff]   ;;  %v6562_v58 = vld [vmem:[%s6848_s13] ss:$0 sm:$0xff]  ;;  %s5258_s13 = scalar_lea.vmem %s6680_s22, 1024 }
 0x791   : > { %v3173_v17 = vpop.xlane.xlu0 %3172  ;;  %v3187_v7 = vmul.f32 0.0078125, %v3177_v43  ;;  %p5259_p1 = scmp.ne.s32.totalorder %s6680_s22, %s5258_s13  ;;  %p5266_p12 = scmp.lt.s32.totalorder %s5264_s27, %s5258_s13 }
 0x792   : > { %v3185_v4 = vmul.f32 0.0078125, %v3173_v17  ;;  %v3200_v41 = vmul.f32 %v6530_v57, %v6530_v57  ;;  %3406 = vmatpush1.bf16.msra.mxu1 %v4807_v47  ;;  %v4822_v47 = vld [vmem:[#allocation16 + $0x58] sm:$0xff]  }
 0x793   : > { %v6536_v5 = vsub.f32 %v3162_v53, %v3187_v7  ;;  %3407 = vmatprep.subr.bf16.mxu1 %v4812_v40  ;;  %p5260_p8 = pnand %p5259_p1, %p6855_p0  ;;  %p5267_p2 = por %p5266_p12, %p5265_p7 }
 0x794   : > { %v6534_v51 = vsub.f32 %v3160_v48, %v3185_v4  ;;  %3211 = vadd.xlane.f32.xlu0 %v3200_v41 }
 0x795   : > { %v3175_v49 = vpop.xlane.xlu0 %3174  ;;  %v3203_v27 = vmul.f32 %v6536_v5, %v6536_v5  ;;  %p5261_p4 = pneg %p5260_p8 }
 0x796   : > { %v3186_v6 = vmul.f32 0.0078125, %v3175_v49  ;;  %v3201_v25 = vmul.f32 %v6534_v51, %v6534_v51  ;;  %3408 = vmatpush1.bf16.msra.mxu1 %v4810_v11 }
 0x797   : > { %3409 = vmatprep.subr.bf16.mxu1 %v4815_v38  ;;  %p5268_p10 = pnand %p5267_p2, %p5261_p4 }
 0x798   : > { %v6540_v42 = vsub.f32 %v3161_v2, %v3186_v6  ;;  %3213 = vadd.xlane.f32.xlu1 %v3201_v25  ;;  %v4817_v25 = vld [vmem:[#allocation16] sm:$0xff]  }
 0x799   : > { %v3179_v59 = vpop.xlane.xlu0 %3178 }
 0x79a   : > { %v3188_v46 = vmul.f32 0.0078125, %v3179_v59  ;;  %v3202_v3 = vmul.f32 %v6540_v42, %v6540_v42  ;;  %3410 = vmatpush1.bf16.msra.mxu1 %v4813_v31 }
 0x79b   : > { %4305 = vmatprep.subr.bf16.mxu1 %v4816_v56 }
 0x79c   : > { %v6546_v1 = vsub.f32 %v3163_v55, %v3188_v46  ;;  %3217 = vadd.xlane.f32.xlu1 %v3203_v27  ;;  %3215 = vadd.xlane.f32.xlu0 %v3202_v3  ;;  %v4818_v27 = vld [vmem:[#allocation16 + $0x48] sm:$0xff]  }
 0x79e   : > { %v3204_v29 = vmul.f32 %v6546_v1, %v6546_v1 }
 0x7a0   : > { %3219 = vadd.xlane.f32.xlu0 %v3204_v29 }
 0x819   : > { %v3206_v15 = vpop.xlane.xlu1 %3205 }
 0x81a   : > { %v3221_v14 = vmul.f32 0.0078125, %v3206_v15 }
 0x81b   : > { %v3208_v20 = vpop.xlane.xlu0 %3207 }
 0x81c   : > { %v3229_v53 = vadd.f32 1e-05, %v3221_v14  ;;  %v3222_v21 = vmul.f32 0.0078125, %v3208_v20  ;;  %v4824_v14 = vld [vmem:[#allocation16 + $0x60] sm:$0xff]  }
 0x81d   : > { %v3210_v19 = vpop.xlane.xlu1 %3209 }
 0x81e   : > { %4960 = vrsqrt.f32 %v3229_v53  ;;  %v3230_v48 = vadd.f32 1e-05, %v3222_v21  ;;  %v3223_v63 = vmul.f32 0.0078125, %v3210_v19  ;;  %v4825_v21 = vld [vmem:[#allocation16 + $0x20] sm:$0xff]  }
 0x820   : > { %4962 = vrsqrt.f32 %v3230_v48  ;;  %v3231_v32 = vadd.f32 1e-05, %v3223_v63  ;;  %v4826_v63 = vld [vmem:[#allocation16 + $0x68] sm:$0xff]  }
 0x821   : > { %v3212_v16 = vpop.xlane.xlu0 %3211 }
 0x822   : > { %4964 = vrsqrt.f32 %v3231_v32  ;;  %v3224_v2 = vmul.f32 0.0078125, %v3212_v16  ;;  %v4827_v32 = vld [vmem:[#allocation16 + $0x28] sm:$0xff]  }
 0x824   : > { %v3232_v18 = vadd.f32 1e-05, %v3224_v2 }
 0x825   : > { %v3214_v55 = vpop.xlane.xlu1 %3213 }
 0x826   : > { %4966 = vrsqrt.f32 %v3232_v18  ;;  %v3225_v22 = vmul.f32 0.0078125, %v3214_v55  ;;  %v4828_v18 = vld [vmem:[#allocation16 + $0x70] sm:$0xff]  }
 0x827   : > { %v4829_v55 = vld [vmem:[#allocation16 + $0x30] sm:$0xff]  }
 0x828   : > { %v4961_v54 = vpop.eup %4960  ;;  %v3233_v60 = vadd.f32 1e-05, %v3225_v22  ;;  %v4830_v22 = vld [vmem:[#allocation16 + $0x78] sm:$0xff]  }
 0x829   : > { %v3245_v13 = vmul.f32 %v4961_v54, %v6518_v28  ;;  %v3218_v9 = vpop.xlane.xlu1 %3217  ;;  %v3216_v39 = vpop.xlane.xlu0 %3215  ;;  %v3307_v54 = vsub.s32 0, %v5984_v36 }
 0x82a   : > { %v4963_v10 = vpop.eup %4962  ;;  %4968 = vrsqrt.f32 %v3233_v60  ;;  %v3227_v0 = vmul.f32 0.0078125, %v3218_v9  ;;  %v3226_v50 = vmul.f32 0.0078125, %v3216_v39  ;;  %v3303_v60 = vld [vmem:[%s6849_s18] sm:$0x3] }
 0x82b   : > { %v3246_v26 = vmul.f32 %v4963_v10, %v6520_v62  ;;  %v3260_v61 = vmul.f32 %v6554_v37, %v3245_v13  ;;  %v3308_v13 = vrot.slane %v3303_v60, %v3307_v54 }
 0x82c   : > { %v4965_v30 = vpop.eup %4964  ;;  %v3234_v33 = vadd.f32 1e-05, %v3226_v50  ;;  %v3235_v43 = vadd.f32 1e-05, %v3227_v0 }
 0x82d   : > { %v3220_v17 = vpop.xlane.xlu0 %3219  ;;  %v3261_v28 = vmul.f32 %v6554_v37, %v3246_v26  ;;  %v6566_v4 = vadd.f32 %v6562_v58, %v3260_v61  ;;  %v3247_v41 = vmul.f32 %v4965_v30, %v6524_v12  ;;  %v4819_v12 = vld [vmem:[#allocation16 + $0x8] sm:$0xff]  }
 0x82e   : > { %v3228_v7 = vmul.f32 0.0078125, %v3220_v17  ;;  %4970 = vrsqrt.f32 %v3234_v33 }
 0x82f   : > { %v6569_v62 = vadd.f32 %v6562_v58, %v3261_v28  ;;  %4972 = vrsqrt.f32 %v3235_v43  ;;  %v3262_v3 = vmul.f32 %v6554_v37, %v3247_v41 }
 0x830   : > { %v4967_v49 = vpop.eup %4966  ;;  %v3236_v6 = vadd.f32 1e-05, %v3228_v7 }
 0x831   : > { %v3283_v59 = vpack.c.bf16 %v6569_v62, %v6566_v4  ;;  %v3248_v46 = vmul.f32 %v4967_v49, %v6530_v57  ;;  %v6582_v8 = vadd.f32 %v6562_v58, %v3262_v3 }
 0x832   : > { %4974 = vrsqrt.f32 %v3236_v6 }
 0x833   : > { %3428 = vmatmul.mubr.bf16.vlgmr.msra.gmra.mrb[40].mxu1 %v3283_v59  ;;  %v3263_v24 = vmul.f32 %v6554_v37, %v3248_v46 }
 0x834   : > { %v4969_v44 = vpop.eup %4968  ;;  %3437 = vmatprep.mubr.bf16.mxu1 %v5358_v52  ;;  %4306 = vmatpush3.bf16.msra.mxu1 %v4817_v25 }
 0x835   : > { %v6579_v29 = vadd.f32 %v6562_v58, %v3263_v24  ;;  %4307 = vmatprep.subr.bf16.mxu1 %v4818_v27  ;;  %v3249_v57 = vmul.f32 %v4969_v44, %v6534_v51  ;;  %v4823_v51 = vld [vmem:[#allocation16 + $0x18] sm:$0xff]  }
 0x837   : > { %v3284_v34 = vpack.c.bf16 %v6579_v29, %v6582_v8  ;;  %v3264_v38 = vmul.f32 %v6554_v37, %v3249_v57 }
 0x838   : > { %4308 = vmatpush3.bf16.msra.mxu1 %v4819_v12  ;;  %v4971_v45 = vpop.eup %4970 }
 0x839   : > { %4309 = vmatprep.subr.bf16.mxu1 %v4820_v23  ;;  %v3250_v40 = vmul.f32 %v4971_v45, %v6540_v42  ;;  %v4973_v11 = vpop.eup %4972  ;;  %v6596_v42 = vadd.f32 %v6562_v58, %v3264_v38 }
 0x83a   : > { %v3251_v53 = vmul.f32 %v4973_v11, %v6536_v5 }
 0x83b   : > { %3438 = vmatmul.mubr.bf16.gmra.mrb[44].mxu1 %v3284_v34  ;;  %v3265_v56 = vmul.f32 %v6554_v37, %v3250_v40 }
 0x83c   : > { %v4975_v31 = vpop.eup %4974  ;;  %3447 = vmatprep.mubr.bf16.mxu1 %v5358_v52  ;;  %4310 = vmatpush3.bf16.msra.mxu1 %v4821_v35 }
 0x83d   : > { %v3252_v15 = vmul.f32 %v4975_v31, %v6546_v1  ;;  %4311 = vmatprep.subr.bf16.mxu1 %v4822_v47  ;;  %v6593_v20 = vadd.f32 %v6562_v58, %v3265_v56  ;;  %v3266_v1 = vmul.f32 %v6554_v37, %v3251_v53 }
 0x83f   : > { %v3285_v19 = vpack.c.bf16 %v6593_v20, %v6596_v42  ;;  %v3267_v48 = vmul.f32 %v6554_v37, %v3252_v15  ;;  %v6608_v5 = vadd.f32 %v6562_v58, %v3266_v1  ;;  %v3311_v37 = vsub.s32 1, %v5984_v36 }
 0x840   : > { %4312 = vmatpush3.bf16.msra.mxu1 %v4823_v51 }
 0x841   : > { %4313 = vmatprep.subr.bf16.mxu1 %v4824_v14  ;;  %v6605_v16 = vadd.f32 %v6562_v58, %v3267_v48  ;;  %v3312_v9 = vrot.slane %v3303_v60, %v3311_v37 }
 0x843   : > { %3448 = vmatmul.mubr.bf16.gmra.mrb[48].mxu1 %v3285_v19  ;;  %v3286_v2 = vpack.c.bf16 %v6605_v16, %v6608_v5 }
 0x844   : > { %3457 = vmatprep.mubr.bf16.mxu1 %v5358_v52  ;;  %4314 = vmatpush3.bf16.msra.mxu1 %v4825_v21  ;;  %v4831_v52 = vld [vmem:[#allocation16 + $0x38] sm:$0xff]  }
 0x845   : > { %4315 = vmatprep.subr.bf16.mxu1 %v4826_v63 }
 0x848   : > { %4316 = vmatpush3.bf16.msra.mxu1 %v4827_v32 }
 0x849   : > { %4317 = vmatprep.subr.bf16.mxu1 %v4828_v18 }
 0x84b   : > { %3458 = vmatmul.mubr.bf16.gmra.mrb[52].mxu1 %v3286_v2 }
 0x84c   : > { %4318 = vmatpush3.bf16.msra.mxu1 %v4829_v55 }
 0x84d   : > { %4319 = vmatprep.subr.bf16.mxu1 %v4830_v22 }
 0x850   : > { %4320 = vmatpush3.bf16.msra.mxu1 %v4831_v52 }
 0x906   : > { %v3429_v39 = vpop.f32.mrb[40].mxu1 }
 0x907   : > { %v3430_v10 = vadd.f32 %v3429_v39, %v3308_v13  ;;  %v3431_v0 = vpop.f32.mrb[41].mxu1 }
 0x908   : > { %v3432_v50 = vadd.f32 %v3431_v0, %v3312_v9  ;;  %v3433_v26 = vpop.f32.mrb[42].mxu1 }
 0x909   : > { %v3434_v61 = vadd.f32 %v3433_v26, %v3308_v13  ;;  %v3435_v30 = vpop.f32.mrb[43].mxu1  ;;  %v3468_v58 = vmax.f32 %v3430_v10, 0.0 }
 0x90a   : > { %v3436_v33 = vadd.f32 %v3435_v30, %v3312_v9  ;;  %v3469_v17 = vmax.f32 %v3432_v50, 0.0  ;;  %v4148_v50 = vld [vmem:[%s6850_s25] ss:$0 sm:$0xff] }
 0x90b   : > { %v3470_v43 = vmax.f32 %v3434_v61, 0.0 }
 0x90c   : > { %v3471_v28 = vmax.f32 %v3436_v33, 0.0 }
 0x90d   : > { %v3484_v7 = vpack.c.bf16 %v3470_v43, %v3468_v58 }
 0x90e   : > { %v3485_v41 = vpack.c.bf16 %v3471_v28, %v3469_v17  ;;  %v3439_v49 = vpop.f32.mrb[44].mxu1 }
 0x90f   : > { %v3440_v6 = vadd.f32 %v3439_v49, %v3308_v13  ;;  %v3441_v25 = vpop.f32.mrb[45].mxu1 }
 0x910   : > { %v3442_v36 = vadd.f32 %v3441_v25, %v3312_v9  ;;  %v3443_v59 = vpop.f32.mrb[46].mxu1  ;;  %3659 = vmatprep.mubr.bf16.mxu1 %v3485_v41 }
 0x911   : > { %v3444_v46 = vadd.f32 %v3443_v59, %v3308_v13  ;;  %v3445_v27 = vpop.f32.mrb[47].mxu1  ;;  %3660 = vmatmul.mubr.bf16.vlgmr.msra.gmra.mrb[56].mxu1 %v3484_v7  ;;  %v3472_v24 = vmax.f32 %v3440_v6, 0.0 }
 0x912   : > { %v3446_v3 = vadd.f32 %v3445_v27, %v3312_v9  ;;  %v3473_v12 = vmax.f32 %v3442_v36, 0.0 }
 0x913   : > { %v3474_v44 = vmax.f32 %v3444_v46, 0.0 }
 0x914   : > { %v3475_v23 = vmax.f32 %v3446_v3, 0.0 }
 0x915   : > { %v3486_v57 = vpack.c.bf16 %v3474_v44, %v3472_v24 }
 0x916   : > { %v3487_v35 = vpack.c.bf16 %v3475_v23, %v3473_v12  ;;  %v3449_v45 = vpop.f32.mrb[48].mxu1 }
 0x917   : > { %v3450_v34 = vadd.f32 %v3449_v45, %v3308_v13  ;;  %v3451_v47 = vpop.f32.mrb[49].mxu1 }
 0x918   : > { %v3452_v40 = vadd.f32 %v3451_v47, %v3312_v9  ;;  %v3453_v11 = vpop.f32.mrb[50].mxu1  ;;  %3667 = vmatprep.mubr.bf16.mxu1 %v3487_v35 }
 0x919   : > { %v3454_v38 = vadd.f32 %v3453_v11, %v3308_v13  ;;  %v3455_v31 = vpop.f32.mrb[51].mxu1  ;;  %3668 = vmatmul.mubr.bf16.gmra.mrb[60].mxu1 %v3486_v57  ;;  %v3476_v51 = vmax.f32 %v3450_v34, 0.0 }
 0x91a   : > { %v3456_v56 = vadd.f32 %v3455_v31, %v3312_v9  ;;  %v3477_v14 = vmax.f32 %v3452_v40, 0.0 }
 0x91b   : > { %v3478_v15 = vmax.f32 %v3454_v38, 0.0 }
 0x91c   : > { %v3479_v53 = vmax.f32 %v3456_v56, 0.0 }
 0x91d   : > { %v3488_v21 = vpack.c.bf16 %v3478_v15, %v3476_v51 }
 0x91e   : > { %v3489_v19 = vpack.c.bf16 %v3479_v53, %v3477_v14  ;;  %v3459_v48 = vpop.f32.mrb[52].mxu1 }
 0x91f   : > { %v3460_v63 = vadd.f32 %v3459_v48, %v3308_v13  ;;  %v3461_v1 = vpop.f32.mrb[53].mxu1 }
 0x920   : > { %v3462_v32 = vadd.f32 %v3461_v1, %v3312_v9  ;;  %v3463_v2 = vpop.f32.mrb[54].mxu1  ;;  %3675 = vmatprep.mubr.bf16.mxu1 %v3489_v19 }
 0x921   : > { %v3464_v18 = vadd.f32 %v3463_v2, %v3308_v13  ;;  %v3465_v55 = vpop.f32.mrb[55].mxu1  ;;  %3676 = vmatmul.mubr.bf16.gmra.mrb[64].mxu1 %v3488_v21  ;;  %v3480_v52 = vmax.f32 %v3460_v63, 0.0 }
 0x922   : > { %v3466_v22 = vadd.f32 %v3465_v55, %v3312_v9  ;;  %v3481_v60 = vmax.f32 %v3462_v32, 0.0 }
 0x923   : > { %v3482_v54 = vmax.f32 %v3464_v18, 0.0 }
 0x924   : > { %v3483_v37 = vmax.f32 %v3466_v22, 0.0 }
 0x925   : > { %v3490_v39 = vpack.c.bf16 %v3482_v54, %v3480_v52 }
 0x926   : > { %v3491_v10 = vpack.c.bf16 %v3483_v37, %v3481_v60 }
 0x928   : > { %3683 = vmatprep.mubr.bf16.mxu1 %v3491_v10 }
 0x929   : > { %3684 = vmatmul.mubr.bf16.gmra.mrb[68].mxu1 %v3490_v39 }
 0x9e4   : > { %v4321_v0 = vpop.f32.mrb[56].mxu1 }
 0x9e5   : > { %v4322_v26 = vpop.f32.mrb[57].mxu1 }
 0x9e6   : > { %v4323_v61 = vadd.f32 %v4322_v26, %v4321_v0  ;;  %v4324_v30 = vpop.f32.mrb[58].mxu1 }
 0x9e7   : > { %v4325_v13 = vpop.f32.mrb[59].mxu1 }
 0x9e8   : > { %v3662_v33 = vadd.f32 %v4323_v61, %v4148_v50  ;;  %v4326_v58 = vadd.f32 %v4325_v13, %v4324_v30 }
 0x9ea   : > { %v3665_v9 = vadd.f32 %v4326_v58, %v4148_v50  ;;  %v3692_v43 = vadd.f32 %v3662_v33, %v6566_v4 }
 0x9ec   : > { %v4327_v17 = vpop.f32.mrb[60].mxu1  ;;  %3700 = vadd.xlane.f32.xlu1 %v3692_v43  ;;  %v3693_v28 = vadd.f32 %v3665_v9, %v6569_v62 }
 0x9ed   : > { %v4328_v7 = vpop.f32.mrb[61].mxu1 }
 0x9ee   : > { %v4329_v41 = vadd.f32 %v4328_v7, %v4327_v17  ;;  %v4330_v49 = vpop.f32.mrb[62].mxu1  ;;  %3702 = vadd.xlane.f32.xlu0 %v3693_v28 }
 0x9ef   : > { %v4331_v6 = vpop.f32.mrb[63].mxu1 }
 0x9f0   : > { %v3670_v25 = vadd.f32 %v4329_v41, %v4148_v50  ;;  %v4332_v36 = vadd.f32 %v4331_v6, %v4330_v49 }
 0x9f2   : > { %v3673_v59 = vadd.f32 %v4332_v36, %v4148_v50  ;;  %v3694_v46 = vadd.f32 %v3670_v25, %v6582_v8 }
 0x9f4   : > { %v4333_v27 = vpop.f32.mrb[64].mxu1  ;;  %3704 = vadd.xlane.f32.xlu1 %v3694_v46  ;;  %v3695_v3 = vadd.f32 %v3673_v59, %v6579_v29 }
 0x9f5   : > { %v4334_v24 = vpop.f32.mrb[65].mxu1 }
 0x9f6   : > { %v4335_v4 = vadd.f32 %v4334_v24, %v4333_v27  ;;  %v4336_v44 = vpop.f32.mrb[66].mxu1  ;;  %3706 = vadd.xlane.f32.xlu0 %v3695_v3  ;;  %v4165_v24 = vld [vmem:[%s6851_s16] ss:$0 sm:$0xff] }
 0x9f7   : > { %v4337_v12 = vpop.f32.mrb[67].mxu1 }
 0x9f8   : > { %v3678_v62 = vadd.f32 %v4335_v4, %v4148_v50  ;;  %v4338_v23 = vadd.f32 %v4337_v12, %v4336_v44 }
 0x9fa   : > { %v3681_v57 = vadd.f32 %v4338_v23, %v4148_v50  ;;  %v3696_v35 = vadd.f32 %v3678_v62, %v6596_v42  ;;  %v4166_v62 = vld [vmem:[%s6852_s28] ss:$0 sm:$0xff] }
 0x9fc   : > { %3708 = vadd.xlane.f32.xlu1 %v3696_v35  ;;  %v4339_v45 = vpop.f32.mrb[68].mxu1  ;;  %v3697_v34 = vadd.f32 %v3681_v57, %v6593_v20 }
 0x9fd   : > { %v4340_v47 = vpop.f32.mrb[69].mxu1 }
 0x9fe   : > { %v4341_v8 = vadd.f32 %v4340_v47, %v4339_v45  ;;  %3710 = vadd.xlane.f32.xlu0 %v3697_v34  ;;  %v4342_v40 = vpop.f32.mrb[70].mxu1 }
 0x9ff   : > { %v4343_v11 = vpop.f32.mrb[71].mxu1 }
 0xa00   : > { %v3686_v29 = vadd.f32 %v4341_v8, %v4148_v50  ;;  %v4344_v38 = vadd.f32 %v4343_v11, %v4342_v40 }
 0xa02   : > { %v3689_v31 = vadd.f32 %v4344_v38, %v4148_v50  ;;  %v3698_v56 = vadd.f32 %v3686_v29, %v6608_v5 }
 0xa04   : > { %3712 = vadd.xlane.f32.xlu1 %v3698_v56  ;;  %v3699_v51 = vadd.f32 %v3689_v31, %v6605_v16 }
 0xa06   : > { %3714 = vadd.xlane.f32.xlu0 %v3699_v51 }
 0xa79   : > { %v3701_v15 = vpop.xlane.xlu1 %3700 }
 0xa7a   : > { %v3716_v42 = vmul.f32 0.0078125, %v3701_v15 }
 0xa7b   : > { %v3703_v14 = vpop.xlane.xlu0 %3702 }
 0xa7c   : > { %v3724_v53 = vsub.f32 %v3692_v43, %v3716_v42  ;;  %v3717_v21 = vmul.f32 0.0078125, %v3703_v14 }
 0xa7e   : > { %v3725_v20 = vsub.f32 %v3693_v28, %v3717_v21  ;;  %v3732_v19 = vmul.f32 %v3724_v53, %v3724_v53 }
 0xa80   : > { %3740 = vadd.xlane.f32.xlu1 %v3732_v19  ;;  %v3733_v48 = vmul.f32 %v3725_v20, %v3725_v20 }
 0xa81   : > { %v3705_v63 = vpop.xlane.xlu1 %3704 }
 0xa82   : > { %v3718_v1 = vmul.f32 0.0078125, %v3705_v63  ;;  %3742 = vadd.xlane.f32.xlu0 %v3733_v48 }
 0xa83   : > { %v3707_v32 = vpop.xlane.xlu0 %3706 }
 0xa84   : > { %v6628_v2 = vsub.f32 %v3694_v46, %v3718_v1  ;;  %v3719_v5 = vmul.f32 0.0078125, %v3707_v32 }
 0xa86   : > { %v6630_v18 = vsub.f32 %v3695_v3, %v3719_v5  ;;  %v3734_v16 = vmul.f32 %v6628_v2, %v6628_v2 }
 0xa88   : > { %3744 = vadd.xlane.f32.xlu1 %v3734_v16  ;;  %v3735_v55 = vmul.f32 %v6630_v18, %v6630_v18 }
 0xa89   : > { %v3709_v22 = vpop.xlane.xlu1 %3708 }
 0xa8a   : > { %v3720_v52 = vmul.f32 0.0078125, %v3709_v22  ;;  %3746 = vadd.xlane.f32.xlu0 %v3735_v55 }
 0xa8b   : > { %v3711_v54 = vpop.xlane.xlu0 %3710 }
 0xa8c   : > { %v6636_v60 = vsub.f32 %v3696_v35, %v3720_v52  ;;  %v3721_v37 = vmul.f32 0.0078125, %v3711_v54 }
 0xa8e   : > { %v6638_v39 = vsub.f32 %v3697_v34, %v3721_v37  ;;  %v3736_v10 = vmul.f32 %v6636_v60, %v6636_v60 }
 0xa90   : > { %3748 = vadd.xlane.f32.xlu1 %v3736_v10  ;;  %v3737_v0 = vmul.f32 %v6638_v39, %v6638_v39 }
 0xa91   : > { %v3713_v50 = vpop.xlane.xlu1 %3712 }
 0xa92   : > { %v3722_v26 = vmul.f32 0.0078125, %v3713_v50  ;;  %3750 = vadd.xlane.f32.xlu0 %v3737_v0 }
 0xa93   : > { %v3715_v61 = vpop.xlane.xlu0 %3714 }
 0xa94   : > { %v6644_v30 = vsub.f32 %v3698_v56, %v3722_v26  ;;  %v3723_v13 = vmul.f32 0.0078125, %v3715_v61 }
 0xa96   : > { %v6646_v33 = vsub.f32 %v3699_v51, %v3723_v13  ;;  %v3738_v58 = vmul.f32 %v6644_v30, %v6644_v30 }
 0xa98   : > { %3752 = vadd.xlane.f32.xlu1 %v3738_v58  ;;  %v3739_v9 = vmul.f32 %v6646_v33, %v6646_v33 }
 0xa9a   : > { %3754 = vadd.xlane.f32.xlu0 %v3739_v9 }
 0xb0d   : > { %v3741_v43 = vpop.xlane.xlu1 %3740 }
 0xb0e   : > { %v3756_v17 = vmul.f32 0.0078125, %v3741_v43 }
 0xb0f   : > { %v3743_v28 = vpop.xlane.xlu0 %3742 }
 0xb10   : > { %v3764_v7 = vadd.f32 1e-05, %v3756_v17  ;;  %v3757_v41 = vmul.f32 0.0078125, %v3743_v28 }
 0xb12   : > { %4976 = vrsqrt.f32 %v3764_v7  ;;  %v3765_v49 = vadd.f32 1e-05, %v3757_v41 }
 0xb14   : > { %4978 = vrsqrt.f32 %v3765_v49 }
 0xb15   : > { %v3745_v6 = vpop.xlane.xlu1 %3744 }
 0xb16   : > { %v3758_v25 = vmul.f32 0.0078125, %v3745_v6 }
 0xb17   : > { %v3747_v36 = vpop.xlane.xlu0 %3746 }
 0xb18   : > { %v3766_v59 = vadd.f32 1e-05, %v3758_v25  ;;  %v3759_v46 = vmul.f32 0.0078125, %v3747_v36 }
 0xb1a   : > { %4980 = vrsqrt.f32 %v3766_v59  ;;  %v3767_v27 = vadd.f32 1e-05, %v3759_v46 }
 0xb1c   : > { %v4977_v3 = vpop.eup %4976  ;;  %4982 = vrsqrt.f32 %v3767_v27 }
 0xb1d   : > { %v3780_v4 = vmul.f32 %v4977_v3, %v3724_v53  ;;  %v3749_v44 = vpop.xlane.xlu1 %3748 }
 0xb1e   : > { %v4979_v12 = vpop.eup %4978  ;;  %v3760_v23 = vmul.f32 0.0078125, %v3749_v44 }
 0xb1f   : > { %v3795_v57 = vmul.f32 %v4165_v24, %v3780_v4  ;;  %v3781_v35 = vmul.f32 %v4979_v12, %v3725_v20  ;;  %v3751_v45 = vpop.xlane.xlu0 %3750 }
 0xb20   : > { %v3768_v34 = vadd.f32 1e-05, %v3760_v23  ;;  %v3761_v47 = vmul.f32 0.0078125, %v3751_v45 }
 0xb21   : > { %v3810_v8 = vadd.f32 %v4166_v62, %v3795_v57  ;;  %v3796_v40 = vmul.f32 %v4165_v24, %v3781_v35 }
 0xb22   : > { %4984 = vrsqrt.f32 %v3768_v34  ;;  %v3769_v11 = vadd.f32 1e-05, %v3761_v47 }
 0xb23   : > { %3818 = vst [vmem:[%s6659_s12] sm:$0xff] %v3810_v8  ;;  %v3811_v29 = vadd.f32 %v4166_v62, %v3796_v40 }
 0xb24   : > { %v4981_v38 = vpop.eup %4980  ;;  %4986 = vrsqrt.f32 %v3769_v11 }
 0xb25   : > { %3819 = vst [vmem:[%s6659_s12 + $0x8] sm:$0xff] %v3811_v29  ;;  %v3782_v31 = vmul.f32 %v4981_v38, %v6628_v2  ;;  %v3753_v56 = vpop.xlane.xlu1 %3752 }
 0xb26   : > { %v4983_v51 = vpop.eup %4982  ;;  %v3762_v15 = vmul.f32 0.0078125, %v3753_v56 }
 0xb27   : > { %v3797_v42 = vmul.f32 %v4165_v24, %v3782_v31  ;;  %v3783_v14 = vmul.f32 %v4983_v51, %v6630_v18  ;;  %v3755_v53 = vpop.xlane.xlu0 %3754 }
 0xb28   : > { %v3770_v21 = vadd.f32 1e-05, %v3762_v15  ;;  %v3763_v20 = vmul.f32 0.0078125, %v3755_v53 }
 0xb29   : > { %v3812_v19 = vadd.f32 %v4166_v62, %v3797_v42  ;;  %v3798_v48 = vmul.f32 %v4165_v24, %v3783_v14 }
 0xb2a   : > { %4988 = vrsqrt.f32 %v3770_v21  ;;  %v3771_v63 = vadd.f32 1e-05, %v3763_v20 }
 0xb2b   : > { %3820 = vst [vmem:[%s6659_s12 + $0x10] sm:$0xff] %v3812_v19  ;;  %v3813_v1 = vadd.f32 %v4166_v62, %v3798_v48 }
 0xb2c   : > { %v4985_v32 = vpop.eup %4984  ;;  %4990 = vrsqrt.f32 %v3771_v63 }
 0xb2d   : > { %3821 = vst [vmem:[%s6659_s12 + $0x18] sm:$0xff] %v3813_v1  ;;  %v3784_v2 = vmul.f32 %v4985_v32, %v6636_v60 }
 0xb2e   : > { %v4987_v5 = vpop.eup %4986 }
 0xb2f   : > { %v3799_v18 = vmul.f32 %v4165_v24, %v3784_v2  ;;  %v3785_v16 = vmul.f32 %v4987_v5, %v6638_v39 }
 0xb31   : > { %v3814_v55 = vadd.f32 %v4166_v62, %v3799_v18  ;;  %v3800_v22 = vmul.f32 %v4165_v24, %v3785_v16 }
 0xb33   : > { %3822 = vst [vmem:[%s6659_s12 + $0x20] sm:$0xff] %v3814_v55  ;;  %v3815_v52 = vadd.f32 %v4166_v62, %v3800_v22 }
 0xb34   : > { %v4989_v54 = vpop.eup %4988 }
 0xb35   : > { %3823 = vst [vmem:[%s6659_s12 + $0x28] sm:$0xff] %v3815_v52  ;;  %v3786_v37 = vmul.f32 %v4989_v54, %v6644_v30 }
 0xb36   : > { %v4991_v10 = vpop.eup %4990 }
 0xb37   : > { %v3801_v0 = vmul.f32 %v4165_v24, %v3786_v37  ;;  %v3787_v60 = vmul.f32 %v4991_v10, %v6646_v33 }
 0xb39   : > { %v3816_v50 = vadd.f32 %v4166_v62, %v3801_v0  ;;  %v3802_v39 = vmul.f32 %v4165_v24, %v3787_v60 }
 0xb3b   : > { %3824 = vst [vmem:[%s6659_s12 + $0x30] sm:$0xff] %v3816_v50  ;;  %v3817_v26 = vadd.f32 %v4166_v62, %v3802_v39 }
 0xb3d   : > { %3825 = vst [vmem:[%s6659_s12 + $0x38] sm:$0xff] %v3817_v26 }
 0xb3e   : > { %5271 = shalt.err (!%p5268_p10)
}
 0xb3f   : > { %s5272_s18 = scalar_lea.hbm %s6678_s7, 1024  ;;  %s5276_s25 = scalar_lea.hbm %s6854_s3, 2048 }
 0xb40   : > { %p5273_p6 = scmp.ne.s32.totalorder %s6678_s7, %s5272_s18  ;;  %p5277_p9 = scmp.lt.u32.totalorder %s6678_s7, %s6854_s3 }
 0xb41   : > { %p5278_p11 = scmp.lt.u32.totalorder %s5276_s25, %s5272_s18  ;;  %p5280_p1 = scmp.lt.u32.totalorder %s5272_s18, %s6678_s7 }
 0xb42   : > { %p5274_p13 = pnand %p5273_p6, %p6855_p0 }
 0xb43   : > { %p5279_p3 = por %p5278_p11, %p5277_p9 }
 0xb44   : > { %p5275_p5 = pneg %p5274_p13 }
 0xb45   : > { %p5281_p8 = por %p5280_p1, %p5279_p3 }
 0xb47   : > { %p5282_p4 = pnand %p5281_p8, %p5275_p5 }
 0xb49   : > { %5285 = shalt.err (!%p5282_p4)
}
 0xb4a   : > { %s5360_s16 = smov 128   ;;  %s5361_s14 = smov 8  }
 0xb4b   : > { %4663 = dma.vmem_to_hbm [thread:$0]  (%p6855_p0), %s6680_s22, 1024, %s6678_s7, %s3827_s23, %s5360_s16, %s5360_s16, %s5361_s14  }
 0xb4c PF: > { %s6856_s21 = sld [smem:[#allocation24_spill]]  ;;  %s6857_s28 = sld [smem:[#allocation29_spill]] }
 0xb4d   : > { %s6858_s12 = sld [smem:[#allocation25_spill]] }
 0xb52   : > { %s3856_s5 = sand.u32 1, %s6856_s21   ;;  %p6859_p7 = scmp.ne.s32.totalorder %s6857_s28, 0 }
 0xb53   : > { %p6860_p12 = scmp.ge.s32.totalorder %s6858_s12, 2  ;;  %s3857_s24 = scalar_lea.sflag [#allocation4], %s3856_s5 }
 0xb55   : > { %p4695_p2 = pnand %p6860_p12, %p6859_p7 }
 0xb57   : > { %5323 = dma.done.wait (!%p4695_p2), %s3857_s24, 1024  }
 0xb58   : > { %5325 = vsyncadd (!%p4695_p2), %s3857_s24, 4294966272  ;;  %s6861_s21 = sld [smem:[#allocation26_spill]]  ;;  %s6862_s29 = sld [smem:[#allocation27_spill]] }
 0xb59   : > { %s6863_s0 = smov %s5332_s30  ;;  %s6864_s30 = smov %s5336_s20 }
 0xb5e   : > { %p38_p10 = scmp.ge.s32.totalorder %s6861_s21, 4   ;;  %s6865_s20 = smov %s6862_s29 }
 0xb60   :  { %40 = sbr.rel (!%p38_p10) target bundleno = 28 (0x1c), region = 189 }
 0xb67   :  { %3862 = vsyncpa [#allocation3], 1 }
 0xb68   :  { %3864 = vsyncpa [#allocation3 + $0x1], 1 }
 0xb69   :  { %3865 = vsyncpa [#allocation6], 1 }
 0xb6a   :  { %3867 = vsyncpa [#allocation6 + $0x1], 1 }
 0xb6b   :  { %3868 = vsyncpa [#allocation9], 1 }
 0xb6c   :  { %3869 = vsyncpa [#allocation12], 1 }
 0xb6d   :  { %3870 = vsyncpa [#allocation15], 1 }
 0xb6e   :  { %3871 = vsyncpa [#allocation4], 1 }
 0xb6f   :  { %3873 = vsyncpa [#allocation4 + $0x1], 1 }

</bundles_post_ra>
